<compile_context>
chip_gen: v7x
topology: tpu7x:2x2x1
jax: 0.10.0
libtpu: 0.0.40
codegen_flags: <defaults>
</compile_context>

<pallas_src>
import jax
import jax.numpy as jnp
from jax.experimental import pallas as pl
from jax.experimental.pallas import tpu as pltpu

IN_DIM = 28 * 28     # 784 logical input features (kept unpadded)
HID = 512
OUT_DIM = 10         # logical logits
OUT_PAD = 128        # lane-dense padded head width


def mlp_kernel(x_ref, w1_ref, b1_ref, *rest):
    """Fused (Linear+ReLU) x 6 then Linear.

    fc1: bf16 weights.  fc2..fc7: int8 weights (weight-only quant) dequantized
    to bf16 in VMEM before each MXU dot, per-output-channel scale folded into
    the f32 accumulator.  All accumulation is f32.
    """
    o_ref = rest[-1]
    qrefs = rest[:-1]                      # (w_int8, scale_f32, bias_f32) x 6

    h = x_ref[...].astype(jnp.bfloat16)    # (bt, 784) cast done in-kernel

    # fc1 — bf16 weights, unpadded K=784.
    y = jnp.dot(h, w1_ref[...], preferred_element_type=jnp.float32) + b1_ref[...]
    h = jnp.maximum(y, 0.0).astype(jnp.bfloat16)

    # fc2 .. fc7 — int8 weights + per-channel scale (|q| <= 127 is exact in bf16).
    for li in range(6):
        w_ref, s_ref, b_ref = qrefs[3 * li], qrefs[3 * li + 1], qrefs[3 * li + 2]
        wq = w_ref[...].astype(jnp.float32).astype(jnp.bfloat16)
        y = jnp.dot(h, wq, preferred_element_type=jnp.float32) * s_ref[...] + b_ref[...]
        if li < 5:
            h = jnp.maximum(y, 0.0).astype(jnp.bfloat16)
        else:
            o_ref[...] = y.astype(o_ref.dtype)


def _batch_tile(B):
    """Per-generation batch tile: 256 fills the v6e/v7x 256-wide MXU, 128 on v5e.
    Small batches use a single 8-aligned tile (kernel is weight-DMA bound there)."""
    kind = jax.devices()[0].device_kind.lower()
    big = 128 if "v5" in kind else 256
    if B <= big:
        return max(8, ((B + 7) // 8) * 8)
    return big


@jax.jit
def mlp_forward(x, packed):
    """x: (B, 784) f32.  packed: kernel-packed params from pack_params_for_kernel.
    Returns (B, 10) f32 logits."""
    B = x.shape[0]
    bt = _batch_tile(B)
    n_tiles = pl.cdiv(B, bt)
    B_pad = n_tiles * bt
    xp = x if B_pad == B else jnp.pad(x, ((0, B_pad - B), (0, 0)))

    x_spec = pl.BlockSpec((bt, IN_DIM), lambda i: (i, 0))
    # Grid-invariant whole-array blocks: fetched once, stay resident across steps.
    param_specs = [pl.BlockSpec(p.shape, lambda i: (0, 0)) for p in packed]
    out_spec = pl.BlockSpec((bt, OUT_PAD), lambda i: (i, 0))

    # Only request cross-core parallelism when there is enough real work; a
    # "parallel" batch axis on v7x duplicates the weight DMA into both cores.
    semantics = ("parallel",) if n_tiles >= 4 else ("arbitrary",)

    flops = 2 * B_pad * (IN_DIM * HID + 5 * HID * HID + HID * OUT_PAD)
    bytes_accessed = (sum(int(p.size) * p.dtype.itemsize for p in packed)
                      + B_pad * IN_DIM * 4 + B_pad * OUT_PAD * 4)

    out = pl.pallas_call(
        mlp_kernel,
        out_shape=jax.ShapeDtypeStruct((B_pad, OUT_PAD), jnp.float32),
        grid_spec=pltpu.PrefetchScalarGridSpec(
            num_scalar_prefetch=0,
            grid=(n_tiles,),
            in_specs=[x_spec] + param_specs,
            out_specs=out_spec,
        ),
        compiler_params=pltpu.CompilerParams(
            dimension_semantics=semantics,
            vmem_limit_bytes=32 << 20,
        ),
        cost_estimate=pl.CostEstimate(
            flops=flops, transcendentals=0, bytes_accessed=bytes_accessed),
    )(xp, *packed)

    return out[:B, :OUT_DIM]


def init_params(key):
    """Logical f32 params mirroring nn.Linear's uniform init.
    Weights stored as (in, out) i.e. PyTorch W.T; biases as (1, out)."""
    dims = [(IN_DIM, HID)] + [(HID, HID)] * 5 + [(HID, OUT_DIM)]
    params = []
    for fan_in, fan_out in dims:
        key, kw, kb = jax.random.split(key, 3)
        bound = 1.0 / jnp.sqrt(fan_in)
        w = jax.random.uniform(kw, (fan_in, fan_out), jnp.float32, -bound, bound)
        b = jax.random.uniform(kb, (1, fan_out), jnp.float32, -bound, bound)
        params += [w, b]
    return tuple(params)


def _quantize_cols(w):
    """Per-output-channel symmetric int8 quantization."""
    amax = jnp.max(jnp.abs(w), axis=0, keepdims=True)
    scale = jnp.where(amax > 0, amax, 1.0) / 127.0
    q = jnp.clip(jnp.round(w / scale), -127.0, 127.0).astype(jnp.int8)
    return q, scale.astype(jnp.float32)


def pack_params_for_kernel(params):
    """One-time packing (outside the per-call hot path):
      fc1: bf16 (784, 512) weight + f32 (1, 512) bias.
      fc2..fc7: int8 weight + f32 per-channel scale + f32 bias.
      fc7 zero-padded to 128 output lanes (scale 1 / bias 0 in the pad)."""
    packed = [params[0].astype(jnp.bfloat16), params[1]]
    for i in range(1, 7):
        w, b = params[2 * i], params[2 * i + 1]
        q, s = _quantize_cols(w)
        if i == 6:
            q = jnp.zeros((HID, OUT_PAD), jnp.int8).at[:, :OUT_DIM].set(q)
            s = jnp.ones((1, OUT_PAD), jnp.float32).at[:, :OUT_DIM].set(s)
            b = jnp.zeros((1, OUT_PAD), jnp.float32).at[:, :OUT_DIM].set(b)
        packed += [q, s, b]
    return tuple(packed)


def reference_forward(x, packed):
    """Pure-JAX reference with identical numerics (bf16 activations, int8
    weight-only quant, f32 accumulation)."""
    h = x.astype(jnp.bfloat16)
    y = jnp.dot(h, packed[0], preferred_element_type=jnp.float32) + packed[1]
    h = jnp.maximum(y, 0.0).astype(jnp.bfloat16)
    for li in range(6):
        w, s, b = packed[2 + 3 * li: 2 + 3 * li + 3]
        wq = w.astype(jnp.float32).astype(jnp.bfloat16)
        y = jnp.dot(h, wq, preferred_element_type=jnp.float32) * s + b
        if li < 5:
            h = jnp.maximum(y, 0.0).astype(jnp.bfloat16)
    return y[:, :OUT_DIM]


if __name__ == "__main__":
    key = jax.random.PRNGKey(0)
    kx, kp = jax.random.split(key)

    B = 16  # images arrive as (B, 1, 28, 28) and are flattened, as in Net.forward
    x_img = jax.random.normal(kx, (B, 1, 28, 28), jnp.float32)
    x = x_img.reshape(-1, IN_DIM)          # x.view(-1, 28*28)

    params = init_params(kp)
    packed = pack_params_for_kernel(params)

    out = jax.block_until_ready(mlp_forward(x, packed))
    ref = reference_forward(x, packed)

    assert out.shape == (B, OUT_DIM)
    assert jnp.allclose(out, ref, atol=2e-2, rtol=2e-2), "kernel/reference mismatch"

    print("KERNEL_OK")
</pallas_src>

<mosaic_0001>
module attributes {stable_mosaic.version = 11 : i64} {
  func.func @mlp_kernel(%arg0: i32, %arg1: memref<16x784xf32, #tpu.memory_space<vmem>>, %arg2: memref<784x512xbf16, #tpu.memory_space<vmem>>, %arg3: memref<1x512xf32, #tpu.memory_space<vmem>>, %arg4: memref<512x512xi8, #tpu.memory_space<vmem>>, %arg5: memref<1x512xf32, #tpu.memory_space<vmem>>, %arg6: memref<1x512xf32, #tpu.memory_space<vmem>>, %arg7: memref<512x512xi8, #tpu.memory_space<vmem>>, %arg8: memref<1x512xf32, #tpu.memory_space<vmem>>, %arg9: memref<1x512xf32, #tpu.memory_space<vmem>>, %arg10: memref<512x512xi8, #tpu.memory_space<vmem>>, %arg11: memref<1x512xf32, #tpu.memory_space<vmem>>, %arg12: memref<1x512xf32, #tpu.memory_space<vmem>>, %arg13: memref<512x512xi8, #tpu.memory_space<vmem>>, %arg14: memref<1x512xf32, #tpu.memory_space<vmem>>, %arg15: memref<1x512xf32, #tpu.memory_space<vmem>>, %arg16: memref<512x512xi8, #tpu.memory_space<vmem>>, %arg17: memref<1x512xf32, #tpu.memory_space<vmem>>, %arg18: memref<1x512xf32, #tpu.memory_space<vmem>>, %arg19: memref<512x128xi8, #tpu.memory_space<vmem>>, %arg20: memref<1x128xf32, #tpu.memory_space<vmem>>, %arg21: memref<1x128xf32, #tpu.memory_space<vmem>>, %arg22: memref<16x128xf32, #tpu.memory_space<vmem>>) attributes {dimension_semantics = [#tpu.dimension_semantics<arbitrary>], iteration_bounds = array<i64: 1>, scalar_prefetch = 0 : i64, scratch_operands = 0 : i64, tpu.core_type = #tpu.core_type<tc>, window_params = [{transform_indices = @transform_0, window_bounds = array<i64: 16, 784>}, {pipeline_mode = #tpu.pipeline_mode<synchronous>, transform_indices = @transform_1, window_bounds = array<i64: 784, 512>}, {pipeline_mode = #tpu.pipeline_mode<synchronous>, transform_indices = @transform_2, window_bounds = array<i64: 1, 512>}, {pipeline_mode = #tpu.pipeline_mode<synchronous>, transform_indices = @transform_3, window_bounds = array<i64: 512, 512>}, {pipeline_mode = #tpu.pipeline_mode<synchronous>, transform_indices = @transform_4, window_bounds = array<i64: 1, 512>}, {pipeline_mode = #tpu.pipeline_mode<synchronous>, transform_indices = @transform_5, window_bounds = array<i64: 1, 512>}, {pipeline_mode = #tpu.pipeline_mode<synchronous>, transform_indices = @transform_6, window_bounds = array<i64: 512, 512>}, {pipeline_mode = #tpu.pipeline_mode<synchronous>, transform_indices = @transform_7, window_bounds = array<i64: 1, 512>}, {pipeline_mode = #tpu.pipeline_mode<synchronous>, transform_indices = @transform_8, window_bounds = array<i64: 1, 512>}, {pipeline_mode = #tpu.pipeline_mode<synchronous>, transform_indices = @transform_9, window_bounds = array<i64: 512, 512>}, {pipeline_mode = #tpu.pipeline_mode<synchronous>, transform_indices = @transform_10, window_bounds = array<i64: 1, 512>}, {pipeline_mode = #tpu.pipeline_mode<synchronous>, transform_indices = @transform_11, window_bounds = array<i64: 1, 512>}, {pipeline_mode = #tpu.pipeline_mode<synchronous>, transform_indices = @transform_12, window_bounds = array<i64: 512, 512>}, {pipeline_mode = #tpu.pipeline_mode<synchronous>, transform_indices = @transform_13, window_bounds = array<i64: 1, 512>}, {pipeline_mode = #tpu.pipeline_mode<synchronous>, transform_indices = @transform_14, window_bounds = array<i64: 1, 512>}, {pipeline_mode = #tpu.pipeline_mode<synchronous>, transform_indices = @transform_15, window_bounds = array<i64: 512, 512>}, {pipeline_mode = #tpu.pipeline_mode<synchronous>, transform_indices = @transform_16, window_bounds = array<i64: 1, 512>}, {pipeline_mode = #tpu.pipeline_mode<synchronous>, transform_indices = @transform_17, window_bounds = array<i64: 1, 512>}, {pipeline_mode = #tpu.pipeline_mode<synchronous>, transform_indices = @transform_18, window_bounds = array<i64: 512, 128>}, {pipeline_mode = #tpu.pipeline_mode<synchronous>, transform_indices = @transform_19, window_bounds = array<i64: 1, 128>}, {pipeline_mode = #tpu.pipeline_mode<synchronous>, transform_indices = @transform_20, window_bounds = array<i64: 1, 128>}, {transform_indices = @transform_21, window_bounds = array<i64: 16, 128>}]} {
    %c0 = arith.constant 0 : index
    %c0_0 = arith.constant 0 : index
    %0 = vector.load %arg1[%c0, %c0_0] : memref<16x784xf32, #tpu.memory_space<vmem>>, vector<16x784xf32>
    %1 = arith.truncf %0 : vector<16x784xf32> to vector<16x784xbf16>
    %c0_1 = arith.constant 0 : index
    %c0_2 = arith.constant 0 : index
    %2 = vector.load %arg2[%c0_1, %c0_2] : memref<784x512xbf16, #tpu.memory_space<vmem>>, vector<784x512xbf16>
    %cst = arith.constant dense<0.000000e+00> : vector<16x512xf32>
    %3 = tpu.matmul %1, %2, %cst {dimension_numbers = #tpu.dot_dimension_numbers<[1], [0], [0], [1], [0, 0, 1, 1], [], []>} : vector<16x784xbf16>, vector<784x512xbf16>, vector<16x512xf32> -> vector<16x512xf32>
    %c0_3 = arith.constant 0 : index
    %c0_4 = arith.constant 0 : index
    %4 = vector.load %arg3[%c0_3, %c0_4] : memref<1x512xf32, #tpu.memory_space<vmem>>, vector<1x512xf32>
    %5 = vector.broadcast %4 : vector<1x512xf32> to vector<16x512xf32>
    %6 = arith.addf %3, %5 : vector<16x512xf32>
    %cst_5 = arith.constant 0.000000e+00 : f32
    %7 = vector.broadcast %cst_5 : f32 to vector<16x512xf32>
    %8 = arith.maximumf %6, %7 : vector<16x512xf32>
    %9 = arith.truncf %8 : vector<16x512xf32> to vector<16x512xbf16>
    %c0_6 = arith.constant 0 : index
    %c0_7 = arith.constant 0 : index
    %10 = vector.load %arg4[%c0_6, %c0_7] : memref<512x512xi8, #tpu.memory_space<vmem>>, vector<512x512xi8>
    %11 = arith.sitofp %10 : vector<512x512xi8> to vector<512x512xf32>
    %12 = arith.truncf %11 : vector<512x512xf32> to vector<512x512xbf16>
    %cst_8 = arith.constant dense<0.000000e+00> : vector<16x512xf32>
    %13 = tpu.matmul %9, %12, %cst_8 {dimension_numbers = #tpu.dot_dimension_numbers<[1], [0], [0], [1], [0, 0, 1, 1], [], []>} : vector<16x512xbf16>, vector<512x512xbf16>, vector<16x512xf32> -> vector<16x512xf32>
    %c0_9 = arith.constant 0 : index
    %c0_10 = arith.constant 0 : index
    %14 = vector.load %arg5[%c0_9, %c0_10] : memref<1x512xf32, #tpu.memory_space<vmem>>, vector<1x512xf32>
    %15 = vector.broadcast %14 : vector<1x512xf32> to vector<16x512xf32>
    %16 = arith.mulf %13, %15 : vector<16x512xf32>
    %c0_11 = arith.constant 0 : index
    %c0_12 = arith.constant 0 : index
    %17 = vector.load %arg6[%c0_11, %c0_12] : memref<1x512xf32, #tpu.memory_space<vmem>>, vector<1x512xf32>
    %18 = vector.broadcast %17 : vector<1x512xf32> to vector<16x512xf32>
    %19 = arith.addf %16, %18 : vector<16x512xf32>
    %cst_13 = arith.constant 0.000000e+00 : f32
    %20 = vector.broadcast %cst_13 : f32 to vector<16x512xf32>
    %21 = arith.maximumf %19, %20 : vector<16x512xf32>
    %22 = arith.truncf %21 : vector<16x512xf32> to vector<16x512xbf16>
    %c0_14 = arith.constant 0 : index
    %c0_15 = arith.constant 0 : index
    %23 = vector.load %arg7[%c0_14, %c0_15] : memref<512x512xi8, #tpu.memory_space<vmem>>, vector<512x512xi8>
    %24 = arith.sitofp %23 : vector<512x512xi8> to vector<512x512xf32>
    %25 = arith.truncf %24 : vector<512x512xf32> to vector<512x512xbf16>
    %cst_16 = arith.constant dense<0.000000e+00> : vector<16x512xf32>
    %26 = tpu.matmul %22, %25, %cst_16 {dimension_numbers = #tpu.dot_dimension_numbers<[1], [0], [0], [1], [0, 0, 1, 1], [], []>} : vector<16x512xbf16>, vector<512x512xbf16>, vector<16x512xf32> -> vector<16x512xf32>
    %c0_17 = arith.constant 0 : index
    %c0_18 = arith.constant 0 : index
    %27 = vector.load %arg8[%c0_17, %c0_18] : memref<1x512xf32, #tpu.memory_space<vmem>>, vector<1x512xf32>
    %28 = vector.broadcast %27 : vector<1x512xf32> to vector<16x512xf32>
    %29 = arith.mulf %26, %28 : vector<16x512xf32>
    %c0_19 = arith.constant 0 : index
    %c0_20 = arith.constant 0 : index
    %30 = vector.load %arg9[%c0_19, %c0_20] : memref<1x512xf32, #tpu.memory_space<vmem>>, vector<1x512xf32>
    %31 = vector.broadcast %30 : vector<1x512xf32> to vector<16x512xf32>
    %32 = arith.addf %29, %31 : vector<16x512xf32>
    %cst_21 = arith.constant 0.000000e+00 : f32
    %33 = vector.broadcast %cst_21 : f32 to vector<16x512xf32>
    %34 = arith.maximumf %32, %33 : vector<16x512xf32>
    %35 = arith.truncf %34 : vector<16x512xf32> to vector<16x512xbf16>
    %c0_22 = arith.constant 0 : index
    %c0_23 = arith.constant 0 : index
    %36 = vector.load %arg10[%c0_22, %c0_23] : memref<512x512xi8, #tpu.memory_space<vmem>>, vector<512x512xi8>
    %37 = arith.sitofp %36 : vector<512x512xi8> to vector<512x512xf32>
    %38 = arith.truncf %37 : vector<512x512xf32> to vector<512x512xbf16>
    %cst_24 = arith.constant dense<0.000000e+00> : vector<16x512xf32>
    %39 = tpu.matmul %35, %38, %cst_24 {dimension_numbers = #tpu.dot_dimension_numbers<[1], [0], [0], [1], [0, 0, 1, 1], [], []>} : vector<16x512xbf16>, vector<512x512xbf16>, vector<16x512xf32> -> vector<16x512xf32>
    %c0_25 = arith.constant 0 : index
    %c0_26 = arith.constant 0 : index
    %40 = vector.load %arg11[%c0_25, %c0_26] : memref<1x512xf32, #tpu.memory_space<vmem>>, vector<1x512xf32>
    %41 = vector.broadcast %40 : vector<1x512xf32> to vector<16x512xf32>
    %42 = arith.mulf %39, %41 : vector<16x512xf32>
    %c0_27 = arith.constant 0 : index
    %c0_28 = arith.constant 0 : index
    %43 = vector.load %arg12[%c0_27, %c0_28] : memref<1x512xf32, #tpu.memory_space<vmem>>, vector<1x512xf32>
    %44 = vector.broadcast %43 : vector<1x512xf32> to vector<16x512xf32>
    %45 = arith.addf %42, %44 : vector<16x512xf32>
    %cst_29 = arith.constant 0.000000e+00 : f32
    %46 = vector.broadcast %cst_29 : f32 to vector<16x512xf32>
    %47 = arith.maximumf %45, %46 : vector<16x512xf32>
    %48 = arith.truncf %47 : vector<16x512xf32> to vector<16x512xbf16>
    %c0_30 = arith.constant 0 : index
    %c0_31 = arith.constant 0 : index
    %49 = vector.load %arg13[%c0_30, %c0_31] : memref<512x512xi8, #tpu.memory_space<vmem>>, vector<512x512xi8>
    %50 = arith.sitofp %49 : vector<512x512xi8> to vector<512x512xf32>
    %51 = arith.truncf %50 : vector<512x512xf32> to vector<512x512xbf16>
    %cst_32 = arith.constant dense<0.000000e+00> : vector<16x512xf32>
    %52 = tpu.matmul %48, %51, %cst_32 {dimension_numbers = #tpu.dot_dimension_numbers<[1], [0], [0], [1], [0, 0, 1, 1], [], []>} : vector<16x512xbf16>, vector<512x512xbf16>, vector<16x512xf32> -> vector<16x512xf32>
    %c0_33 = arith.constant 0 : index
    %c0_34 = arith.constant 0 : index
    %53 = vector.load %arg14[%c0_33, %c0_34] : memref<1x512xf32, #tpu.memory_space<vmem>>, vector<1x512xf32>
    %54 = vector.broadcast %53 : vector<1x512xf32> to vector<16x512xf32>
    %55 = arith.mulf %52, %54 : vector<16x512xf32>
    %c0_35 = arith.constant 0 : index
    %c0_36 = arith.constant 0 : index
    %56 = vector.load %arg15[%c0_35, %c0_36] : memref<1x512xf32, #tpu.memory_space<vmem>>, vector<1x512xf32>
    %57 = vector.broadcast %56 : vector<1x512xf32> to vector<16x512xf32>
    %58 = arith.addf %55, %57 : vector<16x512xf32>
    %cst_37 = arith.constant 0.000000e+00 : f32
    %59 = vector.broadcast %cst_37 : f32 to vector<16x512xf32>
    %60 = arith.maximumf %58, %59 : vector<16x512xf32>
    %61 = arith.truncf %60 : vector<16x512xf32> to vector<16x512xbf16>
    %c0_38 = arith.constant 0 : index
    %c0_39 = arith.constant 0 : index
    %62 = vector.load %arg16[%c0_38, %c0_39] : memref<512x512xi8, #tpu.memory_space<vmem>>, vector<512x512xi8>
    %63 = arith.sitofp %62 : vector<512x512xi8> to vector<512x512xf32>
    %64 = arith.truncf %63 : vector<512x512xf32> to vector<512x512xbf16>
    %cst_40 = arith.constant dense<0.000000e+00> : vector<16x512xf32>
    %65 = tpu.matmul %61, %64, %cst_40 {dimension_numbers = #tpu.dot_dimension_numbers<[1], [0], [0], [1], [0, 0, 1, 1], [], []>} : vector<16x512xbf16>, vector<512x512xbf16>, vector<16x512xf32> -> vector<16x512xf32>
    %c0_41 = arith.constant 0 : index
    %c0_42 = arith.constant 0 : index
    %66 = vector.load %arg17[%c0_41, %c0_42] : memref<1x512xf32, #tpu.memory_space<vmem>>, vector<1x512xf32>
    %67 = vector.broadcast %66 : vector<1x512xf32> to vector<16x512xf32>
    %68 = arith.mulf %65, %67 : vector<16x512xf32>
    %c0_43 = arith.constant 0 : index
    %c0_44 = arith.constant 0 : index
    %69 = vector.load %arg18[%c0_43, %c0_44] : memref<1x512xf32, #tpu.memory_space<vmem>>, vector<1x512xf32>
    %70 = vector.broadcast %69 : vector<1x512xf32> to vector<16x512xf32>
    %71 = arith.addf %68, %70 : vector<16x512xf32>
    %cst_45 = arith.constant 0.000000e+00 : f32
    %72 = vector.broadcast %cst_45 : f32 to vector<16x512xf32>
    %73 = arith.maximumf %71, %72 : vector<16x512xf32>
    %74 = arith.truncf %73 : vector<16x512xf32> to vector<16x512xbf16>
    %c0_46 = arith.constant 0 : index
    %c0_47 = arith.constant 0 : index
    %75 = vector.load %arg19[%c0_46, %c0_47] : memref<512x128xi8, #tpu.memory_space<vmem>>, vector<512x128xi8>
    %76 = arith.sitofp %75 : vector<512x128xi8> to vector<512x128xf32>
    %77 = arith.truncf %76 : vector<512x128xf32> to vector<512x128xbf16>
    %cst_48 = arith.constant dense<0.000000e+00> : vector<16x128xf32>
    %78 = tpu.matmul %74, %77, %cst_48 {dimension_numbers = #tpu.dot_dimension_numbers<[1], [0], [0], [1], [0, 0, 1, 1], [], []>} : vector<16x512xbf16>, vector<512x128xbf16>, vector<16x128xf32> -> vector<16x128xf32>
    %c0_49 = arith.constant 0 : index
    %c0_50 = arith.constant 0 : index
    %79 = vector.load %arg20[%c0_49, %c0_50] : memref<1x128xf32, #tpu.memory_space<vmem>>, vector<1x128xf32>
    %80 = vector.broadcast %79 : vector<1x128xf32> to vector<16x128xf32>
    %81 = arith.mulf %78, %80 : vector<16x128xf32>
    %c0_51 = arith.constant 0 : index
    %c0_52 = arith.constant 0 : index
    %82 = vector.load %arg21[%c0_51, %c0_52] : memref<1x128xf32, #tpu.memory_space<vmem>>, vector<1x128xf32>
    %83 = vector.broadcast %82 : vector<1x128xf32> to vector<16x128xf32>
    %84 = arith.addf %81, %83 : vector<16x128xf32>
    %c0_53 = arith.constant 0 : index
    %c0_54 = arith.constant 0 : index
    %85 = vector.load %arg22[%c0_53, %c0_54] : memref<16x128xf32, #tpu.memory_space<vmem>>, vector<16x128xf32>
    tpu.vector_store %arg22[%c0_53, %c0_54], %84 {strides = array<i32>} : memref<16x128xf32, #tpu.memory_space<vmem>>, vector<16x128xf32>,
    return
  }
  func.func @transform_0(%arg0: i32) -> (i32, i32) {
    %c0_i32 = arith.constant 0 : i32
    %c0_i32_0 = arith.constant 0 : i32
    return %arg0, %c0_i32 : i32, i32
  }
  func.func @transform_1(%arg0: i32) -> (i32, i32) {
    %c0_i32 = arith.constant 0 : i32
    %c0_i32_0 = arith.constant 0 : i32
    %c0_i32_1 = arith.constant 0 : i32
    return %c0_i32, %c0_i32_0 : i32, i32
  }
  func.func @transform_2(%arg0: i32) -> (i32, i32) {
    %c0_i32 = arith.constant 0 : i32
    %c0_i32_0 = arith.constant 0 : i32
    %c0_i32_1 = arith.constant 0 : i32
    return %c0_i32, %c0_i32_0 : i32, i32
  }
  func.func @transform_3(%arg0: i32) -> (i32, i32) {
    %c0_i32 = arith.constant 0 : i32
    %c0_i32_0 = arith.constant 0 : i32
    %c0_i32_1 = arith.constant 0 : i32
    return %c0_i32, %c0_i32_0 : i32, i32
  }
  func.func @transform_4(%arg0: i32) -> (i32, i32) {
    %c0_i32 = arith.constant 0 : i32
    %c0_i32_0 = arith.constant 0 : i32
    %c0_i32_1 = arith.constant 0 : i32
    return %c0_i32, %c0_i32_0 : i32, i32
  }
  func.func @transform_5(%arg0: i32) -> (i32, i32) {
    %c0_i32 = arith.constant 0 : i32
    %c0_i32_0 = arith.constant 0 : i32
    %c0_i32_1 = arith.constant 0 : i32
    return %c0_i32, %c0_i32_0 : i32, i32
  }
  func.func @transform_6(%arg0: i32) -> (i32, i32) {
    %c0_i32 = arith.constant 0 : i32
    %c0_i32_0 = arith.constant 0 : i32
    %c0_i32_1 = arith.constant 0 : i32
    return %c0_i32, %c0_i32_0 : i32, i32
  }
  func.func @transform_7(%arg0: i32) -> (i32, i32) {
    %c0_i32 = arith.constant 0 : i32
    %c0_i32_0 = arith.constant 0 : i32
    %c0_i32_1 = arith.constant 0 : i32
    return %c0_i32, %c0_i32_0 : i32, i32
  }
  func.func @transform_8(%arg0: i32) -> (i32, i32) {
    %c0_i32 = arith.constant 0 : i32
    %c0_i32_0 = arith.constant 0 : i32
    %c0_i32_1 = arith.constant 0 : i32
    return %c0_i32, %c0_i32_0 : i32, i32
  }
  func.func @transform_9(%arg0: i32) -> (i32, i32) {
    %c0_i32 = arith.constant 0 : i32
    %c0_i32_0 = arith.constant 0 : i32
    %c0_i32_1 = arith.constant 0 : i32
    return %c0_i32, %c0_i32_0 : i32, i32
  }
  func.func @transform_10(%arg0: i32) -> (i32, i32) {
    %c0_i32 = arith.constant 0 : i32
    %c0_i32_0 = arith.constant 0 : i32
    %c0_i32_1 = arith.constant 0 : i32
    return %c0_i32, %c0_i32_0 : i32, i32
  }
  func.func @transform_11(%arg0: i32) -> (i32, i32) {
    %c0_i32 = arith.constant 0 : i32
    %c0_i32_0 = arith.constant 0 : i32
    %c0_i32_1 = arith.constant 0 : i32
    return %c0_i32, %c0_i32_0 : i32, i32
  }
  func.func @transform_12(%arg0: i32) -> (i32, i32) {
    %c0_i32 = arith.constant 0 : i32
    %c0_i32_0 = arith.constant 0 : i32
    %c0_i32_1 = arith.constant 0 : i32
    return %c0_i32, %c0_i32_0 : i32, i32
  }
  func.func @transform_13(%arg0: i32) -> (i32, i32) {
    %c0_i32 = arith.constant 0 : i32
    %c0_i32_0 = arith.constant 0 : i32
    %c0_i32_1 = arith.constant 0 : i32
    return %c0_i32, %c0_i32_0 : i32, i32
  }
  func.func @transform_14(%arg0: i32) -> (i32, i32) {
    %c0_i32 = arith.constant 0 : i32
    %c0_i32_0 = arith.constant 0 : i32
    %c0_i32_1 = arith.constant 0 : i32
    return %c0_i32, %c0_i32_0 : i32, i32
  }
  func.func @transform_15(%arg0: i32) -> (i32, i32) {
    %c0_i32 = arith.constant 0 : i32
    %c0_i32_0 = arith.constant 0 : i32
    %c0_i32_1 = arith.constant 0 : i32
    return %c0_i32, %c0_i32_0 : i32, i32
  }
  func.func @transform_16(%arg0: i32) -> (i32, i32) {
    %c0_i32 = arith.constant 0 : i32
    %c0_i32_0 = arith.constant 0 : i32
    %c0_i32_1 = arith.constant 0 : i32
    return %c0_i32, %c0_i32_0 : i32, i32
  }
  func.func @transform_17(%arg0: i32) -> (i32, i32) {
    %c0_i32 = arith.constant 0 : i32
    %c0_i32_0 = arith.constant 0 : i32
    %c0_i32_1 = arith.constant 0 : i32
    return %c0_i32, %c0_i32_0 : i32, i32
  }
  func.func @transform_18(%arg0: i32) -> (i32, i32) {
    %c0_i32 = arith.constant 0 : i32
    %c0_i32_0 = arith.constant 0 : i32
    %c0_i32_1 = arith.constant 0 : i32
    return %c0_i32, %c0_i32_0 : i32, i32
  }
  func.func @transform_19(%arg0: i32) -> (i32, i32) {
    %c0_i32 = arith.constant 0 : i32
    %c0_i32_0 = arith.constant 0 : i32
    %c0_i32_1 = arith.constant 0 : i32
    return %c0_i32, %c0_i32_0 : i32, i32
  }
  func.func @transform_20(%arg0: i32) -> (i32, i32) {
    %c0_i32 = arith.constant 0 : i32
    %c0_i32_0 = arith.constant 0 : i32
    %c0_i32_1 = arith.constant 0 : i32
    return %c0_i32, %c0_i32_0 : i32, i32
  }
  func.func @transform_21(%arg0: i32) -> (i32, i32) {
    %c0_i32 = arith.constant 0 : i32
    %c0_i32_0 = arith.constant 0 : i32
    return %arg0, %c0_i32 : i32, i32
  }
}

</mosaic_0001>

<bundles_post_ra>
// kernel: mlp_forward.1
= control target key start
LH: loop header
LB: loop body
LE: loop exit
PB: predicated region body
PF: predicated region fallthrough
CT: control target
= control target key end

     0   :  { %s5369_s0 = inlined_call_operand.hbm [shape: f32[16,784], index: 0, kind: input, shape index: {}]   ;;  %s5370_s1 = inlined_call_operand.hbm [shape: bf16[784,512], index: 1, kind: input, shape index: {}]   ;;  %s5371_s2 = inlined_call_operand.vmem [shape: f32[1,512], index: 2, kind: input, shape index: {}]   ;;  %s5372_s3 = inlined_call_operand.hbm [shape: s8[512,512], index: 3, kind: input, shape index: {}]   ;;  %s5373_s4 = inlined_call_operand.vmem [shape: f32[1,512], index: 4, kind: input, shape index: {}]   ;;  %s5374_s5 = inlined_call_operand.vmem [shape: f32[1,512], index: 5, kind: input, shape index: {}]   ;;  %s5375_s6 = inlined_call_operand.hbm [shape: s8[512,512], index: 6, kind: input, shape index: {}]   ;;  %s5376_s7 = inlined_call_operand.vmem [shape: f32[1,512], index: 7, kind: input, shape index: {}]   ;;  %s5377_s8 = inlined_call_operand.vmem [shape: f32[1,512], index: 8, kind: input, shape index: {}]   ;;  %s5378_s9 = inlined_call_operand.hbm [shape: s8[512,512], index: 9, kind: input, shape index: {}]   ;;  %s5379_s10 = inlined_call_operand.vmem [shape: f32[1,512], index: 10, kind: input, shape index: {}]   ;;  %s5380_s11 = inlined_call_operand.vmem [shape: f32[1,512], index: 11, kind: input, shape index: {}]   ;;  %s5381_s12 = inlined_call_operand.hbm [shape: s8[512,512], index: 12, kind: input, shape index: {}]   ;;  %s5382_s13 = inlined_call_operand.vmem [shape: f32[1,512], index: 13, kind: input, shape index: {}]   ;;  %s5383_s14 = inlined_call_operand.vmem [shape: f32[1,512], index: 14, kind: input, shape index: {}]   ;;  %s5384_s15 = inlined_call_operand.hbm [shape: s8[512,512], index: 15, kind: input, shape index: {}]   ;;  %s5385_s16 = inlined_call_operand.vmem [shape: f32[1,512], index: 16, kind: input, shape index: {}]   ;;  %s5386_s17 = inlined_call_operand.vmem [shape: f32[1,512], index: 17, kind: input, shape index: {}]   ;;  %s5387_s18 = inlined_call_operand.hbm [shape: s8[512,128], index: 18, kind: input, shape index: {}]   ;;  %s5388_s19 = inlined_call_operand.vmem [shape: f32[1,128], index: 19, kind: input, shape index: {}]   ;;  %s5389_s20 = inlined_call_operand.vmem [shape: f32[1,128], index: 20, kind: input, shape index: {}]   ;;  %s5390_s21 = inlined_call_operand.hbm [shape: f32[16,128], index: 21, kind: output, shape index: {}]  }
   0x1   :  { %5397 = sst [smem:[#allocation23_spill]] %s5369_s0 }
   0x2   :  { %5398 = sst [smem:[#allocation24_spill]] %s5370_s1 }
   0x3   :  { %5399 = sst [smem:[#allocation25_spill]] %s5371_s2 }
   0x4   :  { %5400 = sst [smem:[#allocation26_spill]] %s5372_s3 }
   0x5   :  { %5401 = sst [smem:[#allocation27_spill]] %s5373_s4 }
   0x6   :  { %5402 = sst [smem:[#allocation28_spill]] %s5374_s5 }
   0x7   :  { %5403 = sst [smem:[#allocation29_spill]] %s5389_s20 }
   0x8   :  { %5404 = sst [smem:[#allocation30_spill]] %s5390_s21 }
   0x9   :  { %26 = vsyncpa [#allocation3], 0 }
   0xa   :  { %27 = vsyncpa [#allocation6], 0 }
   0xb   :  { %28 = vsyncpa [#allocation9], 0 }
   0xc   :  { %29 = vsyncpa [#allocation12], 0 }
   0xd   :  { %30 = vsyncpa [#allocation15], 0 }
   0xe   :  { %31 = vsyncpa [#allocation4], 0  ;;  %s4947_s2 = smov [#allocation5]   ;;  %s5405_s3 = sld [smem:[#allocation24_spill]] }
   0xf   :  { %s49_s25 = sshll.u32 %s4947_s2, 4  ;;  %s50_s25 = int_to_ptr.vmem [resolvable:$true] %s49_s25 }
  0x14   :  { %s4737_s28 = scalar_lea.hbm %s5405_s3, 25088 }
  0x15   :  { %p4738_p0 = scmp.ne.s32.totalorder %s5405_s3, %s4737_s28  ;;  %p4741_p1 = scmp.lt.u32.totalorder %s4737_s28, %s5405_s3 }
  0x17   :  { %p4743_p2 = pnand %p4741_p1, %p4738_p0 }
  0x19   :  { %4746 = shalt.err (!%p4743_p2)
}
  0x1a   :  { %s4747_s5 = scalar_lea.vmem %s50_s25, 25088  ;;  %p4752_p4 = scmp.lt.s32.totalorder %s50_s25, %s50_s25 }
  0x1b   :  { %p4748_p3 = scmp.ne.s32.totalorder %s50_s25, %s4747_s5  ;;  %p4753_p5 = scmp.lt.s32.totalorder %s4747_s5, %s4747_s5 }
  0x1d   :  { %p4754_p6 = por %p4753_p5, %p4752_p4 }
  0x1f   :  { %p4755_p7 = pnand %p4754_p6, %p4748_p3 }
  0x21   :  { %4758 = shalt.err (!%p4755_p7)
}
  0x22   :  { %s4948_s22 = smov 256   ;;  %s4949_s23 = smov 16  }
  0x23   :  { %55 = dma.hbm_to_vmem [thread:$0]  %s5405_s3, 25088, %s50_s25, [#allocation6], %s4948_s22, %s4948_s22, %s4949_s23  }
  0x24   :  { %s4950_s2 = smov [#allocation8]   ;;  %s4951_s27 = smov [#allocation11]  }
  0x25   :  { %s79_s26 = sshll.u32 %s4950_s2, 4  ;;  %s111_s28 = sshll.u32 %s4951_s27, 4  ;;  %s80_s26 = int_to_ptr.vmem [resolvable:$true] %s79_s26  ;;  %s112_s28 = int_to_ptr.vmem [resolvable:$true] %s111_s28 }
  0x26   :  { %s4759_s4 = scalar_lea.hbm %s5375_s6, 8192 }
  0x27   :  { %p4760_p8 = scmp.ne.s32.totalorder %s5375_s6, %s4759_s4  ;;  %p4763_p9 = scmp.lt.u32.totalorder %s4759_s4, %s5375_s6 }
  0x29   :  { %p4765_p10 = pnand %p4763_p9, %p4760_p8 }
  0x2b   :  { %4768 = shalt.err (!%p4765_p10)
}
  0x2c   :  { %s4769_s25 = scalar_lea.vmem %s80_s26, 8192  ;;  %p4774_p12 = scmp.lt.s32.totalorder %s80_s26, %s80_s26 }
  0x2d   :  { %p4770_p11 = scmp.ne.s32.totalorder %s80_s26, %s4769_s25  ;;  %p4775_p13 = scmp.lt.s32.totalorder %s4769_s25, %s4769_s25 }
  0x2f   :  { %p4776_p0 = por %p4775_p13, %p4774_p12 }
  0x31   :  { %p4777_p1 = pnand %p4776_p0, %p4770_p11 }
  0x33   :  { %4780 = shalt.err (!%p4777_p1)
}
  0x34   :  { %s5395_s3 = smov 512   ;;  %s4953_s22 = smov 32  }
  0x35   :  { %85 = dma.hbm_to_vmem [thread:$0]  %s5375_s6, 8192, %s80_s26, [#allocation9], %s5395_s3, %s5395_s3, %s4953_s22  }
  0x36   :  { %s4781_s24 = scalar_lea.hbm %s5381_s12, 8192 }
  0x37   :  { %p4782_p2 = scmp.ne.s32.totalorder %s5381_s12, %s4781_s24  ;;  %p4785_p3 = scmp.lt.u32.totalorder %s4781_s24, %s5381_s12 }
  0x39   :  { %p4787_p4 = pnand %p4785_p3, %p4782_p2 }
  0x3b   :  { %4790 = shalt.err (!%p4787_p4)
}
  0x3c   :  { %s4791_s4 = scalar_lea.vmem %s112_s28, 8192  ;;  %p4796_p6 = scmp.lt.s32.totalorder %s112_s28, %s112_s28 }
  0x3d   :  { %p4792_p5 = scmp.ne.s32.totalorder %s112_s28, %s4791_s4  ;;  %p4797_p7 = scmp.lt.s32.totalorder %s4791_s4, %s4791_s4 }
  0x3f   :  { %p4798_p8 = por %p4797_p7, %p4796_p6 }
  0x41   :  { %p4799_p9 = pnand %p4798_p8, %p4792_p5 }
  0x43   :  { %4802 = shalt.err (!%p4799_p9)
}
  0x44   :  { %117 = dma.hbm_to_vmem [thread:$0]  %s5381_s12, 8192, %s112_s28, [#allocation12], %s5395_s3, %s5395_s3, %s4953_s22  }
  0x45   :  { %s4954_s30 = smov [#allocation2]   ;;  %s5406_s1 = sld [smem:[#allocation23_spill]] }
  0x46   :  { %s37_s5 = sshll.u32 %s4954_s30, 4  ;;  %s38_s5 = int_to_ptr.vmem [resolvable:$true] %s37_s5 }
  0x4b   :  { %s4803_s20 = scalar_lea.hbm %s5406_s1, 1792 }
  0x4c   :  { %p4804_p10 = scmp.ne.s32.totalorder %s5406_s1, %s4803_s20  ;;  %p4807_p11 = scmp.lt.u32.totalorder %s4803_s20, %s5406_s1 }
  0x4e   :  { %p4809_p12 = pnand %p4807_p11, %p4804_p10 }
  0x50   :  { %4812 = shalt.err (!%p4809_p12)
}
  0x51   :  { %s4813_s29 = scalar_lea.vmem %s38_s5, 1792  ;;  %p4818_p0 = scmp.lt.s32.totalorder %s38_s5, %s38_s5 }
  0x52   :  { %p4814_p13 = scmp.ne.s32.totalorder %s38_s5, %s4813_s29  ;;  %p4819_p1 = scmp.lt.s32.totalorder %s4813_s29, %s4813_s29 }
  0x54   :  { %p4820_p2 = por %p4819_p1, %p4818_p0 }
  0x56   :  { %p4821_p3 = pnand %p4820_p2, %p4814_p13 }
  0x58   :  { %4824 = shalt.err (!%p4821_p3)
}
  0x59   :  { %s4955_s12 = smov 896   ;;  %s4956_s28 = smov 56  }
  0x5a   :  { %43 = dma.hbm_to_vmem [thread:$0]  %s5406_s1, 1792, %s38_s5, [#allocation3], %s4955_s12, %s4955_s12, %s4956_s28  }
  0x5b   :  { %s4957_s6 = smov [#allocation7]   ;;  %s4958_s30 = smov [#allocation10]  }
  0x5c   :  { %s63_s26 = sshll.u32 %s4957_s6, 4  ;;  %s95_s25 = sshll.u32 %s4958_s30, 4  ;;  %s64_s26 = int_to_ptr.vmem [resolvable:$true] %s63_s26  ;;  %s5129_s25 = int_to_ptr.vmem [resolvable:$true] %s95_s25 }
  0x5d   :  { %s5407_s21 = sld [smem:[#allocation26_spill]] }
  0x63   :  { %s4825_s24 = scalar_lea.hbm %s5407_s21, 8192 }
  0x64   :  { %p4826_p4 = scmp.ne.s32.totalorder %s5407_s21, %s4825_s24  ;;  %p4829_p5 = scmp.lt.u32.totalorder %s4825_s24, %s5407_s21 }
  0x66   :  { %p4831_p6 = pnand %p4829_p5, %p4826_p4 }
  0x68   :  { %4834 = shalt.err (!%p4831_p6)
}
  0x69   :  { %s4835_s5 = scalar_lea.vmem %s64_s26, 8192  ;;  %p4840_p8 = scmp.lt.s32.totalorder %s64_s26, %s64_s26 }
  0x6a   :  { %p4836_p7 = scmp.ne.s32.totalorder %s64_s26, %s4835_s5  ;;  %p4841_p9 = scmp.lt.s32.totalorder %s4835_s5, %s4835_s5 }
  0x6c   :  { %p4842_p10 = por %p4841_p9, %p4840_p8 }
  0x6e   :  { %p4843_p11 = pnand %p4842_p10, %p4836_p7 }
  0x70   :  { %4846 = shalt.err (!%p4843_p11)
}
  0x71   :  { %s5408_s1 = smov 512   ;;  %s4847_s3 = scalar_lea.hbm %s5378_s9, 8192 }
  0x72   :  { %69 = dma.hbm_to_vmem [thread:$0]  %s5407_s21, 8192, %s64_s26, [#allocation6], %s5408_s1, %s5408_s1, %s4953_s22  }
  0x73   :  { %p4848_p12 = scmp.ne.s32.totalorder %s5378_s9, %s4847_s3  ;;  %p4851_p13 = scmp.lt.u32.totalorder %s4847_s3, %s5378_s9 }
  0x75   :  { %p4853_p0 = pnand %p4851_p13, %p4848_p12 }
  0x77   :  { %4856 = shalt.err (!%p4853_p0)
}
  0x78   :  { %s4857_s24 = scalar_lea.vmem %s5129_s25, 8192  ;;  %p4862_p2 = scmp.lt.s32.totalorder %s5129_s25, %s5129_s25 }
  0x79   :  { %p4858_p1 = scmp.ne.s32.totalorder %s5129_s25, %s4857_s24  ;;  %p4863_p3 = scmp.lt.s32.totalorder %s4857_s24, %s4857_s24 }
  0x7b   :  { %p4864_p4 = por %p4863_p3, %p4862_p2 }
  0x7d   :  { %p4865_p5 = pnand %p4864_p4, %p4858_p1 }
  0x7f   :  { %4868 = shalt.err (!%p4865_p5)
}
  0x80   :  { %101 = dma.hbm_to_vmem [thread:$0]  %s5378_s9, 8192, %s5129_s25, [#allocation9], %s5408_s1, %s5408_s1, %s4953_s22  }
  0x81   :  { %s4959_s2 = smov [#allocation13]   ;;  %s4960_s29 = smov [#allocation14]  }
  0x82   :  { %s127_s27 = sshll.u32 %s4959_s2, 4  ;;  %s143_s5 = sshll.u32 %s4960_s29, 4  ;;  %s128_s27 = int_to_ptr.vmem [resolvable:$true] %s127_s27  ;;  %s5166_s5 = int_to_ptr.vmem [resolvable:$true] %s143_s5 }
  0x83   :  { %s4869_s0 = scalar_lea.hbm %s5384_s15, 8192 }
  0x84   :  { %p4870_p6 = scmp.ne.s32.totalorder %s5384_s15, %s4869_s0  ;;  %p4873_p7 = scmp.lt.u32.totalorder %s4869_s0, %s5384_s15 }
  0x86   :  { %p4875_p8 = pnand %p4873_p7, %p4870_p6 }
  0x88   :  { %4878 = shalt.err (!%p4875_p8)
}
  0x89   :  { %s4879_s9 = scalar_lea.vmem %s128_s27, 8192  ;;  %p4884_p10 = scmp.lt.s32.totalorder %s128_s27, %s128_s27 }
  0x8a   :  { %p4880_p9 = scmp.ne.s32.totalorder %s128_s27, %s4879_s9  ;;  %p4885_p11 = scmp.lt.s32.totalorder %s4879_s9, %s4879_s9 }
  0x8c   :  { %p4886_p12 = por %p4885_p11, %p4884_p10 }
  0x8e   :  { %p4887_p13 = pnand %p4886_p12, %p4880_p9 }
  0x90   :  { %4890 = shalt.err (!%p4887_p13)
}
  0x91   :  { %133 = dma.hbm_to_vmem [thread:$0]  %s5384_s15, 8192, %s128_s27, [#allocation12], %s5408_s1, %s5408_s1, %s4953_s22  }
  0x92   :  { %s4891_s26 = scalar_lea.hbm %s5387_s18, 2048 }
  0x93   :  { %p4892_p0 = scmp.ne.s32.totalorder %s5387_s18, %s4891_s26  ;;  %p4895_p1 = scmp.lt.u32.totalorder %s4891_s26, %s5387_s18 }
  0x95   :  { %p4897_p2 = pnand %p4895_p1, %p4892_p0 }
  0x97   :  { %4900 = shalt.err (!%p4897_p2)
}
  0x98   :  { %s4901_s28 = scalar_lea.vmem %s5166_s5, 2048  ;;  %p4906_p4 = scmp.lt.s32.totalorder %s5166_s5, %s5166_s5 }
  0x99   :  { %p4902_p3 = scmp.ne.s32.totalorder %s5166_s5, %s4901_s28  ;;  %p4907_p5 = scmp.lt.s32.totalorder %s4901_s28, %s4901_s28 }
  0x9b   :  { %p4908_p6 = por %p4907_p5, %p4906_p4 }
  0x9d   :  { %p4909_p7 = pnand %p4908_p6, %p4902_p3 }
  0x9f   :  { %4912 = shalt.err (!%p4909_p7)
}
  0xa0   :  { %s4961_s15 = smov 128   ;;  %s4962_s22 = smov 8  }
  0xa1   :  { %149 = dma.hbm_to_vmem [thread:$0]  %s5387_s18, 2048, %s5166_s5, [#allocation15], %s4961_s15, %s4961_s15, %s4962_s22  }
  0xa2   :  { %4935 = dma.done.wait [#allocation3], 1792  }
  0xa3   :  { %4936 = vsyncadd [#allocation3], 4294965504 }
  0xa4   :  { %4937 = dma.done.wait [#allocation6], 33280  }
  0xa5   :  { %4938 = vsyncadd [#allocation6], 4294934016 }
  0xa6   :  { %4939 = dma.done.wait [#allocation9], 16384  }
  0xa7   :  { %4940 = vsyncadd [#allocation9], 4294950912 }
  0xa8   :  { %4941 = dma.done.wait [#allocation12], 16384  }
  0xa9   :  { %4942 = vsyncadd [#allocation12], 4294950912 }
  0xaa   :  { %4943 = dma.done.wait [#allocation15], 2048  }
  0xab   :  { %4944 = vsyncadd [#allocation15], 4294965248  ;;  %v4443_v0 = vld [vmem:[#allocation5 + $0x4] ss:$16 sps:$4 sm:$0xff]   ;;  %v4445_v1 = vld [vmem:[#allocation5 + $0xc] ss:$16 sps:$4 sm:$0xff]  }
  0xac   :  { %1402 = vmatprep.subr.bf16.mxu0 %v4443_v0  ;;  %v4447_v2 = vld [vmem:[#allocation5] ss:$16 sps:$4 sm:$0xff]   ;;  %v4448_v3 = vld [vmem:[#allocation5 + $0x8] ss:$16 sps:$4 sm:$0xff]   ;;  %1574 = vmatprep.subr.bf16.mxu1 %v4445_v1  ;;  %v4449_v4 = vld [vmem:[#allocation5 + $0x24] ss:$16 sps:$4 sm:$0xff]  }
  0xad   :  { %1403 = vmatpush1.bf16.msra.mxu0 %v4447_v2  ;;  %1575 = vmatpush1.bf16.msra.mxu1 %v4448_v3  ;;  %v4451_v5 = vld [vmem:[#allocation5 + $0x2c] ss:$16 sps:$4 sm:$0xff]   ;;  %v4453_v6 = vld [vmem:[#allocation5 + $0x20] ss:$16 sps:$4 sm:$0xff]   ;;  %v4454_v7 = vld [vmem:[#allocation5 + $0x28] ss:$16 sps:$4 sm:$0xff]  }
  0xae   :  { %1404 = vmatprep.subr.bf16.mxu0 %v4449_v4  ;;  %1576 = vmatprep.subr.bf16.mxu1 %v4451_v5  ;;  %v4455_v8 = vld [vmem:[#allocation5 + $0x44] ss:$16 sps:$4 sm:$0xff]   ;;  %v4457_v9 = vld [vmem:[#allocation5 + $0x4c] ss:$16 sps:$4 sm:$0xff]   ;;  %v4459_v10 = vld [vmem:[#allocation5 + $0x40] ss:$16 sps:$4 sm:$0xff]  }
  0xaf   :  { %v4460_v11 = vld [vmem:[#allocation5 + $0x48] ss:$16 sps:$4 sm:$0xff]   ;;  %v4461_v12 = vld [vmem:[#allocation5 + $0x64] ss:$16 sps:$4 sm:$0xff]   ;;  %v4463_v13 = vld [vmem:[#allocation5 + $0x6c] ss:$16 sps:$4 sm:$0xff]  }
  0xb0   :  { %v4465_v14 = vld [vmem:[#allocation5 + $0x60] ss:$16 sps:$4 sm:$0xff]   ;;  %v4466_v15 = vld [vmem:[#allocation5 + $0x68] ss:$16 sps:$4 sm:$0xff]   ;;  %v4467_v16 = vld [vmem:[#allocation5 + $0x84] ss:$16 sps:$4 sm:$0xff]  }
  0xb1   :  { %1405 = vmatpush1.bf16.msra.mxu0 %v4453_v6  ;;  %1577 = vmatpush1.bf16.msra.mxu1 %v4454_v7  ;;  %v4469_v17 = vld [vmem:[#allocation5 + $0x8c] ss:$16 sps:$4 sm:$0xff]   ;;  %v4471_v18 = vld [vmem:[#allocation5 + $0x80] ss:$16 sps:$4 sm:$0xff]   ;;  %v4472_v19 = vld [vmem:[#allocation5 + $0x88] ss:$16 sps:$4 sm:$0xff]  }
  0xb2   :  { %1406 = vmatprep.subr.bf16.mxu0 %v4455_v8  ;;  %1578 = vmatprep.subr.bf16.mxu1 %v4457_v9  ;;  %v4473_v20 = vld [vmem:[#allocation5 + $0xa4] ss:$16 sps:$4 sm:$0xff]   ;;  %v4475_v21 = vld [vmem:[#allocation5 + $0xac] ss:$16 sps:$4 sm:$0xff]   ;;  %v4477_v22 = vld [vmem:[#allocation5 + $0xa0] ss:$16 sps:$4 sm:$0xff]  }
  0xb3   :  { %v4478_v23 = vld [vmem:[#allocation5 + $0xa8] ss:$16 sps:$4 sm:$0xff]   ;;  %v4479_v24 = vld [vmem:[#allocation5 + $0xc4] ss:$16 sps:$4 sm:$0xff]   ;;  %v4481_v25 = vld [vmem:[#allocation5 + $0xcc] ss:$16 sps:$4 sm:$0xff]  }
  0xb4   :  { %v4483_v26 = vld [vmem:[#allocation5 + $0xc0] ss:$16 sps:$4 sm:$0xff]   ;;  %v4484_v27 = vld [vmem:[#allocation5 + $0xc8] ss:$16 sps:$4 sm:$0xff]   ;;  %v4485_v28 = vld [vmem:[#allocation5 + $0xe4] ss:$16 sps:$4 sm:$0xff]  }
  0xb5   :  { %1407 = vmatpush1.bf16.msra.mxu0 %v4459_v10  ;;  %1579 = vmatpush1.bf16.msra.mxu1 %v4460_v11  ;;  %v4487_v29 = vld [vmem:[#allocation5 + $0xec] ss:$16 sps:$4 sm:$0xff]   ;;  %v4489_v30 = vld [vmem:[#allocation5 + $0xe0] ss:$16 sps:$4 sm:$0xff]   ;;  %v4490_v31 = vld [vmem:[#allocation5 + $0xe8] ss:$16 sps:$4 sm:$0xff]  }
  0xb6   :  { %1408 = vmatprep.subr.bf16.mxu0 %v4461_v12  ;;  %1580 = vmatprep.subr.bf16.mxu1 %v4463_v13  ;;  %v4491_v32 = vld [vmem:[#allocation5 + $0x104] ss:$16 sps:$4 sm:$0xff]   ;;  %v4493_v33 = vld [vmem:[#allocation5 + $0x10c] ss:$16 sps:$4 sm:$0xff]   ;;  %v4495_v34 = vld [vmem:[#allocation5 + $0x100] ss:$16 sps:$4 sm:$0xff]  }
  0xb7   :  { %v4496_v35 = vld [vmem:[#allocation5 + $0x108] ss:$16 sps:$4 sm:$0xff]   ;;  %v4497_v36 = vld [vmem:[#allocation5 + $0x124] ss:$16 sps:$4 sm:$0xff]   ;;  %v4499_v37 = vld [vmem:[#allocation5 + $0x12c] ss:$16 sps:$4 sm:$0xff]  }
  0xb8   :  { %v4501_v38 = vld [vmem:[#allocation5 + $0x120] ss:$16 sps:$4 sm:$0xff]   ;;  %v4502_v39 = vld [vmem:[#allocation5 + $0x128] ss:$16 sps:$4 sm:$0xff]   ;;  %v4503_v40 = vld [vmem:[#allocation5 + $0x144] ss:$16 sps:$4 sm:$0xff]  }
  0xb9   :  { %1409 = vmatpush1.bf16.msra.mxu0 %v4465_v14  ;;  %1581 = vmatpush1.bf16.msra.mxu1 %v4466_v15  ;;  %v4505_v41 = vld [vmem:[#allocation5 + $0x14c] ss:$16 sps:$4 sm:$0xff]   ;;  %v4507_v42 = vld [vmem:[#allocation5 + $0x140] ss:$16 sps:$4 sm:$0xff]   ;;  %v4508_v43 = vld [vmem:[#allocation5 + $0x148] ss:$16 sps:$4 sm:$0xff]  }
  0xba   :  { %1410 = vmatprep.subr.bf16.mxu0 %v4467_v16  ;;  %1582 = vmatprep.subr.bf16.mxu1 %v4469_v17  ;;  %v4509_v44 = vld [vmem:[#allocation5 + $0x164] ss:$16 sps:$4 sm:$0xff]   ;;  %v4511_v45 = vld [vmem:[#allocation5 + $0x16c] ss:$16 sps:$4 sm:$0xff]   ;;  %v4513_v48 = vld [vmem:[#allocation5 + $0x160] ss:$16 sps:$4 sm:$0xff]  }
  0xbb   :  { %v180_v46 = vld [vmem:[#allocation2 + $0x8] sm:$0xff]  ;;  %v187_v47 = vld [vmem:[#allocation2 + $0x40] sm:$0xff]  ;;  %v186_v5 = vld [vmem:[#allocation2 + $0x38] sm:$0xff]  ;;  %vm1398_vm0 = vcmask 130048   ;;  %s5409_s0 = sld [smem:[#allocation25_spill]]  ;;  %s5410_s6 = sld [smem:[#allocation27_spill]] }
  0xbc   :  { %v4514_v49 = vld [vmem:[#allocation5 + $0x168] ss:$16 sps:$4 sm:$0xff]   ;;  %v194_v50 = vpack.c.bf16 %v187_v47, %v180_v46  ;;  %v4515_v51 = vld [vmem:[#allocation5 + $0x184] ss:$16 sps:$4 sm:$0xff]   ;;  %v4517_v52 = vld [vmem:[#allocation5 + $0x18c] ss:$16 sps:$4 sm:$0xff]  }
  0xbd   :  { %1411 = vmatpush1.bf16.msra.mxu0 %v4471_v18  ;;  %1583 = vmatpush1.bf16.msra.mxu1 %v4472_v19  ;;  %v4519_v53 = vld [vmem:[#allocation5 + $0x180] ss:$16 sps:$4 sm:$0xff]   ;;  %v4520_v54 = vld [vmem:[#allocation5 + $0x188] ss:$16 sps:$4 sm:$0xff]   ;;  %v4521_v55 = vld [vmem:[#allocation5 + $0x1a4] ss:$16 sps:$4 sm:$0xff]  }
  0xbe   :  { %1412 = vmatprep.subr.bf16.mxu0 %v4473_v20  ;;  %1584 = vmatprep.subr.bf16.mxu1 %v4475_v21  ;;  %v4523_v56 = vld [vmem:[#allocation5 + $0x1ac] ss:$16 sps:$4 sm:$0xff]   ;;  %v4525_v57 = vld [vmem:[#allocation5 + $0x1a0] ss:$16 sps:$4 sm:$0xff]   ;;  %v4526_v58 = vld [vmem:[#allocation5 + $0x1a8] ss:$16 sps:$4 sm:$0xff]  }
  0xbf   :  { %1434 = vmatprep.mubr.bf16.mxu0 %v194_v50  ;;  %1606 = vmatprep.mubr.bf16.mxu1 %v194_v50  ;;  %v4527_v59 = vld [vmem:[#allocation5 + $0x1c4] ss:$16 sps:$4 sm:$0xff]   ;;  %v4529_v60 = vld [vmem:[#allocation5 + $0x1cc] ss:$16 sps:$4 sm:$0xff]   ;;  %v4531_v61 = vld [vmem:[#allocation5 + $0x1c0] ss:$16 sps:$4 sm:$0xff]  }
  0xc0   :  { %v4532_v62 = vld [vmem:[#allocation5 + $0x1c8] ss:$16 sps:$4 sm:$0xff]   ;;  %v4533_v63 = vld [vmem:[#allocation5 + $0x1e4] ss:$16 sps:$4 sm:$0xff]   ;;  %v4535_v0 = vld [vmem:[#allocation5 + $0x1ec] ss:$16 sps:$4 sm:$0xff]  }
  0xc1   :  { %1413 = vmatpush1.bf16.msra.mxu0 %v4477_v22  ;;  %1585 = vmatpush1.bf16.msra.mxu1 %v4478_v23  ;;  %v4537_v1 = vld [vmem:[#allocation5 + $0x1e0] ss:$16 sps:$4 sm:$0xff]   ;;  %v4538_v2 = vld [vmem:[#allocation5 + $0x1e8] ss:$16 sps:$4 sm:$0xff]   ;;  %v4541_v3 = vld [vmem:[#allocation5 + $0x204] ss:$16 sps:$4 sm:$0xff]  }
  0xc2   :  { %1414 = vmatprep.subr.bf16.mxu0 %v4479_v24  ;;  %1586 = vmatprep.subr.bf16.mxu1 %v4481_v25  ;;  %v179_v4 = vld [vmem:[#allocation2] sm:$0xff]  ;;  %v4544_v6 = vld [vmem:[#allocation5 + $0x20c] ss:$16 sps:$4 sm:$0xff]   ;;  %v4542_v8 = vld [vmem:[#allocation5 + $0x208] ss:$16 sps:$4 sm:$0xff]   ;;  %s5411_s25 = sld [smem:[#allocation28_spill]] }
  0xc3   :  { %v4539_v7 = vld [vmem:[#allocation5 + $0x200] ss:$16 sps:$4 sm:$0xff]   ;;  %v193_v9 = vpack.c.bf16 %v186_v5, %v179_v4  ;;  %v4547_v10 = vld [vmem:[#allocation5 + $0x224] ss:$16 sps:$4 sm:$0xff]   ;;  %v4550_v11 = vld [vmem:[#allocation5 + $0x22c] ss:$16 sps:$4 sm:$0xff]  }
  0xc4   :  { %v4545_v12 = vld [vmem:[#allocation5 + $0x220] ss:$16 sps:$4 sm:$0xff]   ;;  %v4548_v13 = vld [vmem:[#allocation5 + $0x228] ss:$16 sps:$4 sm:$0xff]   ;;  %v4553_v14 = vld [vmem:[#allocation5 + $0x244] ss:$16 sps:$4 sm:$0xff]  }
  0xc5   :  { %1415 = vmatpush1.bf16.msra.mxu0 %v4483_v26  ;;  %1587 = vmatpush1.bf16.msra.mxu1 %v4484_v27  ;;  %v4556_v15 = vld [vmem:[#allocation5 + $0x24c] ss:$16 sps:$4 sm:$0xff]   ;;  %v4551_v16 = vld [vmem:[#allocation5 + $0x240] ss:$16 sps:$4 sm:$0xff]   ;;  %v4554_v17 = vld [vmem:[#allocation5 + $0x248] ss:$16 sps:$4 sm:$0xff]  }
  0xc6   :  { %1416 = vmatprep.subr.bf16.mxu0 %v4485_v28  ;;  %1588 = vmatprep.subr.bf16.mxu1 %v4487_v29  ;;  %v4559_v18 = vld [vmem:[#allocation5 + $0x264] ss:$16 sps:$4 sm:$0xff]   ;;  %v4562_v19 = vld [vmem:[#allocation5 + $0x26c] ss:$16 sps:$4 sm:$0xff]   ;;  %v4557_v20 = vld [vmem:[#allocation5 + $0x260] ss:$16 sps:$4 sm:$0xff]  }
  0xc7   :  { %v4560_v21 = vld [vmem:[#allocation5 + $0x268] ss:$16 sps:$4 sm:$0xff]   ;;  %v4565_v22 = vld [vmem:[#allocation5 + $0x284] ss:$16 sps:$4 sm:$0xff]   ;;  %v4568_v23 = vld [vmem:[#allocation5 + $0x28c] ss:$16 sps:$4 sm:$0xff]  }
  0xc8   :  { %v4563_v24 = vld [vmem:[#allocation5 + $0x280] ss:$16 sps:$4 sm:$0xff]   ;;  %v4566_v25 = vld [vmem:[#allocation5 + $0x288] ss:$16 sps:$4 sm:$0xff]   ;;  %v4571_v26 = vld [vmem:[#allocation5 + $0x2a4] ss:$16 sps:$4 sm:$0xff]  }
  0xc9   :  { %1417 = vmatpush1.bf16.msra.mxu0 %v4489_v30  ;;  %1589 = vmatpush1.bf16.msra.mxu1 %v4490_v31  ;;  %v4574_v27 = vld [vmem:[#allocation5 + $0x2ac] ss:$16 sps:$4 sm:$0xff]   ;;  %v4569_v28 = vld [vmem:[#allocation5 + $0x2a0] ss:$16 sps:$4 sm:$0xff]   ;;  %v4572_v29 = vld [vmem:[#allocation5 + $0x2a8] ss:$16 sps:$4 sm:$0xff]  }
  0xca   :  { %1418 = vmatprep.subr.bf16.mxu0 %v4491_v32  ;;  %1590 = vmatprep.subr.bf16.mxu1 %v4493_v33  ;;  %v4577_v30 = vld [vmem:[#allocation5 + $0x2c4] ss:$16 sps:$4 sm:$0xff]   ;;  %v4580_v31 = vld [vmem:[#allocation5 + $0x2cc] ss:$16 sps:$4 sm:$0xff]   ;;  %v4593_v47 = vld [vmem:[#allocation5 + $0x320] ss:$16 sps:$4 sm:$0xff]  }
  0xcb   :  { %v182_v32 = vld [vmem:[#allocation2 + $0x18] sm:$0xff]  ;;  %v189_v33 = vld [vmem:[#allocation2 + $0x50] sm:$0xff]  ;;  %s5412_s5 = sld [smem:[#allocation29_spill]] }
  0xcc   :  { %v4598_v46 = vld [vmem:[#allocation5 + $0x32c] ss:$16 sps:$4 sm:$0xff]   ;;  %v4626_v4 = vld [vmem:[#allocation5 + $0x3c8] ss:$16 sps:$4 sm:$0xff]   ;;  %v4631_v5 = vld [vmem:[#allocation5 + $0x3e4] ss:$16 sps:$4 sm:$0xff]  }
  0xcd   :  { %1419 = vmatpush1.bf16.msra.mxu0 %v4495_v34  ;;  %1591 = vmatpush1.bf16.msra.mxu1 %v4496_v35  ;;  %v4575_v34 = vld [vmem:[#allocation5 + $0x2c0] ss:$16 sps:$4 sm:$0xff]   ;;  %v4578_v35 = vld [vmem:[#allocation5 + $0x2c8] ss:$16 sps:$4 sm:$0xff]   ;;  %v4604_v50 = vld [vmem:[#allocation5 + $0x34c] ss:$16 sps:$4 sm:$0xff]  }
  0xce   :  { %1420 = vmatprep.subr.bf16.mxu0 %v4497_v36  ;;  %1592 = vmatprep.subr.bf16.mxu1 %v4499_v37  ;;  %v196_v36 = vpack.c.bf16 %v189_v33, %v182_v32  ;;  %v4583_v37 = vld [vmem:[#allocation5 + $0x2e4] ss:$16 sps:$4 sm:$0xff]   ;;  %v4664_v32 = vld [vmem:[#allocation5 + $0x48c] ss:$16 sps:$4 sm:$0xff]   ;;  %v4659_v33 = vld [vmem:[#allocation5 + $0x480] ss:$16 sps:$4 sm:$0xff]  }
  0xd1   :  { %1421 = vmatpush1.bf16.msra.mxu0 %v4501_v38  ;;  %1593 = vmatpush1.bf16.msra.mxu1 %v4502_v39  ;;  %v4586_v38 = vld [vmem:[#allocation5 + $0x2ec] ss:$16 sps:$4 sm:$0xff]   ;;  %v4581_v39 = vld [vmem:[#allocation5 + $0x2e0] ss:$16 sps:$4 sm:$0xff]  }
  0xd2   :  { %1422 = vmatprep.subr.bf16.mxu0 %v4503_v40  ;;  %1594 = vmatprep.subr.bf16.mxu1 %v4505_v41  ;;  %v4584_v40 = vld [vmem:[#allocation5 + $0x2e8] ss:$16 sps:$4 sm:$0xff]   ;;  %v4589_v41 = vld [vmem:[#allocation5 + $0x304] ss:$16 sps:$4 sm:$0xff]  }
  0xd5   :  { %1423 = vmatpush1.bf16.msra.mxu0 %v4507_v42  ;;  %1595 = vmatpush1.bf16.msra.mxu1 %v4508_v43  ;;  %v4592_v42 = vld [vmem:[#allocation5 + $0x30c] ss:$16 sps:$4 sm:$0xff]   ;;  %v4587_v43 = vld [vmem:[#allocation5 + $0x300] ss:$16 sps:$4 sm:$0xff]  }
  0xd6   :  { %1424 = vmatprep.subr.bf16.mxu0 %v4509_v44  ;;  %1596 = vmatprep.subr.bf16.mxu1 %v4511_v45  ;;  %v4590_v44 = vld [vmem:[#allocation5 + $0x308] ss:$16 sps:$4 sm:$0xff]   ;;  %v4595_v45 = vld [vmem:[#allocation5 + $0x324] ss:$16 sps:$4 sm:$0xff]  }
  0xd9   :  { %1425 = vmatpush1.bf16.msra.mxu0 %v4513_v48  ;;  %1597 = vmatpush1.bf16.msra.mxu1 %v4514_v49  ;;  %v4596_v48 = vld [vmem:[#allocation5 + $0x328] ss:$16 sps:$4 sm:$0xff]   ;;  %v4601_v49 = vld [vmem:[#allocation5 + $0x344] ss:$16 sps:$4 sm:$0xff]  }
  0xda   :  { %1426 = vmatprep.subr.bf16.mxu0 %v4515_v51  ;;  %1598 = vmatprep.subr.bf16.mxu1 %v4517_v52  ;;  %v4599_v51 = vld [vmem:[#allocation5 + $0x340] ss:$16 sps:$4 sm:$0xff]   ;;  %v4602_v52 = vld [vmem:[#allocation5 + $0x348] ss:$16 sps:$4 sm:$0xff]  }
  0xdd   :  { %1427 = vmatpush1.bf16.msra.mxu0 %v4519_v53  ;;  %1599 = vmatpush1.bf16.msra.mxu1 %v4520_v54  ;;  %v4607_v53 = vld [vmem:[#allocation5 + $0x364] ss:$16 sps:$4 sm:$0xff]   ;;  %v4610_v54 = vld [vmem:[#allocation5 + $0x36c] ss:$16 sps:$4 sm:$0xff]  }
  0xde   :  { %1428 = vmatprep.subr.bf16.mxu0 %v4521_v55  ;;  %1600 = vmatprep.subr.bf16.mxu1 %v4523_v56  ;;  %v4605_v55 = vld [vmem:[#allocation5 + $0x360] ss:$16 sps:$4 sm:$0xff]   ;;  %v4608_v56 = vld [vmem:[#allocation5 + $0x368] ss:$16 sps:$4 sm:$0xff]  }
  0xe1   :  { %1429 = vmatpush1.bf16.msra.mxu0 %v4525_v57  ;;  %1601 = vmatpush1.bf16.msra.mxu1 %v4526_v58  ;;  %v4613_v57 = vld [vmem:[#allocation5 + $0x384] ss:$16 sps:$4 sm:$0xff]   ;;  %v4616_v58 = vld [vmem:[#allocation5 + $0x38c] ss:$16 sps:$4 sm:$0xff]  }
  0xe2   :  { %1430 = vmatprep.subr.bf16.mxu0 %v4527_v59  ;;  %1602 = vmatprep.subr.bf16.mxu1 %v4529_v60  ;;  %v4611_v59 = vld [vmem:[#allocation5 + $0x380] ss:$16 sps:$4 sm:$0xff]   ;;  %v4614_v60 = vld [vmem:[#allocation5 + $0x388] ss:$16 sps:$4 sm:$0xff]  }
  0xe5   :  { %1431 = vmatpush1.bf16.msra.mxu0 %v4531_v61  ;;  %1603 = vmatpush1.bf16.msra.mxu1 %v4532_v62  ;;  %v4619_v61 = vld [vmem:[#allocation5 + $0x3a4] ss:$16 sps:$4 sm:$0xff]   ;;  %v4622_v62 = vld [vmem:[#allocation5 + $0x3ac] ss:$16 sps:$4 sm:$0xff]  }
  0xe6   :  { %1432 = vmatprep.subr.bf16.mxu0 %v4533_v63  ;;  %1604 = vmatprep.subr.bf16.mxu1 %v4535_v0  ;;  %v4617_v63 = vld [vmem:[#allocation5 + $0x3a0] ss:$16 sps:$4 sm:$0xff]   ;;  %v4620_v0 = vld [vmem:[#allocation5 + $0x3a8] ss:$16 sps:$4 sm:$0xff]  }
  0xe9   :  { %1433 = vmatpush1.bf16.msra.mxu0 %v4537_v1  ;;  %1605 = vmatpush1.bf16.msra.mxu1 %v4538_v2  ;;  %v4625_v1 = vld [vmem:[#allocation5 + $0x3c4] ss:$16 sps:$4 sm:$0xff]   ;;  %v4628_v2 = vld [vmem:[#allocation5 + $0x3cc] ss:$16 sps:$4 sm:$0xff]  }
  0xea   :  { %1445 = vmatprep.subr.bf16.mxu0 %v4541_v3  ;;  %1617 = vmatprep.subr.bf16.mxu1 %v4544_v6  ;;  %v4623_v3 = vld [vmem:[#allocation5 + $0x3c0] ss:$16 sps:$4 sm:$0xff]   ;;  %v4634_v6 = vld [vmem:[#allocation5 + $0x3ec] ss:$16 sps:$4 sm:$0xff]  }
  0xec   :  { %1435 = vmatmul.mubr.bf16.vlgmr.msra.gmra.mrb[0].mxu0 %v193_v9  ;;  %1607 = vmatmul.mubr.bf16.vlgmr.msra.gmra.mrb[0].mxu1 %v193_v9  ;;  %v4637_v9 = vld [vmem:[#allocation5 + $0x404] ss:$16 sps:$4 sm:$0xff]  }
  0xed   :  { %1446 = vmatpush1.bf16.msra.mxu0 %v4539_v7  ;;  %1618 = vmatpush1.bf16.msra.mxu1 %v4542_v8  ;;  %v4629_v7 = vld [vmem:[#allocation5 + $0x3e0] ss:$16 sps:$4 sm:$0xff]   ;;  %v4632_v8 = vld [vmem:[#allocation5 + $0x3e8] ss:$16 sps:$4 sm:$0xff]  }
  0xee   :  { %1447 = vmatprep.subr.bf16.mxu0 %v4547_v10  ;;  %1619 = vmatprep.subr.bf16.mxu1 %v4550_v11  ;;  %v181_v10 = vld [vmem:[#allocation2 + $0x10] sm:$0xff]  ;;  %v188_v11 = vld [vmem:[#allocation2 + $0x48] sm:$0xff] }
  0xef   :  { %1477 = vmatprep.mubr.bf16.mxu0 %v196_v36  ;;  %1649 = vmatprep.mubr.bf16.mxu1 %v196_v36  ;;  %v4670_v36 = vld [vmem:[#allocation5 + $0x4ac] ss:$16 sps:$4 sm:$0xff]  }
  0xf1   :  { %1448 = vmatpush1.bf16.msra.mxu0 %v4545_v12  ;;  %1620 = vmatpush1.bf16.msra.mxu1 %v4548_v13  ;;  %v4640_v12 = vld [vmem:[#allocation5 + $0x40c] ss:$16 sps:$4 sm:$0xff]   ;;  %v4635_v13 = vld [vmem:[#allocation5 + $0x400] ss:$16 sps:$4 sm:$0xff]  }
  0xf2   :  { %1449 = vmatprep.subr.bf16.mxu0 %v4553_v14  ;;  %1621 = vmatprep.subr.bf16.mxu1 %v4556_v15  ;;  %v4638_v14 = vld [vmem:[#allocation5 + $0x408] ss:$16 sps:$4 sm:$0xff]   ;;  %v195_v15 = vpack.c.bf16 %v188_v11, %v181_v10  ;;  %v4727_v11 = vld [vmem:[#allocation5 + $0x5e4] ss:$16 sps:$4 sm:$0xff]  }
  0xf3   :  { %v4722_v10 = vld [vmem:[#allocation5 + $0x5c8] ss:$16 sps:$4 sm:$0xff]  }
  0xf5   :  { %1450 = vmatpush1.bf16.msra.mxu0 %v4551_v16  ;;  %1622 = vmatpush1.bf16.msra.mxu1 %v4554_v17  ;;  %v4643_v16 = vld [vmem:[#allocation5 + $0x424] ss:$16 sps:$4 sm:$0xff]   ;;  %v4646_v17 = vld [vmem:[#allocation5 + $0x42c] ss:$16 sps:$4 sm:$0xff]  }
  0xf6   :  { %1451 = vmatprep.subr.bf16.mxu0 %v4559_v18  ;;  %1623 = vmatprep.subr.bf16.mxu1 %v4562_v19  ;;  %v184_v18 = vld [vmem:[#allocation2 + $0x28] sm:$0xff]  ;;  %v4641_v19 = vld [vmem:[#allocation5 + $0x420] ss:$16 sps:$4 sm:$0xff]  }
  0xf9   :  { %1452 = vmatpush1.bf16.msra.mxu0 %v4557_v20  ;;  %1624 = vmatpush1.bf16.msra.mxu1 %v4560_v21  ;;  %v4644_v20 = vld [vmem:[#allocation5 + $0x428] ss:$16 sps:$4 sm:$0xff]   ;;  %v191_v21 = vld [vmem:[#allocation2 + $0x60] sm:$0xff] }
  0xfa   :  { %1453 = vmatprep.subr.bf16.mxu0 %v4565_v22  ;;  %1625 = vmatprep.subr.bf16.mxu1 %v4568_v23  ;;  %v4649_v22 = vld [vmem:[#allocation5 + $0x444] ss:$16 sps:$4 sm:$0xff]   ;;  %v198_v23 = vpack.c.bf16 %v191_v21, %v184_v18  ;;  %v4736_v18 = vld [vmem:[#allocation5 + $0x60c] ss:$16 sps:$4 sm:$0xff]  }
  0xfb   :  { %v1761_v21 = vld [vmem:[#allocation7 + $0x18] sm:$0xff] }
  0xfd   :  { %1454 = vmatpush1.bf16.msra.mxu0 %v4563_v24  ;;  %1626 = vmatpush1.bf16.msra.mxu1 %v4566_v25  ;;  %v4652_v24 = vld [vmem:[#allocation5 + $0x44c] ss:$16 sps:$4 sm:$0xff]   ;;  %v4647_v25 = vld [vmem:[#allocation5 + $0x440] ss:$16 sps:$4 sm:$0xff]  }
  0xfe   :  { %1455 = vmatprep.subr.bf16.mxu0 %v4571_v26  ;;  %1627 = vmatprep.subr.bf16.mxu1 %v4574_v27  ;;  %v4650_v26 = vld [vmem:[#allocation5 + $0x448] ss:$16 sps:$4 sm:$0xff]   ;;  %v4655_v27 = vld [vmem:[#allocation5 + $0x464] ss:$16 sps:$4 sm:$0xff]  }
 0x101   :  { %1456 = vmatpush1.bf16.msra.mxu0 %v4569_v28  ;;  %1628 = vmatpush1.bf16.msra.mxu1 %v4572_v29  ;;  %v4658_v28 = vld [vmem:[#allocation5 + $0x46c] ss:$16 sps:$4 sm:$0xff]   ;;  %v4653_v29 = vld [vmem:[#allocation5 + $0x460] ss:$16 sps:$4 sm:$0xff]  }
 0x102   :  { %1457 = vmatprep.subr.bf16.mxu0 %v4577_v30  ;;  %1629 = vmatprep.subr.bf16.mxu1 %v4580_v31  ;;  %v4656_v30 = vld [vmem:[#allocation5 + $0x468] ss:$16 sps:$4 sm:$0xff]   ;;  %v4661_v31 = vld [vmem:[#allocation5 + $0x484] ss:$16 sps:$4 sm:$0xff]  }
 0x105   :  { %1458 = vmatpush1.bf16.msra.mxu0 %v4575_v34  ;;  %1630 = vmatpush1.bf16.msra.mxu1 %v4578_v35  ;;  %v4662_v34 = vld [vmem:[#allocation5 + $0x488] ss:$16 sps:$4 sm:$0xff]   ;;  %v4667_v35 = vld [vmem:[#allocation5 + $0x4a4] ss:$16 sps:$4 sm:$0xff]  }
 0x106   :  { %1459 = vmatprep.subr.bf16.mxu0 %v4583_v37  ;;  %1631 = vmatprep.subr.bf16.mxu1 %v4586_v38  ;;  %v4665_v37 = vld [vmem:[#allocation5 + $0x4a0] ss:$16 sps:$4 sm:$0xff]   ;;  %v4668_v38 = vld [vmem:[#allocation5 + $0x4a8] ss:$16 sps:$4 sm:$0xff]  }
 0x109   :  { %1460 = vmatpush1.bf16.msra.mxu0 %v4581_v39  ;;  %1632 = vmatpush1.bf16.msra.mxu1 %v4584_v40  ;;  %v4673_v39 = vld [vmem:[#allocation5 + $0x4c4] ss:$16 sps:$4 sm:$0xff]   ;;  %v4676_v40 = vld [vmem:[#allocation5 + $0x4cc] ss:$16 sps:$4 sm:$0xff]  }
 0x10a   :  { %1461 = vmatprep.subr.bf16.mxu0 %v4589_v41  ;;  %1633 = vmatprep.subr.bf16.mxu1 %v4592_v42  ;;  %v4671_v41 = vld [vmem:[#allocation5 + $0x4c0] ss:$16 sps:$4 sm:$0xff]   ;;  %v4674_v42 = vld [vmem:[#allocation5 + $0x4c8] ss:$16 sps:$4 sm:$0xff]  }
 0x10d   :  { %1462 = vmatpush1.bf16.msra.mxu0 %v4587_v43  ;;  %1634 = vmatpush1.bf16.msra.mxu1 %v4590_v44  ;;  %v4679_v43 = vld [vmem:[#allocation5 + $0x4e4] ss:$16 sps:$4 sm:$0xff]   ;;  %v4682_v44 = vld [vmem:[#allocation5 + $0x4ec] ss:$16 sps:$4 sm:$0xff]  }
 0x10e   :  { %1463 = vmatprep.subr.bf16.mxu0 %v4595_v45  ;;  %1635 = vmatprep.subr.bf16.mxu1 %v4598_v46  ;;  %v4677_v45 = vld [vmem:[#allocation5 + $0x4e0] ss:$16 sps:$4 sm:$0xff]   ;;  %v4680_v46 = vld [vmem:[#allocation5 + $0x4e8] ss:$16 sps:$4 sm:$0xff]  }
 0x111   :  { %1464 = vmatpush1.bf16.msra.mxu0 %v4593_v47  ;;  %1636 = vmatpush1.bf16.msra.mxu1 %v4596_v48  ;;  %v4685_v47 = vld [vmem:[#allocation5 + $0x504] ss:$16 sps:$4 sm:$0xff]   ;;  %v4688_v48 = vld [vmem:[#allocation5 + $0x50c] ss:$16 sps:$4 sm:$0xff]  }
 0x112   :  { %1465 = vmatprep.subr.bf16.mxu0 %v4601_v49  ;;  %1637 = vmatprep.subr.bf16.mxu1 %v4604_v50  ;;  %v4683_v49 = vld [vmem:[#allocation5 + $0x500] ss:$16 sps:$4 sm:$0xff]   ;;  %v4686_v50 = vld [vmem:[#allocation5 + $0x508] ss:$16 sps:$4 sm:$0xff]  }
 0x115   :  { %1466 = vmatpush1.bf16.msra.mxu0 %v4599_v51  ;;  %1638 = vmatpush1.bf16.msra.mxu1 %v4602_v52  ;;  %v4691_v51 = vld [vmem:[#allocation5 + $0x524] ss:$16 sps:$4 sm:$0xff]   ;;  %v4694_v52 = vld [vmem:[#allocation5 + $0x52c] ss:$16 sps:$4 sm:$0xff]  }
 0x116   :  { %1467 = vmatprep.subr.bf16.mxu0 %v4607_v53  ;;  %1639 = vmatprep.subr.bf16.mxu1 %v4610_v54  ;;  %v4689_v53 = vld [vmem:[#allocation5 + $0x520] ss:$16 sps:$4 sm:$0xff]   ;;  %v4692_v54 = vld [vmem:[#allocation5 + $0x528] ss:$16 sps:$4 sm:$0xff]  }
 0x119   :  { %1468 = vmatpush1.bf16.msra.mxu0 %v4605_v55  ;;  %1640 = vmatpush1.bf16.msra.mxu1 %v4608_v56  ;;  %v4697_v55 = vld [vmem:[#allocation5 + $0x544] ss:$16 sps:$4 sm:$0xff]   ;;  %v4700_v56 = vld [vmem:[#allocation5 + $0x54c] ss:$16 sps:$4 sm:$0xff]  }
 0x11a   :  { %1469 = vmatprep.subr.bf16.mxu0 %v4613_v57  ;;  %1641 = vmatprep.subr.bf16.mxu1 %v4616_v58  ;;  %v4695_v57 = vld [vmem:[#allocation5 + $0x540] ss:$16 sps:$4 sm:$0xff]   ;;  %v4698_v58 = vld [vmem:[#allocation5 + $0x548] ss:$16 sps:$4 sm:$0xff]  }
 0x11d   :  { %1470 = vmatpush1.bf16.msra.mxu0 %v4611_v59  ;;  %1642 = vmatpush1.bf16.msra.mxu1 %v4614_v60  ;;  %v4703_v59 = vld [vmem:[#allocation5 + $0x564] ss:$16 sps:$4 sm:$0xff]   ;;  %v4706_v60 = vld [vmem:[#allocation5 + $0x56c] ss:$16 sps:$4 sm:$0xff]  }
 0x11e   :  { %1471 = vmatprep.subr.bf16.mxu0 %v4619_v61  ;;  %1643 = vmatprep.subr.bf16.mxu1 %v4622_v62  ;;  %v4701_v61 = vld [vmem:[#allocation5 + $0x560] ss:$16 sps:$4 sm:$0xff]   ;;  %v4704_v62 = vld [vmem:[#allocation5 + $0x568] ss:$16 sps:$4 sm:$0xff]  }
 0x121   :  { %1472 = vmatpush1.bf16.msra.mxu0 %v4617_v63  ;;  %1644 = vmatpush1.bf16.msra.mxu1 %v4620_v0  ;;  %v4709_v63 = vld [vmem:[#allocation5 + $0x584] ss:$16 sps:$4 sm:$0xff]   ;;  %v4712_v0 = vld [vmem:[#allocation5 + $0x58c] ss:$16 sps:$4 sm:$0xff]  }
 0x122   :  { %1473 = vmatprep.subr.bf16.mxu0 %v4625_v1  ;;  %1645 = vmatprep.subr.bf16.mxu1 %v4628_v2  ;;  %v4707_v1 = vld [vmem:[#allocation5 + $0x580] ss:$16 sps:$4 sm:$0xff]   ;;  %v4710_v2 = vld [vmem:[#allocation5 + $0x588] ss:$16 sps:$4 sm:$0xff]  }
 0x125   :  { %1474 = vmatpush1.bf16.msra.mxu0 %v4623_v3  ;;  %1646 = vmatpush1.bf16.msra.mxu1 %v4626_v4  ;;  %v4715_v3 = vld [vmem:[#allocation5 + $0x5a4] ss:$16 sps:$4 sm:$0xff]   ;;  %v4718_v4 = vld [vmem:[#allocation5 + $0x5ac] ss:$16 sps:$4 sm:$0xff]  }
 0x126   :  { %1475 = vmatprep.subr.bf16.mxu0 %v4631_v5  ;;  %1647 = vmatprep.subr.bf16.mxu1 %v4634_v6  ;;  %v4713_v5 = vld [vmem:[#allocation5 + $0x5a0] ss:$16 sps:$4 sm:$0xff]   ;;  %v4716_v6 = vld [vmem:[#allocation5 + $0x5a8] ss:$16 sps:$4 sm:$0xff]  }
 0x129   :  { %1476 = vmatpush1.bf16.msra.mxu0 %v4629_v7  ;;  %1648 = vmatpush1.bf16.msra.mxu1 %v4632_v8  ;;  %v4721_v7 = vld [vmem:[#allocation5 + $0x5c4] ss:$16 sps:$4 sm:$0xff]   ;;  %v4724_v8 = vld [vmem:[#allocation5 + $0x5cc] ss:$16 sps:$4 sm:$0xff]  }
 0x12a   :  { %1488 = vmatprep.subr.bf16.mxu0 %v4637_v9  ;;  %1660 = vmatprep.subr.bf16.mxu1 %v4640_v12  ;;  %v4719_v9 = vld [vmem:[#allocation5 + $0x5c0] ss:$16 sps:$4 sm:$0xff]   ;;  %v4730_v12 = vld [vmem:[#allocation5 + $0x5ec] ss:$16 sps:$4 sm:$0xff]  }
 0x12c   :  { %1478 = vmatmul.mubr.bf16.vlgmr.msra.gmra.mrb[0].mxu0 %v195_v15  ;;  %1650 = vmatmul.mubr.bf16.vlgmr.msra.gmra.mrb[0].mxu1 %v195_v15  ;;  %v183_v15 = vld [vmem:[#allocation2 + $0x20] sm:$0xff] }
 0x12d   :  { %1489 = vmatpush1.bf16.msra.mxu0 %v4635_v13  ;;  %1661 = vmatpush1.bf16.msra.mxu1 %v4638_v14  ;;  %v4725_v13 = vld [vmem:[#allocation5 + $0x5e0] ss:$16 sps:$4 sm:$0xff]   ;;  %v4728_v14 = vld [vmem:[#allocation5 + $0x5e8] ss:$16 sps:$4 sm:$0xff]  }
 0x12e   :  { %1490 = vmatprep.subr.bf16.mxu0 %v4643_v16  ;;  %1662 = vmatprep.subr.bf16.mxu1 %v4646_v17  ;;  %v190_v16 = vld [vmem:[#allocation2 + $0x58] sm:$0xff]  ;;  %v4733_v17 = vld [vmem:[#allocation5 + $0x604] ss:$16 sps:$4 sm:$0xff]  }
 0x12f   :  { %1520 = vmatprep.mubr.bf16.mxu0 %v198_v23  ;;  %1692 = vmatprep.mubr.bf16.mxu1 %v198_v23  ;;  %v4734_v23 = vld [vmem:[#allocation5 + $0x608] ss:$16 sps:$4 sm:$0xff]  }
 0x131   :  { %1491 = vmatpush1.bf16.msra.mxu0 %v4641_v19  ;;  %1663 = vmatpush1.bf16.msra.mxu1 %v4644_v20  ;;  %v197_v19 = vpack.c.bf16 %v190_v16, %v183_v15  ;;  %v1759_v20 = vld [vmem:[#allocation7 + $0x8] sm:$0xff]  ;;  %v1776_v15 = vld [vmem:[#allocation7 + $0x90] sm:$0xff] }
 0x132   :  { %1492 = vmatprep.subr.bf16.mxu0 %v4649_v22  ;;  %1664 = vmatprep.subr.bf16.mxu1 %v4652_v24  ;;  %v4731_v22 = vld [vmem:[#allocation5 + $0x600] ss:$16 sps:$4 sm:$0xff]   ;;  %v1823_v24 = vunpack.c.l.s8.bf16 %v1759_v20 }
 0x135   :  { %1493 = vmatpush1.bf16.msra.mxu0 %v4647_v25  ;;  %1665 = vmatpush1.bf16.msra.mxu1 %v4650_v26  ;;  %v1825_v25 = vunpack.c.l.s8.bf16 %v1761_v21  ;;  %v4963_v26 = vmov 0  }
 0x136   :  { %1494 = vmatprep.subr.bf16.mxu0 %v4655_v27  ;;  %1666 = vmatprep.subr.bf16.mxu1 %v4658_v28  ;;  %v185_v27 = vld [vmem:[#allocation2 + $0x30] sm:$0xff]  ;;  %v192_v28 = vld [vmem:[#allocation2 + $0x68] sm:$0xff] }
 0x139   :  { %1495 = vmatpush1.bf16.msra.mxu0 %v4653_v29  ;;  %1667 = vmatpush1.bf16.msra.mxu1 %v4656_v30  ;;  %v1758_v29 = vld [vmem:[#allocation7] sm:$0xff]  ;;  %v1760_v30 = vld [vmem:[#allocation7 + $0x10] sm:$0xff] }
 0x13a   :  { %1496 = vmatprep.subr.bf16.mxu0 %v4661_v31  ;;  %1668 = vmatprep.subr.bf16.mxu1 %v4664_v32  ;;  %v199_v31 = vpack.c.bf16 %v192_v28, %v185_v27  ;;  %v1822_v32 = vunpack.c.l.s8.bf16 %v1758_v29  ;;  %v1780_v27 = vld [vmem:[#allocation7 + $0xb0] sm:$0xff] }
 0x13d   :  { %1497 = vmatpush1.bf16.msra.mxu0 %v4659_v33  ;;  %1669 = vmatpush1.bf16.msra.mxu1 %v4662_v34  ;;  %v1824_v33 = vunpack.c.l.s8.bf16 %v1760_v30  ;;  %v1827_v34 = vunpack.c.h.s8.bf16 %v1759_v20  ;;  %v1779_v20 = vld [vmem:[#allocation7 + $0xa8] sm:$0xff] }
 0x13e   :  { %1498 = vmatprep.subr.bf16.mxu0 %v4667_v35  ;;  %1670 = vmatprep.subr.bf16.mxu1 %v4670_v36  ;;  %v1829_v35 = vunpack.c.h.s8.bf16 %v1761_v21  ;;  %v1763_v36 = vld [vmem:[#allocation7 + $0x28] sm:$0xff]  ;;  %v1781_v21 = vld [vmem:[#allocation7 + $0xb8] sm:$0xff] }
 0x141   :  { %1499 = vmatpush1.bf16.msra.mxu0 %v4665_v37  ;;  %1671 = vmatpush1.bf16.msra.mxu1 %v4668_v38  ;;  %v1765_v37 = vld [vmem:[#allocation7 + $0x38] sm:$0xff]  ;;  %v1826_v38 = vunpack.c.h.s8.bf16 %v1758_v29  ;;  %v1864_v29 = vunpack.c.l.s8.bf16 %v1780_v27 }
 0x142   :  { %1500 = vmatprep.subr.bf16.mxu0 %v4673_v39  ;;  %1672 = vmatprep.subr.bf16.mxu1 %v4676_v40  ;;  %v1828_v39 = vunpack.c.h.s8.bf16 %v1760_v30  ;;  %v1831_v40 = vunpack.c.l.s8.bf16 %v1763_v36  ;;  %v1867_v30 = vunpack.c.h.s8.bf16 %v1779_v20 }
 0x145   :  { %1501 = vmatpush1.bf16.msra.mxu0 %v4671_v41  ;;  %1673 = vmatpush1.bf16.msra.mxu1 %v4674_v42  ;;  %v1833_v41 = vunpack.c.l.s8.bf16 %v1765_v37  ;;  %v1762_v42 = vld [vmem:[#allocation7 + $0x20] sm:$0xff] }
 0x146   :  { %1502 = vmatprep.subr.bf16.mxu0 %v4679_v43  ;;  %1674 = vmatprep.subr.bf16.mxu1 %v4682_v44  ;;  %v1764_v43 = vld [vmem:[#allocation7 + $0x30] sm:$0xff]  ;;  %v1830_v44 = vunpack.c.l.s8.bf16 %v1762_v42 }
 0x149   :  { %1503 = vmatpush1.bf16.msra.mxu0 %v4677_v45  ;;  %1675 = vmatpush1.bf16.msra.mxu1 %v4680_v46  ;;  %v1832_v45 = vunpack.c.l.s8.bf16 %v1764_v43  ;;  %v1835_v46 = vunpack.c.h.s8.bf16 %v1763_v36 }
 0x14a   :  { %1504 = vmatprep.subr.bf16.mxu0 %v4685_v47  ;;  %1676 = vmatprep.subr.bf16.mxu1 %v4688_v48  ;;  %v1837_v47 = vunpack.c.h.s8.bf16 %v1765_v37  ;;  %v1767_v48 = vld [vmem:[#allocation7 + $0x48] sm:$0xff] }
 0x14d   :  { %1505 = vmatpush1.bf16.msra.mxu0 %v4683_v49  ;;  %1677 = vmatpush1.bf16.msra.mxu1 %v4686_v50  ;;  %v1769_v49 = vld [vmem:[#allocation7 + $0x58] sm:$0xff]  ;;  %v1834_v50 = vunpack.c.h.s8.bf16 %v1762_v42 }
 0x14e   :  { %1506 = vmatprep.subr.bf16.mxu0 %v4691_v51  ;;  %1678 = vmatprep.subr.bf16.mxu1 %v4694_v52  ;;  %v1836_v51 = vunpack.c.h.s8.bf16 %v1764_v43  ;;  %v1839_v52 = vunpack.c.l.s8.bf16 %v1767_v48 }
 0x151   :  { %1507 = vmatpush1.bf16.msra.mxu0 %v4689_v53  ;;  %1679 = vmatpush1.bf16.msra.mxu1 %v4692_v54  ;;  %v1841_v53 = vunpack.c.l.s8.bf16 %v1769_v49  ;;  %v1766_v54 = vld [vmem:[#allocation7 + $0x40] sm:$0xff] }
 0x152   :  { %1508 = vmatprep.subr.bf16.mxu0 %v4697_v55  ;;  %1680 = vmatprep.subr.bf16.mxu1 %v4700_v56  ;;  %v1768_v55 = vld [vmem:[#allocation7 + $0x50] sm:$0xff]  ;;  %v1838_v56 = vunpack.c.l.s8.bf16 %v1766_v54 }
 0x155   :  { %1509 = vmatpush1.bf16.msra.mxu0 %v4695_v57  ;;  %1681 = vmatpush1.bf16.msra.mxu1 %v4698_v58  ;;  %v1840_v57 = vunpack.c.l.s8.bf16 %v1768_v55  ;;  %v1843_v58 = vunpack.c.h.s8.bf16 %v1767_v48 }
 0x156   :  { %1510 = vmatprep.subr.bf16.mxu0 %v4703_v59  ;;  %1682 = vmatprep.subr.bf16.mxu1 %v4706_v60  ;;  %v1845_v59 = vunpack.c.h.s8.bf16 %v1769_v49  ;;  %v1771_v60 = vld [vmem:[#allocation7 + $0x68] sm:$0xff] }
 0x159   :  { %1511 = vmatpush1.bf16.msra.mxu0 %v4701_v61  ;;  %1683 = vmatpush1.bf16.msra.mxu1 %v4704_v62  ;;  %v1773_v61 = vld [vmem:[#allocation7 + $0x78] sm:$0xff]  ;;  %v1842_v62 = vunpack.c.h.s8.bf16 %v1766_v54 }
 0x15a   :  { %1512 = vmatprep.subr.bf16.mxu0 %v4709_v63  ;;  %1684 = vmatprep.subr.bf16.mxu1 %v4712_v0  ;;  %v1844_v63 = vunpack.c.h.s8.bf16 %v1768_v55  ;;  %v1847_v0 = vunpack.c.l.s8.bf16 %v1771_v60 }
 0x15d   :  { %1513 = vmatpush1.bf16.msra.mxu0 %v4707_v1  ;;  %1685 = vmatpush1.bf16.msra.mxu1 %v4710_v2  ;;  %v1849_v1 = vunpack.c.l.s8.bf16 %v1773_v61  ;;  %v1770_v2 = vld [vmem:[#allocation7 + $0x60] sm:$0xff] }
 0x15e   :  { %1514 = vmatprep.subr.bf16.mxu0 %v4715_v3  ;;  %1686 = vmatprep.subr.bf16.mxu1 %v4718_v4  ;;  %v1772_v3 = vld [vmem:[#allocation7 + $0x70] sm:$0xff]  ;;  %v1846_v4 = vunpack.c.l.s8.bf16 %v1770_v2 }
 0x161   :  { %1515 = vmatpush1.bf16.msra.mxu0 %v4713_v5  ;;  %1687 = vmatpush1.bf16.msra.mxu1 %v4716_v6  ;;  %v1848_v5 = vunpack.c.l.s8.bf16 %v1772_v3  ;;  %v1851_v6 = vunpack.c.h.s8.bf16 %v1771_v60 }
 0x162   :  { %1516 = vmatprep.subr.bf16.mxu0 %v4721_v7  ;;  %1688 = vmatprep.subr.bf16.mxu1 %v4724_v8  ;;  %v1853_v7 = vunpack.c.h.s8.bf16 %v1773_v61  ;;  %v1775_v8 = vld [vmem:[#allocation7 + $0x88] sm:$0xff] }
 0x165   :  { %1517 = vmatpush1.bf16.msra.mxu0 %v4719_v9  ;;  %1689 = vmatpush1.bf16.msra.mxu1 %v4722_v10  ;;  %v1777_v9 = vld [vmem:[#allocation7 + $0x98] sm:$0xff]  ;;  %v1850_v10 = vunpack.c.h.s8.bf16 %v1770_v2  ;;  %v396_v2 = vld [vmem:[%s5409_s0] sm:$0xf]  ;;  %s4964_s0 = smov [#allocation16]  }
 0x166   :  { %1518 = vmatprep.subr.bf16.mxu0 %v4727_v11  ;;  %1690 = vmatprep.subr.bf16.mxu1 %v4730_v12  ;;  %v1852_v11 = vunpack.c.h.s8.bf16 %v1772_v3  ;;  %v1855_v12 = vunpack.c.l.s8.bf16 %v1775_v8  ;;  %s4093_s4 = sshll.u32 %s4964_s0, 4  ;;  %s4094_s4 = int_to_ptr.vmem [resolvable:$true] %s4093_s4 }
 0x167   :  { %p4918_p9 = scmp.lt.s32.totalorder %s4094_s4, %s4094_s4 }
 0x169   :  { %1519 = vmatpush1.bf16.msra.mxu0 %v4725_v13  ;;  %1691 = vmatpush1.bf16.msra.mxu1 %v4728_v14  ;;  %v1857_v13 = vunpack.c.l.s8.bf16 %v1777_v9  ;;  %v1774_v14 = vld [vmem:[#allocation7 + $0x80] sm:$0xff] }
 0x16a   :  { %1531 = vmatprep.subr.bf16.mxu0 %v4733_v17  ;;  %1703 = vmatprep.subr.bf16.mxu1 %v4736_v18  ;;  %v1854_v16 = vunpack.c.l.s8.bf16 %v1774_v14  ;;  %v1856_v17 = vunpack.c.l.s8.bf16 %v1776_v15  ;;  %v1859_v18 = vunpack.c.h.s8.bf16 %v1775_v8 }
 0x16c   :  { %1521 = vmatmul.mubr.bf16.vlgmr.msra.gmra.mrb[0].mxu0 %v197_v19  ;;  %1693 = vmatmul.mubr.bf16.vlgmr.msra.gmra.mrb[0].mxu1 %v197_v19  ;;  %v1861_v19 = vunpack.c.h.s8.bf16 %v1777_v9 }
 0x16d   :  { %1532 = vmatpush1.bf16.msra.mxu0 %v4731_v22  ;;  %1704 = vmatpush1.bf16.msra.mxu1 %v4734_v23  ;;  %v1858_v22 = vunpack.c.h.s8.bf16 %v1774_v14  ;;  %v1860_v23 = vunpack.c.h.s8.bf16 %v1776_v15 }
 0x16e   :  { %1563 = vmatprep.mubr.bf16.mxu0 %v4963_v26  ;;  %1735 = vmatprep.mubr.bf16.mxu1 %v4963_v26  ;;  %v1778_v26 = vld [vmem:[#allocation7 + $0xa0] sm:$0xff] }
 0x16f   :  { %1950 = vmatprep.subr.bf16.mxu0 %v1823_v24  ;;  %2036 = vmatprep.subr.bf16.mxu1 %v1825_v25  ;;  %v1863_v24 = vunpack.c.l.s8.bf16 %v1779_v20  ;;  %v1865_v25 = vunpack.c.l.s8.bf16 %v1781_v21  ;;  %v1862_v28 = vunpack.c.l.s8.bf16 %v1778_v26 }
 0x178   :  { %4305 = vmatmul.mubr.msk.bf16.vlgmr.msra.gmra.mrb[0].mxu0 %vm1398_vm0, %v199_v31  ;;  %4306 = vmatmul.mubr.msk.bf16.vlgmr.msra.gmra.mrb[0].mxu1 %vm1398_vm0, %v199_v31  ;;  %v1869_v31 = vunpack.c.h.s8.bf16 %v1781_v21 }
 0x179   :  { %1951 = vmatpush1.bf16.msra.mxu0 %v1822_v32  ;;  %2037 = vmatpush1.bf16.msra.mxu1 %v1824_v33  ;;  %v1783_v32 = vld [vmem:[#allocation7 + $0xc8] sm:$0xff]  ;;  %v1785_v33 = vld [vmem:[#allocation7 + $0xd8] sm:$0xff] }
 0x17a   :  { %1952 = vmatprep.subr.bf16.mxu0 %v1827_v34  ;;  %2038 = vmatprep.subr.bf16.mxu1 %v1829_v35  ;;  %v1866_v34 = vunpack.c.h.s8.bf16 %v1778_v26  ;;  %v1868_v35 = vunpack.c.h.s8.bf16 %v1780_v27  ;;  %v1871_v36 = vunpack.c.l.s8.bf16 %v1783_v32  ;;  %v1873_v37 = vunpack.c.l.s8.bf16 %v1785_v33 }
 0x17b   :  { %v1875_v42 = vunpack.c.h.s8.bf16 %v1783_v32  ;;  %v1877_v43 = vunpack.c.h.s8.bf16 %v1785_v33 }
 0x17d   :  { %1953 = vmatpush1.bf16.msra.mxu0 %v1826_v38  ;;  %2039 = vmatpush1.bf16.msra.mxu1 %v1828_v39  ;;  %v1782_v38 = vld [vmem:[#allocation7 + $0xc0] sm:$0xff]  ;;  %v1784_v39 = vld [vmem:[#allocation7 + $0xd0] sm:$0xff] }
 0x17e   :  { %1954 = vmatprep.subr.bf16.mxu0 %v1831_v40  ;;  %2040 = vmatprep.subr.bf16.mxu1 %v1833_v41  ;;  %v1870_v40 = vunpack.c.l.s8.bf16 %v1782_v38  ;;  %v1872_v41 = vunpack.c.l.s8.bf16 %v1784_v39 }
 0x181   :  { %1955 = vmatpush1.bf16.msra.mxu0 %v1830_v44  ;;  %2041 = vmatpush1.bf16.msra.mxu1 %v1832_v45  ;;  %v1874_v44 = vunpack.c.h.s8.bf16 %v1782_v38  ;;  %v1876_v45 = vunpack.c.h.s8.bf16 %v1784_v39 }
 0x182   :  { %1956 = vmatprep.subr.bf16.mxu0 %v1835_v46  ;;  %2042 = vmatprep.subr.bf16.mxu1 %v1837_v47  ;;  %v1787_v46 = vld [vmem:[#allocation7 + $0xe8] sm:$0xff]  ;;  %v1789_v47 = vld [vmem:[#allocation7 + $0xf8] sm:$0xff] }
 0x183   :  { %v1879_v48 = vunpack.c.l.s8.bf16 %v1787_v46  ;;  %v1881_v49 = vunpack.c.l.s8.bf16 %v1789_v47  ;;  %v1883_v54 = vunpack.c.h.s8.bf16 %v1787_v46  ;;  %v1885_v55 = vunpack.c.h.s8.bf16 %v1789_v47 }
 0x185   :  { %1957 = vmatpush1.bf16.msra.mxu0 %v1834_v50  ;;  %2043 = vmatpush1.bf16.msra.mxu1 %v1836_v51  ;;  %v1786_v50 = vld [vmem:[#allocation7 + $0xe0] sm:$0xff]  ;;  %v1788_v51 = vld [vmem:[#allocation7 + $0xf0] sm:$0xff] }
 0x186   :  { %1958 = vmatprep.subr.bf16.mxu0 %v1839_v52  ;;  %2044 = vmatprep.subr.bf16.mxu1 %v1841_v53  ;;  %v1878_v52 = vunpack.c.l.s8.bf16 %v1786_v50  ;;  %v1880_v53 = vunpack.c.l.s8.bf16 %v1788_v51 }
 0x189   :  { %1959 = vmatpush1.bf16.msra.mxu0 %v1838_v56  ;;  %2045 = vmatpush1.bf16.msra.mxu1 %v1840_v57  ;;  %v1882_v56 = vunpack.c.h.s8.bf16 %v1786_v50  ;;  %v1884_v57 = vunpack.c.h.s8.bf16 %v1788_v51  ;;  %v1796_v50 = vld [vmem:[#allocation7 + $0x130] sm:$0xff] }
 0x18a   :  { %1960 = vmatprep.subr.bf16.mxu0 %v1843_v58  ;;  %2046 = vmatprep.subr.bf16.mxu1 %v1845_v59  ;;  %v5203_v58 = vld [vmem:[#allocation7 + $0x108] sm:$0xff]  ;;  %v5205_v59 = vld [vmem:[#allocation7 + $0x118] sm:$0xff] }
 0x18b   :  { %v1887_v60 = vunpack.c.l.s8.bf16 %v5203_v58  ;;  %v1889_v61 = vunpack.c.l.s8.bf16 %v5205_v59 }
 0x18d   :  { %1961 = vmatpush1.bf16.msra.mxu0 %v1842_v62  ;;  %2047 = vmatpush1.bf16.msra.mxu1 %v1844_v63  ;;  %v398_v62 = vlaneseq }
 0x18e   :  { %1962 = vmatprep.subr.bf16.mxu0 %v1847_v0  ;;  %2048 = vmatprep.subr.bf16.mxu1 %v1849_v1 }
 0x18f   :  { %v399_v63 = vshrl.u32 %v398_v62, 7  ;;  %v1800_v62 = vld [vmem:[#allocation7 + $0x150] sm:$0xff] }
 0x191   :  { %1963 = vmatpush1.bf16.msra.mxu0 %v1846_v4  ;;  %2049 = vmatpush1.bf16.msra.mxu1 %v1848_v5  ;;  %v5209_v0 = vsub.s32 0, %v399_v63  ;;  %v5211_v1 = vsub.s32 2, %v399_v63  ;;  %v5216_v3 = vsub.s32 1, %v399_v63  ;;  %v5218_v4 = vsub.s32 3, %v399_v63 }
 0x192   :  { %1964 = vmatprep.subr.bf16.mxu0 %v1851_v6  ;;  %2050 = vmatprep.subr.bf16.mxu1 %v1853_v7 }
 0x193   :  { %v401_v5 = vrot.slane %v396_v2, %v5209_v0  ;;  %v409_v6 = vrot.slane %v396_v2, %v5211_v1  ;;  %v405_v7 = vrot.slane %v396_v2, %v5216_v3  ;;  %v413_v8 = vrot.slane %v396_v2, %v5218_v4 }
 0x194   :  { %v1904_v2 = vunpack.c.l.s8.bf16 %v1800_v62 }
 0x195   :  { %1965 = vmatpush1.bf16.msra.mxu0 %v1850_v10  ;;  %2051 = vmatpush1.bf16.msra.mxu1 %v1852_v11 }
 0x196   :  { %1966 = vmatprep.subr.bf16.mxu0 %v1855_v12  ;;  %2052 = vmatprep.subr.bf16.mxu1 %v1857_v13 }
 0x199   :  { %1967 = vmatpush1.bf16.msra.mxu0 %v1854_v16  ;;  %2053 = vmatpush1.bf16.msra.mxu1 %v1856_v17 }
 0x19a   :  { %1968 = vmatprep.subr.bf16.mxu0 %v1859_v18  ;;  %2054 = vmatprep.subr.bf16.mxu1 %v1861_v19 }
 0x19d   :  { %1969 = vmatpush1.bf16.msra.mxu0 %v1858_v22  ;;  %2055 = vmatpush1.bf16.msra.mxu1 %v1860_v23 }
 0x19e   :  { %1970 = vmatprep.subr.bf16.mxu0 %v1863_v24  ;;  %2056 = vmatprep.subr.bf16.mxu1 %v1865_v25 }
 0x1a1   :  { %1971 = vmatpush1.bf16.msra.mxu0 %v1862_v28  ;;  %2057 = vmatpush1.bf16.msra.mxu1 %v1864_v29  ;;  %v1790_v29 = vld [vmem:[#allocation7 + $0x100] sm:$0xff] }
 0x1a2   :  { %1972 = vmatprep.subr.bf16.mxu0 %v1867_v30  ;;  %2058 = vmatprep.subr.bf16.mxu1 %v1869_v31  ;;  %v1792_v30 = vld [vmem:[#allocation7 + $0x110] sm:$0xff]  ;;  %v1886_v39 = vunpack.c.l.s8.bf16 %v1790_v29 }
 0x1a3   :  { %v1892_v46 = vunpack.c.h.s8.bf16 %v1792_v30 }
 0x1a5   :  { %1973 = vmatpush1.bf16.msra.mxu0 %v1866_v34  ;;  %2059 = vmatpush1.bf16.msra.mxu1 %v1868_v35 }
 0x1a6   :  { %1974 = vmatprep.subr.bf16.mxu0 %v1871_v36  ;;  %2060 = vmatprep.subr.bf16.mxu1 %v1873_v37 }
 0x1a9   :  { %1975 = vmatpush1.bf16.msra.mxu0 %v1870_v40  ;;  %2061 = vmatpush1.bf16.msra.mxu1 %v1872_v41  ;;  %v1888_v40 = vunpack.c.l.s8.bf16 %v1792_v30  ;;  %v1891_v41 = vunpack.c.h.s8.bf16 %v5203_v58  ;;  %v1900_v58 = vunpack.c.h.s8.bf16 %v1796_v50 }
 0x1aa   :  { %1976 = vmatprep.subr.bf16.mxu0 %v1875_v42  ;;  %2062 = vmatprep.subr.bf16.mxu1 %v1877_v43  ;;  %v1893_v42 = vunpack.c.h.s8.bf16 %v5205_v59  ;;  %v1795_v43 = vld [vmem:[#allocation7 + $0x128] sm:$0xff] }
 0x1ab   :  { %v1895_v47 = vunpack.c.l.s8.bf16 %v1795_v43 }
 0x1ad   :  { %1977 = vmatpush1.bf16.msra.mxu0 %v1874_v44  ;;  %2063 = vmatpush1.bf16.msra.mxu1 %v1876_v45  ;;  %v1797_v44 = vld [vmem:[#allocation7 + $0x138] sm:$0xff]  ;;  %v1890_v45 = vunpack.c.h.s8.bf16 %v1790_v29 }
 0x1ae   :  { %1978 = vmatprep.subr.bf16.mxu0 %v1879_v48  ;;  %2064 = vmatprep.subr.bf16.mxu1 %v1881_v49  ;;  %v1897_v48 = vunpack.c.l.s8.bf16 %v1797_v44  ;;  %v1794_v49 = vld [vmem:[#allocation7 + $0x120] sm:$0xff] }
 0x1af   :  { %v1894_v51 = vunpack.c.l.s8.bf16 %v1794_v49 }
 0x1b1   :  { %1979 = vmatpush1.bf16.msra.mxu0 %v1878_v52  ;;  %2065 = vmatpush1.bf16.msra.mxu1 %v1880_v53  ;;  %v1896_v52 = vunpack.c.l.s8.bf16 %v1796_v50  ;;  %v1899_v53 = vunpack.c.h.s8.bf16 %v1795_v43  ;;  %v1814_v50 = vld [vmem:[#allocation7 + $0x1c0] sm:$0xff] }
 0x1b2   :  { %1980 = vmatprep.subr.bf16.mxu0 %v1883_v54  ;;  %2066 = vmatprep.subr.bf16.mxu1 %v1885_v55  ;;  %v1901_v54 = vunpack.c.h.s8.bf16 %v1797_v44  ;;  %v1799_v55 = vld [vmem:[#allocation7 + $0x148] sm:$0xff] }
 0x1b3   :  { %v1903_v59 = vunpack.c.l.s8.bf16 %v1799_v55  ;;  %v1815_v44 = vld [vmem:[#allocation7 + $0x1c8] sm:$0xff] }
 0x1b5   :  { %1981 = vmatpush1.bf16.msra.mxu0 %v1882_v56  ;;  %2067 = vmatpush1.bf16.msra.mxu1 %v1884_v57  ;;  %v1801_v56 = vld [vmem:[#allocation7 + $0x158] sm:$0xff]  ;;  %v1898_v57 = vunpack.c.h.s8.bf16 %v1794_v49 }
 0x1b6   :  { %1993 = vmatprep.subr.bf16.mxu0 %v1887_v60  ;;  %2079 = vmatprep.subr.bf16.mxu1 %v1889_v61  ;;  %v1905_v60 = vunpack.c.l.s8.bf16 %v1801_v56  ;;  %v1798_v61 = vld [vmem:[#allocation7 + $0x140] sm:$0xff] }
 0x1b7   :  { %v1902_v63 = vunpack.c.l.s8.bf16 %v1798_v61 }
 0x24b   :  { %v1565_v9 = vpop.f32.mrb[0].mxu0  ;;  %v1737_v10 = vpop.f32.mrb[0].mxu1 }
 0x24c   :  { %v4353_v11 = vadd.f32 %v1565_v9, %v401_v5  ;;  %v4357_v12 = vadd.f32 %v1737_v10, %v409_v6  ;;  %v1567_v13 = vpop.f32.mrb[1].mxu0  ;;  %v1739_v14 = vpop.f32.mrb[1].mxu1  ;;  %v1906_v9 = vunpack.c.h.s8.bf16 %v1798_v61  ;;  %v1908_v10 = vunpack.c.h.s8.bf16 %v1800_v62  ;;  %v1818_v62 = vld [vmem:[#allocation7 + $0x1e0] sm:$0xff] }
 0x24d   :  { %v4354_v15 = vadd.f32 %v1567_v13, %v405_v7  ;;  %v4358_v16 = vadd.f32 %v1739_v14, %v413_v8  ;;  %v1569_v17 = vpop.f32.mrb[2].mxu0  ;;  %v1741_v18 = vpop.f32.mrb[2].mxu1  ;;  %v1802_v13 = vld [vmem:[#allocation7 + $0x160] sm:$0xff]  ;;  %v1804_v14 = vld [vmem:[#allocation7 + $0x170] sm:$0xff] }
 0x24e   :  { %v4355_v19 = vadd.f32 %v1569_v17, %v401_v5  ;;  %v4359_v20 = vadd.f32 %v1741_v18, %v409_v6  ;;  %v1571_v21 = vpop.f32.mrb[3].mxu0  ;;  %v1743_v22 = vpop.f32.mrb[3].mxu1  ;;  %v1746_v25 = vmax.f32 %v4353_v11, 0.0  ;;  %v1748_v26 = vmax.f32 %v4357_v12, 0.0 }
 0x24f   :  { %v4356_v23 = vadd.f32 %v1571_v21, %v405_v7  ;;  %v4360_v24 = vadd.f32 %v1743_v22, %v413_v8  ;;  %v1747_v31 = vmax.f32 %v4354_v15, 0.0  ;;  %v1749_v32 = vmax.f32 %v4358_v16, 0.0  ;;  %v1803_v7 = vld [vmem:[#allocation7 + $0x168] sm:$0xff]  ;;  %v1805_v8 = vld [vmem:[#allocation7 + $0x178] sm:$0xff] }
 0x250   :  { %v1750_v27 = vmax.f32 %v4355_v19, 0.0  ;;  %v1752_v28 = vmax.f32 %v4359_v20, 0.0  ;;  %v1907_v5 = vunpack.c.h.s8.bf16 %v1799_v55  ;;  %v1909_v6 = vunpack.c.h.s8.bf16 %v1801_v56  ;;  %v1807_v19 = vld [vmem:[#allocation7 + $0x188] sm:$0xff]  ;;  %v1809_v20 = vld [vmem:[#allocation7 + $0x198] sm:$0xff] }
 0x251   :  { %v1751_v33 = vmax.f32 %v4356_v23, 0.0  ;;  %v1753_v34 = vmax.f32 %v4360_v24, 0.0  ;;  %v1911_v11 = vunpack.c.l.s8.bf16 %v1803_v7  ;;  %v1913_v12 = vunpack.c.l.s8.bf16 %v1805_v8  ;;  %v1819_v56 = vld [vmem:[#allocation7 + $0x1e8] sm:$0xff] }
 0x252   :  { %v1754_v35 = vpack.c.bf16 %v1750_v27, %v1746_v25  ;;  %v5224_v36 = vpack.c.bf16 %v1752_v28, %v1748_v26  ;;  %v1910_v15 = vunpack.c.l.s8.bf16 %v1802_v13  ;;  %v1912_v16 = vunpack.c.l.s8.bf16 %v1804_v14  ;;  %v1806_v25 = vld [vmem:[#allocation7 + $0x180] sm:$0xff]  ;;  %v1808_v26 = vld [vmem:[#allocation7 + $0x190] sm:$0xff] }
 0x253   :  { %v1755_v37 = vpack.c.bf16 %v1751_v33, %v1747_v31  ;;  %v1757_v38 = vpack.c.bf16 %v1753_v34, %v1749_v32  ;;  %v1915_v17 = vunpack.c.h.s8.bf16 %v1803_v7  ;;  %v1917_v18 = vunpack.c.h.s8.bf16 %v1805_v8  ;;  %v1811_v31 = vld [vmem:[#allocation7 + $0x1a8] sm:$0xff]  ;;  %v1813_v32 = vld [vmem:[#allocation7 + $0x1b8] sm:$0xff] }
 0x254   :  { %v1914_v21 = vunpack.c.h.s8.bf16 %v1802_v13  ;;  %v1916_v22 = vunpack.c.h.s8.bf16 %v1804_v14  ;;  %v1919_v23 = vunpack.c.l.s8.bf16 %v1807_v19  ;;  %v1921_v24 = vunpack.c.l.s8.bf16 %v1809_v20  ;;  %v2195_v8 = vld [vmem:[#allocation8 + $0x8] sm:$0xff]  ;;  %v2194_v14 = vld [vmem:[#allocation8] sm:$0xff] }
 0x255   :  { %1982 = vmatprep.mubr.bf16.mxu0 %v1755_v37  ;;  %2068 = vmatprep.mubr.bf16.mxu1 %v1755_v37  ;;  %v1918_v27 = vunpack.c.l.s8.bf16 %v1806_v25  ;;  %v1920_v28 = vunpack.c.l.s8.bf16 %v1808_v26  ;;  %v1923_v29 = vunpack.c.h.s8.bf16 %v1807_v19  ;;  %v1925_v30 = vunpack.c.h.s8.bf16 %v1809_v20  ;;  %v2199_v20 = vld [vmem:[#allocation8 + $0x28] sm:$0xff] }
 0x256   :  { %1983 = vmatmul.mubr.bf16.vlgmr.msra.gmra.mrb[4].mxu0 %v1754_v35  ;;  %2069 = vmatmul.mubr.bf16.vlgmr.msra.gmra.mrb[4].mxu1 %v1754_v35  ;;  %v1922_v33 = vunpack.c.h.s8.bf16 %v1806_v25  ;;  %v1924_v34 = vunpack.c.h.s8.bf16 %v1808_v26  ;;  %v1927_v35 = vunpack.c.l.s8.bf16 %v1811_v31  ;;  %v1929_v37 = vunpack.c.l.s8.bf16 %v1813_v32  ;;  %v2198_v26 = vld [vmem:[#allocation8 + $0x20] sm:$0xff] }
 0x257   :  { %1994 = vmatpush1.bf16.msra.mxu0 %v1886_v39  ;;  %2080 = vmatpush1.bf16.msra.mxu1 %v1888_v40  ;;  %v1812_v39 = vld [vmem:[#allocation7 + $0x1b0] sm:$0xff]  ;;  %v1933_v43 = vunpack.c.h.s8.bf16 %v1813_v32  ;;  %v2203_v32 = vld [vmem:[#allocation8 + $0x48] sm:$0xff] }
 0x258   :  { %2025 = vmatprep.mubr.bf16.mxu0 %v1757_v38  ;;  %2111 = vmatprep.mubr.bf16.mxu1 %v1757_v38  ;;  %v1810_v38 = vld [vmem:[#allocation7 + $0x1a0] sm:$0xff] }
 0x259   :  { %1995 = vmatprep.subr.bf16.mxu0 %v1891_v41  ;;  %2081 = vmatprep.subr.bf16.mxu1 %v1893_v42  ;;  %v1926_v40 = vunpack.c.l.s8.bf16 %v1810_v38  ;;  %v1928_v41 = vunpack.c.l.s8.bf16 %v1812_v39  ;;  %v1931_v42 = vunpack.c.h.s8.bf16 %v1811_v31 }
 0x25b   :  { %1996 = vmatpush1.bf16.msra.mxu0 %v1890_v45  ;;  %2082 = vmatpush1.bf16.msra.mxu1 %v1892_v46  ;;  %v1817_v45 = vld [vmem:[#allocation7 + $0x1d8] sm:$0xff]  ;;  %v1930_v46 = vunpack.c.h.s8.bf16 %v1810_v38  ;;  %v2202_v38 = vld [vmem:[#allocation8 + $0x40] sm:$0xff] }
 0x25c   :  { %1997 = vmatprep.subr.bf16.mxu0 %v1895_v47  ;;  %2083 = vmatprep.subr.bf16.mxu1 %v1897_v48  ;;  %v1932_v47 = vunpack.c.h.s8.bf16 %v1812_v39  ;;  %v1935_v48 = vunpack.c.l.s8.bf16 %v1815_v44  ;;  %v1937_v49 = vunpack.c.l.s8.bf16 %v1817_v45  ;;  %v1941_v55 = vunpack.c.h.s8.bf16 %v1817_v45  ;;  %v2204_v39 = vld [vmem:[#allocation8 + $0x50] sm:$0xff]  ;;  %v2209_v45 = vld [vmem:[#allocation8 + $0x78] sm:$0xff] }
 0x25f   :  { %1998 = vmatpush1.bf16.msra.mxu0 %v1894_v51  ;;  %2084 = vmatpush1.bf16.msra.mxu1 %v1896_v52  ;;  %v1816_v51 = vld [vmem:[#allocation7 + $0x1d0] sm:$0xff]  ;;  %v1934_v52 = vunpack.c.l.s8.bf16 %v1814_v50 }
 0x260   :  { %1999 = vmatprep.subr.bf16.mxu0 %v1899_v53  ;;  %2085 = vmatprep.subr.bf16.mxu1 %v1901_v54  ;;  %v1936_v53 = vunpack.c.l.s8.bf16 %v1816_v51  ;;  %v1939_v54 = vunpack.c.h.s8.bf16 %v1815_v44  ;;  %v2207_v44 = vld [vmem:[#allocation8 + $0x68] sm:$0xff] }
 0x263   :  { %2000 = vmatpush1.bf16.msra.mxu0 %v1898_v57  ;;  %2086 = vmatpush1.bf16.msra.mxu1 %v1900_v58  ;;  %v1821_v57 = vld [vmem:[#allocation7 + $0x1f8] sm:$0xff]  ;;  %v1938_v58 = vunpack.c.h.s8.bf16 %v1814_v50  ;;  %v2206_v50 = vld [vmem:[#allocation8 + $0x60] sm:$0xff] }
 0x264   :  { %2001 = vmatprep.subr.bf16.mxu0 %v1903_v59  ;;  %2087 = vmatprep.subr.bf16.mxu1 %v1905_v60  ;;  %v1940_v59 = vunpack.c.h.s8.bf16 %v1816_v51  ;;  %v1943_v60 = vunpack.c.l.s8.bf16 %v1819_v56  ;;  %v1945_v61 = vunpack.c.l.s8.bf16 %v1821_v57  ;;  %v1949_v7 = vunpack.c.h.s8.bf16 %v1821_v57  ;;  %v2208_v51 = vld [vmem:[#allocation8 + $0x70] sm:$0xff]  ;;  %v2213_v57 = vld [vmem:[#allocation8 + $0x98] sm:$0xff] }
 0x267   :  { %2002 = vmatpush1.bf16.msra.mxu0 %v1902_v63  ;;  %2088 = vmatpush1.bf16.msra.mxu1 %v1904_v2  ;;  %v1820_v63 = vld [vmem:[#allocation7 + $0x1f0] sm:$0xff]  ;;  %v1942_v2 = vunpack.c.l.s8.bf16 %v1818_v62 }
 0x268   :  { %2003 = vmatprep.subr.bf16.mxu0 %v1907_v5  ;;  %2089 = vmatprep.subr.bf16.mxu1 %v1909_v6  ;;  %v1944_v5 = vunpack.c.l.s8.bf16 %v1820_v63  ;;  %v1947_v6 = vunpack.c.h.s8.bf16 %v1819_v56  ;;  %v2211_v56 = vld [vmem:[#allocation8 + $0x88] sm:$0xff] }
 0x26b   :  { %2004 = vmatpush1.bf16.msra.mxu0 %v1906_v9  ;;  %2090 = vmatpush1.bf16.msra.mxu1 %v1908_v10  ;;  %v2197_v9 = vld [vmem:[#allocation8 + $0x18] sm:$0xff]  ;;  %v1946_v10 = vunpack.c.h.s8.bf16 %v1818_v62  ;;  %v2210_v62 = vld [vmem:[#allocation8 + $0x80] sm:$0xff] }
 0x26c   :  { %2005 = vmatprep.subr.bf16.mxu0 %v1911_v11  ;;  %2091 = vmatprep.subr.bf16.mxu1 %v1913_v12  ;;  %v1948_v11 = vunpack.c.h.s8.bf16 %v1820_v63  ;;  %v2259_v12 = vunpack.c.l.s8.bf16 %v2195_v8  ;;  %v2261_v13 = vunpack.c.l.s8.bf16 %v2197_v9  ;;  %v2265_v19 = vunpack.c.h.s8.bf16 %v2197_v9  ;;  %v2212_v63 = vld [vmem:[#allocation8 + $0x90] sm:$0xff]  ;;  %v2217_v9 = vld [vmem:[#allocation8 + $0xb8] sm:$0xff] }
 0x26f   :  { %2006 = vmatpush1.bf16.msra.mxu0 %v1910_v15  ;;  %2092 = vmatpush1.bf16.msra.mxu1 %v1912_v16  ;;  %v2196_v15 = vld [vmem:[#allocation8 + $0x10] sm:$0xff]  ;;  %v2258_v16 = vunpack.c.l.s8.bf16 %v2194_v14 }
 0x270   :  { %2007 = vmatprep.subr.bf16.mxu0 %v1915_v17  ;;  %2093 = vmatprep.subr.bf16.mxu1 %v1917_v18  ;;  %v2260_v17 = vunpack.c.l.s8.bf16 %v2196_v15  ;;  %v2263_v18 = vunpack.c.h.s8.bf16 %v2195_v8  ;;  %v2215_v8 = vld [vmem:[#allocation8 + $0xa8] sm:$0xff] }
 0x273   :  { %2008 = vmatpush1.bf16.msra.mxu0 %v1914_v21  ;;  %2094 = vmatpush1.bf16.msra.mxu1 %v1916_v22  ;;  %v2201_v21 = vld [vmem:[#allocation8 + $0x38] sm:$0xff]  ;;  %v2262_v22 = vunpack.c.h.s8.bf16 %v2194_v14  ;;  %v2214_v14 = vld [vmem:[#allocation8 + $0xa0] sm:$0xff] }
 0x274   :  { %2009 = vmatprep.subr.bf16.mxu0 %v1919_v23  ;;  %2095 = vmatprep.subr.bf16.mxu1 %v1921_v24  ;;  %v2264_v23 = vunpack.c.h.s8.bf16 %v2196_v15  ;;  %v2267_v24 = vunpack.c.l.s8.bf16 %v2199_v20  ;;  %v2269_v25 = vunpack.c.l.s8.bf16 %v2201_v21  ;;  %v2273_v31 = vunpack.c.h.s8.bf16 %v2201_v21  ;;  %v2216_v15 = vld [vmem:[#allocation8 + $0xb0] sm:$0xff]  ;;  %v2221_v21 = vld [vmem:[#allocation8 + $0xd8] sm:$0xff] }
 0x277   :  { %2010 = vmatpush1.bf16.msra.mxu0 %v1918_v27  ;;  %2096 = vmatpush1.bf16.msra.mxu1 %v1920_v28  ;;  %v2200_v27 = vld [vmem:[#allocation8 + $0x30] sm:$0xff]  ;;  %v2266_v28 = vunpack.c.l.s8.bf16 %v2198_v26 }
 0x278   :  { %2011 = vmatprep.subr.bf16.mxu0 %v1923_v29  ;;  %2097 = vmatprep.subr.bf16.mxu1 %v1925_v30  ;;  %v2268_v29 = vunpack.c.l.s8.bf16 %v2200_v27  ;;  %v2271_v30 = vunpack.c.h.s8.bf16 %v2199_v20  ;;  %v2219_v20 = vld [vmem:[#allocation8 + $0xc8] sm:$0xff] }
 0x27b   :  { %2012 = vmatpush1.bf16.msra.mxu0 %v1922_v33  ;;  %2098 = vmatpush1.bf16.msra.mxu1 %v1924_v34  ;;  %v2270_v33 = vunpack.c.h.s8.bf16 %v2198_v26  ;;  %v2272_v34 = vunpack.c.h.s8.bf16 %v2200_v27  ;;  %v2218_v26 = vld [vmem:[#allocation8 + $0xc0] sm:$0xff]  ;;  %v2220_v27 = vld [vmem:[#allocation8 + $0xd0] sm:$0xff] }
 0x27c   :  { %2013 = vmatprep.subr.bf16.mxu0 %v1927_v35  ;;  %2099 = vmatprep.subr.bf16.mxu1 %v1929_v37  ;;  %v2275_v35 = vunpack.c.l.s8.bf16 %v2203_v32 }
 0x27f   :  { %2014 = vmatpush1.bf16.msra.mxu0 %v1926_v40  ;;  %2100 = vmatpush1.bf16.msra.mxu1 %v1928_v41  ;;  %v2274_v40 = vunpack.c.l.s8.bf16 %v2202_v38  ;;  %v2276_v41 = vunpack.c.l.s8.bf16 %v2204_v39 }
 0x280   :  { %2015 = vmatprep.subr.bf16.mxu0 %v1931_v42  ;;  %2101 = vmatprep.subr.bf16.mxu1 %v1933_v43  ;;  %v2279_v42 = vunpack.c.h.s8.bf16 %v2203_v32  ;;  %v2310_v32 = vunpack.c.h.s8.bf16 %v2218_v26 }
 0x283   :  { %2016 = vmatpush1.bf16.msra.mxu0 %v1930_v46  ;;  %2102 = vmatpush1.bf16.msra.mxu1 %v1932_v47  ;;  %v2278_v46 = vunpack.c.h.s8.bf16 %v2202_v38  ;;  %v2280_v47 = vunpack.c.h.s8.bf16 %v2204_v39  ;;  %v2222_v38 = vld [vmem:[#allocation8 + $0xe0] sm:$0xff]  ;;  %v2224_v39 = vld [vmem:[#allocation8 + $0xf0] sm:$0xff] }
 0x284   :  { %2017 = vmatprep.subr.bf16.mxu0 %v1935_v48  ;;  %2103 = vmatprep.subr.bf16.mxu1 %v1937_v49  ;;  %v2283_v48 = vunpack.c.l.s8.bf16 %v2207_v44  ;;  %v2285_v49 = vunpack.c.l.s8.bf16 %v2209_v45 }
 0x287   :  { %2018 = vmatpush1.bf16.msra.mxu0 %v1934_v52  ;;  %2104 = vmatpush1.bf16.msra.mxu1 %v1936_v53  ;;  %v2282_v52 = vunpack.c.l.s8.bf16 %v2206_v50  ;;  %v2284_v53 = vunpack.c.l.s8.bf16 %v2208_v51 }
 0x288   :  { %2019 = vmatprep.subr.bf16.mxu0 %v1939_v54  ;;  %2105 = vmatprep.subr.bf16.mxu1 %v1941_v55  ;;  %v2287_v54 = vunpack.c.h.s8.bf16 %v2207_v44  ;;  %v2289_v55 = vunpack.c.h.s8.bf16 %v2209_v45  ;;  %v2318_v44 = vunpack.c.h.s8.bf16 %v2222_v38  ;;  %v2320_v45 = vunpack.c.h.s8.bf16 %v2224_v39 }
 0x28b   :  { %2020 = vmatpush1.bf16.msra.mxu0 %v1938_v58  ;;  %2106 = vmatpush1.bf16.msra.mxu1 %v1940_v59  ;;  %v2286_v58 = vunpack.c.h.s8.bf16 %v2206_v50  ;;  %v2288_v59 = vunpack.c.h.s8.bf16 %v2208_v51  ;;  %v2122_v50 = vld [vmem:[%s5410_s6] sm:$0xf] }
 0x28c   :  { %2021 = vmatprep.subr.bf16.mxu0 %v1943_v60  ;;  %2107 = vmatprep.subr.bf16.mxu1 %v1945_v61  ;;  %v2291_v60 = vunpack.c.l.s8.bf16 %v2211_v56  ;;  %v2293_v61 = vunpack.c.l.s8.bf16 %v2213_v57  ;;  %v2152_v51 = vld [vmem:[%s5411_s25] sm:$0xf] }
 0x28f   :  { %2022 = vmatpush1.bf16.msra.mxu0 %v1942_v2  ;;  %2108 = vmatpush1.bf16.msra.mxu1 %v1944_v5  ;;  %v2290_v2 = vunpack.c.l.s8.bf16 %v2210_v62  ;;  %v2292_v5 = vunpack.c.l.s8.bf16 %v2212_v63 }
 0x290   :  { %2023 = vmatprep.subr.bf16.mxu0 %v1947_v6  ;;  %2109 = vmatprep.subr.bf16.mxu1 %v1949_v7  ;;  %v2295_v6 = vunpack.c.h.s8.bf16 %v2211_v56  ;;  %v2297_v7 = vunpack.c.h.s8.bf16 %v2213_v57  ;;  %v2157_v56 = vrot.slane %v2152_v51, %v5209_v0  ;;  %v2165_v57 = vrot.slane %v2152_v51, %v5211_v1 }
 0x293   :  { %2024 = vmatpush1.bf16.msra.mxu0 %v1946_v10  ;;  %2110 = vmatpush1.bf16.msra.mxu1 %v1948_v11  ;;  %v2294_v10 = vunpack.c.h.s8.bf16 %v2210_v62  ;;  %v2296_v11 = vunpack.c.h.s8.bf16 %v2212_v63 }
 0x294   :  { %2386 = vmatprep.subr.bf16.mxu0 %v2259_v12  ;;  %2472 = vmatprep.subr.bf16.mxu1 %v2261_v13  ;;  %v2299_v12 = vunpack.c.l.s8.bf16 %v2215_v8  ;;  %v2301_v13 = vunpack.c.l.s8.bf16 %v2217_v9 }
 0x296   :  { %2026 = vmatmul.mubr.bf16.vlgmr.msra.gmra.mrb[4].mxu0 %v5224_v36  ;;  %2112 = vmatmul.mubr.bf16.vlgmr.msra.gmra.mrb[4].mxu1 %v5224_v36  ;;  %v2205_v36 = vld [vmem:[#allocation8 + $0x58] sm:$0xff] }
 0x297   :  { %2387 = vmatpush1.bf16.msra.mxu0 %v2258_v16  ;;  %2473 = vmatpush1.bf16.msra.mxu1 %v2260_v17  ;;  %v2277_v37 = vunpack.c.l.s8.bf16 %v2205_v36  ;;  %v2281_v43 = vunpack.c.h.s8.bf16 %v2205_v36  ;;  %v2298_v16 = vunpack.c.l.s8.bf16 %v2214_v14  ;;  %v2300_v17 = vunpack.c.l.s8.bf16 %v2216_v15 }
 0x298   :  { %2388 = vmatprep.subr.bf16.mxu0 %v2263_v18  ;;  %2474 = vmatprep.subr.bf16.mxu1 %v2265_v19  ;;  %v2303_v18 = vunpack.c.h.s8.bf16 %v2215_v8  ;;  %v2305_v19 = vunpack.c.h.s8.bf16 %v2217_v9  ;;  %v2312_v36 = vunpack.c.h.s8.bf16 %v2220_v27 }
 0x29b   :  { %2389 = vmatpush1.bf16.msra.mxu0 %v2262_v22  ;;  %2475 = vmatpush1.bf16.msra.mxu1 %v2264_v23  ;;  %v2302_v22 = vunpack.c.h.s8.bf16 %v2214_v14  ;;  %v2304_v23 = vunpack.c.h.s8.bf16 %v2216_v15 }
 0x29c   :  { %2390 = vmatprep.subr.bf16.mxu0 %v2267_v24  ;;  %2476 = vmatprep.subr.bf16.mxu1 %v2269_v25  ;;  %v2307_v24 = vunpack.c.l.s8.bf16 %v2219_v20  ;;  %v2309_v25 = vunpack.c.l.s8.bf16 %v2221_v21 }
 0x29f   :  { %2391 = vmatpush1.bf16.msra.mxu0 %v2266_v28  ;;  %2477 = vmatpush1.bf16.msra.mxu1 %v2268_v29  ;;  %v2306_v28 = vunpack.c.l.s8.bf16 %v2218_v26  ;;  %v2308_v29 = vunpack.c.l.s8.bf16 %v2220_v27 }
 0x2a0   :  { %2392 = vmatprep.subr.bf16.mxu0 %v2271_v30  ;;  %2478 = vmatprep.subr.bf16.mxu1 %v2273_v31  ;;  %v2311_v30 = vunpack.c.h.s8.bf16 %v2219_v20  ;;  %v2313_v31 = vunpack.c.h.s8.bf16 %v2221_v21 }
 0x2a3   :  { %2393 = vmatpush1.bf16.msra.mxu0 %v2270_v33  ;;  %2479 = vmatpush1.bf16.msra.mxu1 %v2272_v34  ;;  %v2223_v33 = vld [vmem:[#allocation8 + $0xe8] sm:$0xff]  ;;  %v2225_v34 = vld [vmem:[#allocation8 + $0xf8] sm:$0xff] }
 0x2a4   :  { %2394 = vmatprep.subr.bf16.mxu0 %v2275_v35  ;;  %2480 = vmatprep.subr.bf16.mxu1 %v2277_v37  ;;  %v2315_v35 = vunpack.c.l.s8.bf16 %v2223_v33  ;;  %v2317_v37 = vunpack.c.l.s8.bf16 %v2225_v34 }
 0x2a7   :  { %2395 = vmatpush1.bf16.msra.mxu0 %v2274_v40  ;;  %2481 = vmatpush1.bf16.msra.mxu1 %v2276_v41  ;;  %v2314_v40 = vunpack.c.l.s8.bf16 %v2222_v38  ;;  %v2316_v41 = vunpack.c.l.s8.bf16 %v2224_v39 }
 0x2a8   :  { %2396 = vmatprep.subr.bf16.mxu0 %v2279_v42  ;;  %2482 = vmatprep.subr.bf16.mxu1 %v2281_v43  ;;  %v2319_v42 = vunpack.c.h.s8.bf16 %v2223_v33  ;;  %v2321_v43 = vunpack.c.h.s8.bf16 %v2225_v34 }
 0x2ab   :  { %2397 = vmatpush1.bf16.msra.mxu0 %v2278_v46  ;;  %2483 = vmatpush1.bf16.msra.mxu1 %v2280_v47  ;;  %v5230_v46 = vld [vmem:[#allocation8 + $0x108] sm:$0xff]  ;;  %v5232_v47 = vld [vmem:[#allocation8 + $0x118] sm:$0xff] }
 0x2ac   :  { %2398 = vmatprep.subr.bf16.mxu0 %v2283_v48  ;;  %2484 = vmatprep.subr.bf16.mxu1 %v2285_v49  ;;  %v2323_v48 = vunpack.c.l.s8.bf16 %v5230_v46  ;;  %v2325_v49 = vunpack.c.l.s8.bf16 %v5232_v47 }
 0x2af   :  { %2399 = vmatpush1.bf16.msra.mxu0 %v2282_v52  ;;  %2485 = vmatpush1.bf16.msra.mxu1 %v2284_v53  ;;  %v2127_v52 = vrot.slane %v2122_v50, %v5209_v0  ;;  %v2135_v53 = vrot.slane %v2122_v50, %v5211_v1 }
 0x2b0   :  { %2400 = vmatprep.subr.bf16.mxu0 %v2287_v54  ;;  %2486 = vmatprep.subr.bf16.mxu1 %v2289_v55  ;;  %v2131_v54 = vrot.slane %v2122_v50, %v5216_v3  ;;  %v2139_v55 = vrot.slane %v2122_v50, %v5218_v4  ;;  %v2230_v50 = vld [vmem:[#allocation8 + $0x120] sm:$0xff] }
 0x2b3   :  { %2401 = vmatpush1.bf16.msra.mxu0 %v2286_v58  ;;  %2487 = vmatpush1.bf16.msra.mxu1 %v2288_v59 }
 0x2b4   :  { %2402 = vmatprep.subr.bf16.mxu0 %v2291_v60  ;;  %2488 = vmatprep.subr.bf16.mxu1 %v2293_v61  ;;  %v2161_v60 = vrot.slane %v2152_v51, %v5216_v3  ;;  %v2169_v61 = vrot.slane %v2152_v51, %v5218_v4  ;;  %v2232_v51 = vld [vmem:[#allocation8 + $0x130] sm:$0xff] }
 0x2b7   :  { %2403 = vmatpush1.bf16.msra.mxu0 %v2290_v2  ;;  %2489 = vmatpush1.bf16.msra.mxu1 %v2292_v5 }
 0x2b8   :  { %2404 = vmatprep.subr.bf16.mxu0 %v2295_v6  ;;  %2490 = vmatprep.subr.bf16.mxu1 %v2297_v7 }
 0x2bb   :  { %2405 = vmatpush1.bf16.msra.mxu0 %v2294_v10  ;;  %2491 = vmatpush1.bf16.msra.mxu1 %v2296_v11 }
 0x2bc   :  { %2406 = vmatprep.subr.bf16.mxu0 %v2299_v12  ;;  %2492 = vmatprep.subr.bf16.mxu1 %v2301_v13 }
 0x2bf   :  { %2407 = vmatpush1.bf16.msra.mxu0 %v2298_v16  ;;  %2493 = vmatpush1.bf16.msra.mxu1 %v2300_v17 }
 0x2c0   :  { %2408 = vmatprep.subr.bf16.mxu0 %v2303_v18  ;;  %2494 = vmatprep.subr.bf16.mxu1 %v2305_v19 }
 0x2c3   :  { %2409 = vmatpush1.bf16.msra.mxu0 %v2302_v22  ;;  %2495 = vmatpush1.bf16.msra.mxu1 %v2304_v23 }
 0x2c4   :  { %2410 = vmatprep.subr.bf16.mxu0 %v2307_v24  ;;  %2496 = vmatprep.subr.bf16.mxu1 %v2309_v25 }
 0x2c7   :  { %2411 = vmatpush1.bf16.msra.mxu0 %v2306_v28  ;;  %2497 = vmatpush1.bf16.msra.mxu1 %v2308_v29  ;;  %v2226_v28 = vld [vmem:[#allocation8 + $0x100] sm:$0xff]  ;;  %v2228_v29 = vld [vmem:[#allocation8 + $0x110] sm:$0xff] }
 0x2c8   :  { %2412 = vmatprep.subr.bf16.mxu0 %v2311_v30  ;;  %2498 = vmatprep.subr.bf16.mxu1 %v2313_v31  ;;  %v2324_v38 = vunpack.c.l.s8.bf16 %v2228_v29 }
 0x2cb   :  { %2413 = vmatpush1.bf16.msra.mxu0 %v2310_v32  ;;  %2499 = vmatpush1.bf16.msra.mxu1 %v2312_v36 }
 0x2cc   :  { %2414 = vmatprep.subr.bf16.mxu0 %v2315_v35  ;;  %2500 = vmatprep.subr.bf16.mxu1 %v2317_v37  ;;  %v2322_v37 = vunpack.c.l.s8.bf16 %v2226_v28 }
 0x2cf   :  { %2415 = vmatpush1.bf16.msra.mxu0 %v2314_v40  ;;  %2501 = vmatpush1.bf16.msra.mxu1 %v2316_v41  ;;  %v2327_v40 = vunpack.c.h.s8.bf16 %v5230_v46  ;;  %v2329_v41 = vunpack.c.h.s8.bf16 %v5232_v47  ;;  %v2330_v46 = vunpack.c.l.s8.bf16 %v2230_v50  ;;  %v2332_v47 = vunpack.c.l.s8.bf16 %v2232_v51 }
 0x2d0   :  { %2416 = vmatprep.subr.bf16.mxu0 %v2319_v42  ;;  %2502 = vmatprep.subr.bf16.mxu1 %v2321_v43  ;;  %v2231_v42 = vld [vmem:[#allocation8 + $0x128] sm:$0xff]  ;;  %v2233_v43 = vld [vmem:[#allocation8 + $0x138] sm:$0xff] }
 0x2d3   :  { %2417 = vmatpush1.bf16.msra.mxu0 %v2318_v44  ;;  %2503 = vmatpush1.bf16.msra.mxu1 %v2320_v45  ;;  %v2326_v44 = vunpack.c.h.s8.bf16 %v2226_v28  ;;  %v2328_v45 = vunpack.c.h.s8.bf16 %v2228_v29 }
 0x2d4   :  { %2429 = vmatprep.subr.bf16.mxu0 %v2323_v48  ;;  %2515 = vmatprep.subr.bf16.mxu1 %v2325_v49  ;;  %v2331_v48 = vunpack.c.l.s8.bf16 %v2231_v42  ;;  %v2333_v49 = vunpack.c.l.s8.bf16 %v2233_v43 }
 0x369   :  { %v2027_v58 = vpop.f32.mrb[4].mxu0  ;;  %v2113_v59 = vpop.f32.mrb[4].mxu1 }
 0x36a   :  { %v2144_v62 = vmul.f32 %v2127_v52, %v2027_v58  ;;  %v2146_v63 = vmul.f32 %v2135_v53, %v2113_v59  ;;  %v2029_v2 = vpop.f32.mrb[5].mxu0  ;;  %v2115_v5 = vpop.f32.mrb[5].mxu1 }
 0x36b   :  { %v2145_v6 = vmul.f32 %v2131_v54, %v2029_v2  ;;  %v2147_v7 = vmul.f32 %v2139_v55, %v2115_v5  ;;  %v2031_v8 = vpop.f32.mrb[6].mxu0  ;;  %v2117_v9 = vpop.f32.mrb[6].mxu1 }
 0x36c   :  { %v2174_v10 = vadd.f32 %v2157_v56, %v2144_v62  ;;  %v2176_v11 = vadd.f32 %v2165_v57, %v2146_v63  ;;  %v2148_v12 = vmul.f32 %v2127_v52, %v2031_v8  ;;  %v2150_v13 = vmul.f32 %v2135_v53, %v2117_v9  ;;  %v2033_v14 = vpop.f32.mrb[7].mxu0  ;;  %v2119_v15 = vpop.f32.mrb[7].mxu1 }
 0x36d   :  { %v2175_v16 = vadd.f32 %v2161_v60, %v2145_v6  ;;  %v2177_v17 = vadd.f32 %v2169_v61, %v2147_v7  ;;  %v2149_v18 = vmul.f32 %v2131_v54, %v2033_v14  ;;  %v2151_v19 = vmul.f32 %v2139_v55, %v2119_v15  ;;  %v2235_v54 = vld [vmem:[#allocation8 + $0x148] sm:$0xff]  ;;  %v2237_v55 = vld [vmem:[#allocation8 + $0x158] sm:$0xff] }
 0x36e   :  { %v2178_v20 = vadd.f32 %v2157_v56, %v2148_v12  ;;  %v2180_v21 = vadd.f32 %v2165_v57, %v2150_v13  ;;  %v2182_v24 = vmax.f32 %v2174_v10, 0.0  ;;  %v2184_v25 = vmax.f32 %v2176_v11, 0.0  ;;  %v2239_v6 = vld [vmem:[#allocation8 + $0x168] sm:$0xff]  ;;  %v2241_v7 = vld [vmem:[#allocation8 + $0x178] sm:$0xff]  ;;  %v2238_v12 = vld [vmem:[#allocation8 + $0x160] sm:$0xff] }
 0x36f   :  { %v2179_v22 = vadd.f32 %v2161_v60, %v2149_v18  ;;  %v2181_v23 = vadd.f32 %v2169_v61, %v2151_v19  ;;  %v2183_v30 = vmax.f32 %v2175_v16, 0.0  ;;  %v2185_v31 = vmax.f32 %v2177_v17, 0.0  ;;  %v2234_v60 = vld [vmem:[#allocation8 + $0x140] sm:$0xff]  ;;  %v2236_v61 = vld [vmem:[#allocation8 + $0x150] sm:$0xff]  ;;  %v2243_v18 = vld [vmem:[#allocation8 + $0x188] sm:$0xff] }
 0x370   :  { %v2186_v26 = vmax.f32 %v2178_v20, 0.0  ;;  %v2188_v27 = vmax.f32 %v2180_v21, 0.0  ;;  %v2335_v52 = vunpack.c.h.s8.bf16 %v2231_v42  ;;  %v2337_v53 = vunpack.c.h.s8.bf16 %v2233_v43  ;;  %v2240_v13 = vld [vmem:[#allocation8 + $0x170] sm:$0xff]  ;;  %v2245_v19 = vld [vmem:[#allocation8 + $0x198] sm:$0xff]  ;;  %v2251_v43 = vld [vmem:[#allocation8 + $0x1c8] sm:$0xff] }
 0x371   :  { %v2187_v32 = vmax.f32 %v2179_v22, 0.0  ;;  %v2189_v36 = vmax.f32 %v2181_v23, 0.0  ;;  %v2334_v56 = vunpack.c.h.s8.bf16 %v2230_v50  ;;  %v2336_v57 = vunpack.c.h.s8.bf16 %v2232_v51  ;;  %v2250_v51 = vld [vmem:[#allocation8 + $0x1c0] sm:$0xff] }
 0x372   :  { %v2190_v33 = vpack.c.bf16 %v2186_v26, %v2182_v24  ;;  %v5250_v34 = vpack.c.bf16 %v2188_v27, %v2184_v25  ;;  %v2339_v58 = vunpack.c.l.s8.bf16 %v2235_v54  ;;  %v2341_v59 = vunpack.c.l.s8.bf16 %v2237_v55  ;;  %v2242_v24 = vld [vmem:[#allocation8 + $0x180] sm:$0xff]  ;;  %v2244_v25 = vld [vmem:[#allocation8 + $0x190] sm:$0xff] }
 0x373   :  { %v2191_v35 = vpack.c.bf16 %v2187_v32, %v2183_v30  ;;  %v2193_v39 = vpack.c.bf16 %v2189_v36, %v2185_v31  ;;  %v2338_v62 = vunpack.c.l.s8.bf16 %v2234_v60  ;;  %v2340_v63 = vunpack.c.l.s8.bf16 %v2236_v61  ;;  %v2247_v30 = vld [vmem:[#allocation8 + $0x1a8] sm:$0xff]  ;;  %v2249_v31 = vld [vmem:[#allocation8 + $0x1b8] sm:$0xff] }
 0x374   :  { %v2343_v2 = vunpack.c.h.s8.bf16 %v2235_v54  ;;  %v2345_v5 = vunpack.c.h.s8.bf16 %v2237_v55  ;;  %v2342_v8 = vunpack.c.h.s8.bf16 %v2234_v60  ;;  %v2344_v9 = vunpack.c.h.s8.bf16 %v2236_v61  ;;  %v2255_v55 = vld [vmem:[#allocation8 + $0x1e8] sm:$0xff]  ;;  %v2254_v61 = vld [vmem:[#allocation8 + $0x1e0] sm:$0xff] }
 0x375   :  { %2418 = vmatprep.mubr.bf16.mxu0 %v2191_v35  ;;  %2504 = vmatprep.mubr.bf16.mxu1 %v2191_v35  ;;  %v2347_v10 = vunpack.c.l.s8.bf16 %v2239_v6  ;;  %v2349_v11 = vunpack.c.l.s8.bf16 %v2241_v7  ;;  %v2346_v14 = vunpack.c.l.s8.bf16 %v2238_v12  ;;  %v2348_v15 = vunpack.c.l.s8.bf16 %v2240_v13 }
 0x376   :  { %2419 = vmatmul.mubr.bf16.vlgmr.msra.gmra.mrb[8].mxu0 %v2190_v33  ;;  %2505 = vmatmul.mubr.bf16.vlgmr.msra.gmra.mrb[8].mxu1 %v2190_v33  ;;  %v2351_v16 = vunpack.c.h.s8.bf16 %v2239_v6  ;;  %v2353_v17 = vunpack.c.h.s8.bf16 %v2241_v7  ;;  %v2350_v20 = vunpack.c.h.s8.bf16 %v2238_v12  ;;  %v2352_v21 = vunpack.c.h.s8.bf16 %v2240_v13  ;;  %v2631_v7 = vld [vmem:[#allocation10 + $0x8] sm:$0xff]  ;;  %v2630_v13 = vld [vmem:[#allocation10] sm:$0xff] }
 0x377   :  { %2430 = vmatpush1.bf16.msra.mxu0 %v2322_v37  ;;  %2516 = vmatpush1.bf16.msra.mxu1 %v2324_v38  ;;  %v2355_v22 = vunpack.c.l.s8.bf16 %v2243_v18  ;;  %v2357_v23 = vunpack.c.l.s8.bf16 %v2245_v19  ;;  %v2354_v26 = vunpack.c.l.s8.bf16 %v2242_v24  ;;  %v2356_v27 = vunpack.c.l.s8.bf16 %v2244_v25  ;;  %v2246_v37 = vld [vmem:[#allocation8 + $0x1a0] sm:$0xff]  ;;  %v2248_v38 = vld [vmem:[#allocation8 + $0x1b0] sm:$0xff] }
 0x378   :  { %2461 = vmatprep.mubr.bf16.mxu0 %v2193_v39  ;;  %2547 = vmatprep.mubr.bf16.mxu1 %v2193_v39  ;;  %v2359_v28 = vunpack.c.h.s8.bf16 %v2243_v18  ;;  %v2361_v29 = vunpack.c.h.s8.bf16 %v2245_v19  ;;  %v2358_v32 = vunpack.c.h.s8.bf16 %v2242_v24  ;;  %v2360_v36 = vunpack.c.h.s8.bf16 %v2244_v25  ;;  %v2635_v19 = vld [vmem:[#allocation10 + $0x28] sm:$0xff]  ;;  %v2634_v25 = vld [vmem:[#allocation10 + $0x20] sm:$0xff] }
 0x379   :  { %2431 = vmatprep.subr.bf16.mxu0 %v2327_v40  ;;  %2517 = vmatprep.subr.bf16.mxu1 %v2329_v41  ;;  %v2363_v33 = vunpack.c.l.s8.bf16 %v2247_v30  ;;  %v2365_v35 = vunpack.c.l.s8.bf16 %v2249_v31  ;;  %v2362_v39 = vunpack.c.l.s8.bf16 %v2246_v37  ;;  %v2364_v40 = vunpack.c.l.s8.bf16 %v2248_v38 }
 0x37a   :  { %v2367_v41 = vunpack.c.h.s8.bf16 %v2247_v30  ;;  %v2369_v42 = vunpack.c.h.s8.bf16 %v2249_v31  ;;  %v2639_v31 = vld [vmem:[#allocation10 + $0x48] sm:$0xff] }
 0x37b   :  { %2432 = vmatpush1.bf16.msra.mxu0 %v2326_v44  ;;  %2518 = vmatpush1.bf16.msra.mxu1 %v2328_v45  ;;  %v2253_v44 = vld [vmem:[#allocation8 + $0x1d8] sm:$0xff]  ;;  %v2366_v45 = vunpack.c.h.s8.bf16 %v2246_v37  ;;  %v2638_v37 = vld [vmem:[#allocation10 + $0x40] sm:$0xff] }
 0x37c   :  { %2433 = vmatprep.subr.bf16.mxu0 %v2331_v48  ;;  %2519 = vmatprep.subr.bf16.mxu1 %v2333_v49  ;;  %v2368_v48 = vunpack.c.h.s8.bf16 %v2248_v38  ;;  %v2371_v49 = vunpack.c.l.s8.bf16 %v2251_v43  ;;  %v2373_v50 = vunpack.c.l.s8.bf16 %v2253_v44  ;;  %v2377_v54 = vunpack.c.h.s8.bf16 %v2253_v44  ;;  %v2640_v38 = vld [vmem:[#allocation10 + $0x50] sm:$0xff]  ;;  %v2645_v44 = vld [vmem:[#allocation10 + $0x78] sm:$0xff] }
 0x37f   :  { %2434 = vmatpush1.bf16.msra.mxu0 %v2330_v46  ;;  %2520 = vmatpush1.bf16.msra.mxu1 %v2332_v47  ;;  %v2252_v46 = vld [vmem:[#allocation8 + $0x1d0] sm:$0xff]  ;;  %v2370_v47 = vunpack.c.l.s8.bf16 %v2250_v51 }
 0x380   :  { %2435 = vmatprep.subr.bf16.mxu0 %v2335_v52  ;;  %2521 = vmatprep.subr.bf16.mxu1 %v2337_v53  ;;  %v2372_v52 = vunpack.c.l.s8.bf16 %v2252_v46  ;;  %v2375_v53 = vunpack.c.h.s8.bf16 %v2251_v43  ;;  %v2643_v43 = vld [vmem:[#allocation10 + $0x68] sm:$0xff] }
 0x383   :  { %2436 = vmatpush1.bf16.msra.mxu0 %v2334_v56  ;;  %2522 = vmatpush1.bf16.msra.mxu1 %v2336_v57  ;;  %v2257_v56 = vld [vmem:[#allocation8 + $0x1f8] sm:$0xff]  ;;  %v2374_v57 = vunpack.c.h.s8.bf16 %v2250_v51  ;;  %v2642_v51 = vld [vmem:[#allocation10 + $0x60] sm:$0xff] }
 0x384   :  { %2437 = vmatprep.subr.bf16.mxu0 %v2339_v58  ;;  %2523 = vmatprep.subr.bf16.mxu1 %v2341_v59  ;;  %v2376_v58 = vunpack.c.h.s8.bf16 %v2252_v46  ;;  %v2379_v59 = vunpack.c.l.s8.bf16 %v2255_v55  ;;  %v2381_v60 = vunpack.c.l.s8.bf16 %v2257_v56  ;;  %v2385_v6 = vunpack.c.h.s8.bf16 %v2257_v56  ;;  %v2644_v46 = vld [vmem:[#allocation10 + $0x70] sm:$0xff]  ;;  %v2649_v56 = vld [vmem:[#allocation10 + $0x98] sm:$0xff] }
 0x387   :  { %2438 = vmatpush1.bf16.msra.mxu0 %v2338_v62  ;;  %2524 = vmatpush1.bf16.msra.mxu1 %v2340_v63  ;;  %v2256_v62 = vld [vmem:[#allocation8 + $0x1f0] sm:$0xff]  ;;  %v2378_v63 = vunpack.c.l.s8.bf16 %v2254_v61 }
 0x388   :  { %2439 = vmatprep.subr.bf16.mxu0 %v2343_v2  ;;  %2525 = vmatprep.subr.bf16.mxu1 %v2345_v5  ;;  %v2380_v2 = vunpack.c.l.s8.bf16 %v2256_v62  ;;  %v2383_v5 = vunpack.c.h.s8.bf16 %v2255_v55  ;;  %v2647_v55 = vld [vmem:[#allocation10 + $0x88] sm:$0xff] }
 0x38b   :  { %2440 = vmatpush1.bf16.msra.mxu0 %v2342_v8  ;;  %2526 = vmatpush1.bf16.msra.mxu1 %v2344_v9  ;;  %v2633_v8 = vld [vmem:[#allocation10 + $0x18] sm:$0xff]  ;;  %v2382_v9 = vunpack.c.h.s8.bf16 %v2254_v61  ;;  %v2646_v61 = vld [vmem:[#allocation10 + $0x80] sm:$0xff] }
 0x38c   :  { %2441 = vmatprep.subr.bf16.mxu0 %v2347_v10  ;;  %2527 = vmatprep.subr.bf16.mxu1 %v2349_v11  ;;  %v2384_v10 = vunpack.c.h.s8.bf16 %v2256_v62  ;;  %v2695_v11 = vunpack.c.l.s8.bf16 %v2631_v7  ;;  %v2697_v12 = vunpack.c.l.s8.bf16 %v2633_v8  ;;  %v2701_v18 = vunpack.c.h.s8.bf16 %v2633_v8  ;;  %v2648_v62 = vld [vmem:[#allocation10 + $0x90] sm:$0xff]  ;;  %v2653_v8 = vld [vmem:[#allocation10 + $0xb8] sm:$0xff] }
 0x38f   :  { %2442 = vmatpush1.bf16.msra.mxu0 %v2346_v14  ;;  %2528 = vmatpush1.bf16.msra.mxu1 %v2348_v15  ;;  %v2632_v14 = vld [vmem:[#allocation10 + $0x10] sm:$0xff]  ;;  %v2694_v15 = vunpack.c.l.s8.bf16 %v2630_v13 }
 0x390   :  { %2443 = vmatprep.subr.bf16.mxu0 %v2351_v16  ;;  %2529 = vmatprep.subr.bf16.mxu1 %v2353_v17  ;;  %v2696_v16 = vunpack.c.l.s8.bf16 %v2632_v14  ;;  %v2699_v17 = vunpack.c.h.s8.bf16 %v2631_v7  ;;  %v2651_v7 = vld [vmem:[#allocation10 + $0xa8] sm:$0xff] }
 0x393   :  { %2444 = vmatpush1.bf16.msra.mxu0 %v2350_v20  ;;  %2530 = vmatpush1.bf16.msra.mxu1 %v2352_v21  ;;  %v2637_v20 = vld [vmem:[#allocation10 + $0x38] sm:$0xff]  ;;  %v2698_v21 = vunpack.c.h.s8.bf16 %v2630_v13  ;;  %v2650_v13 = vld [vmem:[#allocation10 + $0xa0] sm:$0xff] }
 0x394   :  { %2445 = vmatprep.subr.bf16.mxu0 %v2355_v22  ;;  %2531 = vmatprep.subr.bf16.mxu1 %v2357_v23  ;;  %v2700_v22 = vunpack.c.h.s8.bf16 %v2632_v14  ;;  %v2703_v23 = vunpack.c.l.s8.bf16 %v2635_v19  ;;  %v2705_v24 = vunpack.c.l.s8.bf16 %v2637_v20  ;;  %v2709_v30 = vunpack.c.h.s8.bf16 %v2637_v20  ;;  %v2652_v14 = vld [vmem:[#allocation10 + $0xb0] sm:$0xff]  ;;  %v2657_v20 = vld [vmem:[#allocation10 + $0xd8] sm:$0xff] }
 0x397   :  { %2446 = vmatpush1.bf16.msra.mxu0 %v2354_v26  ;;  %2532 = vmatpush1.bf16.msra.mxu1 %v2356_v27  ;;  %v2636_v26 = vld [vmem:[#allocation10 + $0x30] sm:$0xff]  ;;  %v2702_v27 = vunpack.c.l.s8.bf16 %v2634_v25 }
 0x398   :  { %2447 = vmatprep.subr.bf16.mxu0 %v2359_v28  ;;  %2533 = vmatprep.subr.bf16.mxu1 %v2361_v29  ;;  %v2704_v28 = vunpack.c.l.s8.bf16 %v2636_v26  ;;  %v2707_v29 = vunpack.c.h.s8.bf16 %v2635_v19  ;;  %v2655_v19 = vld [vmem:[#allocation10 + $0xc8] sm:$0xff] }
 0x39b   :  { %2448 = vmatpush1.bf16.msra.mxu0 %v2358_v32  ;;  %2534 = vmatpush1.bf16.msra.mxu1 %v2360_v36  ;;  %v2706_v32 = vunpack.c.h.s8.bf16 %v2634_v25  ;;  %v2708_v36 = vunpack.c.h.s8.bf16 %v2636_v26  ;;  %v2654_v25 = vld [vmem:[#allocation10 + $0xc0] sm:$0xff]  ;;  %v2656_v26 = vld [vmem:[#allocation10 + $0xd0] sm:$0xff] }
 0x39c   :  { %2449 = vmatprep.subr.bf16.mxu0 %v2363_v33  ;;  %2535 = vmatprep.subr.bf16.mxu1 %v2365_v35  ;;  %v2711_v33 = vunpack.c.l.s8.bf16 %v2639_v31 }
 0x39f   :  { %2450 = vmatpush1.bf16.msra.mxu0 %v2362_v39  ;;  %2536 = vmatpush1.bf16.msra.mxu1 %v2364_v40  ;;  %v2710_v39 = vunpack.c.l.s8.bf16 %v2638_v37  ;;  %v2712_v40 = vunpack.c.l.s8.bf16 %v2640_v38 }
 0x3a0   :  { %2451 = vmatprep.subr.bf16.mxu0 %v2367_v41  ;;  %2537 = vmatprep.subr.bf16.mxu1 %v2369_v42  ;;  %v2715_v41 = vunpack.c.h.s8.bf16 %v2639_v31  ;;  %v2746_v31 = vunpack.c.h.s8.bf16 %v2654_v25 }
 0x3a3   :  { %2452 = vmatpush1.bf16.msra.mxu0 %v2366_v45  ;;  %2538 = vmatpush1.bf16.msra.mxu1 %v2368_v48  ;;  %v2714_v45 = vunpack.c.h.s8.bf16 %v2638_v37  ;;  %v2716_v48 = vunpack.c.h.s8.bf16 %v2640_v38  ;;  %v2658_v37 = vld [vmem:[#allocation10 + $0xe0] sm:$0xff]  ;;  %v2660_v38 = vld [vmem:[#allocation10 + $0xf0] sm:$0xff] }
 0x3a4   :  { %2453 = vmatprep.subr.bf16.mxu0 %v2371_v49  ;;  %2539 = vmatprep.subr.bf16.mxu1 %v2373_v50  ;;  %v2719_v49 = vunpack.c.l.s8.bf16 %v2643_v43  ;;  %v2721_v50 = vunpack.c.l.s8.bf16 %v2645_v44 }
 0x3a7   :  { %2454 = vmatpush1.bf16.msra.mxu0 %v2370_v47  ;;  %2540 = vmatpush1.bf16.msra.mxu1 %v2372_v52  ;;  %v2718_v47 = vunpack.c.l.s8.bf16 %v2642_v51  ;;  %v2720_v52 = vunpack.c.l.s8.bf16 %v2644_v46 }
 0x3a8   :  { %2455 = vmatprep.subr.bf16.mxu0 %v2375_v53  ;;  %2541 = vmatprep.subr.bf16.mxu1 %v2377_v54  ;;  %v2723_v53 = vunpack.c.h.s8.bf16 %v2643_v43  ;;  %v2725_v54 = vunpack.c.h.s8.bf16 %v2645_v44  ;;  %v2754_v43 = vunpack.c.h.s8.bf16 %v2658_v37  ;;  %v2756_v44 = vunpack.c.h.s8.bf16 %v2660_v38 }
 0x3ab   :  { %2456 = vmatpush1.bf16.msra.mxu0 %v2374_v57  ;;  %2542 = vmatpush1.bf16.msra.mxu1 %v2376_v58  ;;  %v2722_v57 = vunpack.c.h.s8.bf16 %v2642_v51  ;;  %v2724_v58 = vunpack.c.h.s8.bf16 %v2644_v46  ;;  %v2558_v51 = vld [vmem:[%s5376_s7] sm:$0xf] }
 0x3ac   :  { %2457 = vmatprep.subr.bf16.mxu0 %v2379_v59  ;;  %2543 = vmatprep.subr.bf16.mxu1 %v2381_v60  ;;  %v2727_v59 = vunpack.c.l.s8.bf16 %v2647_v55  ;;  %v2729_v60 = vunpack.c.l.s8.bf16 %v2649_v56  ;;  %v2588_v46 = vld [vmem:[%s5377_s8] sm:$0xf] }
 0x3af   :  { %2458 = vmatpush1.bf16.msra.mxu0 %v2378_v63  ;;  %2544 = vmatpush1.bf16.msra.mxu1 %v2380_v2  ;;  %v2726_v63 = vunpack.c.l.s8.bf16 %v2646_v61  ;;  %v2728_v2 = vunpack.c.l.s8.bf16 %v2648_v62 }
 0x3b0   :  { %2459 = vmatprep.subr.bf16.mxu0 %v2383_v5  ;;  %2545 = vmatprep.subr.bf16.mxu1 %v2385_v6  ;;  %v2731_v5 = vunpack.c.h.s8.bf16 %v2647_v55  ;;  %v2733_v6 = vunpack.c.h.s8.bf16 %v2649_v56  ;;  %v2593_v55 = vrot.slane %v2588_v46, %v5209_v0  ;;  %v2601_v56 = vrot.slane %v2588_v46, %v5211_v1 }
 0x3b3   :  { %2460 = vmatpush1.bf16.msra.mxu0 %v2382_v9  ;;  %2546 = vmatpush1.bf16.msra.mxu1 %v2384_v10  ;;  %v2730_v9 = vunpack.c.h.s8.bf16 %v2646_v61  ;;  %v2732_v10 = vunpack.c.h.s8.bf16 %v2648_v62 }
 0x3b4   :  { %2822 = vmatprep.subr.bf16.mxu0 %v2695_v11  ;;  %2908 = vmatprep.subr.bf16.mxu1 %v2697_v12  ;;  %v2735_v11 = vunpack.c.l.s8.bf16 %v2651_v7  ;;  %v2737_v12 = vunpack.c.l.s8.bf16 %v2653_v8 }
 0x3b6   :  { %2462 = vmatmul.mubr.bf16.vlgmr.msra.gmra.mrb[8].mxu0 %v5250_v34  ;;  %2548 = vmatmul.mubr.bf16.vlgmr.msra.gmra.mrb[8].mxu1 %v5250_v34  ;;  %v2641_v34 = vld [vmem:[#allocation10 + $0x58] sm:$0xff] }
 0x3b7   :  { %2823 = vmatpush1.bf16.msra.mxu0 %v2694_v15  ;;  %2909 = vmatpush1.bf16.msra.mxu1 %v2696_v16  ;;  %v2713_v35 = vunpack.c.l.s8.bf16 %v2641_v34  ;;  %v2717_v42 = vunpack.c.h.s8.bf16 %v2641_v34  ;;  %v2734_v15 = vunpack.c.l.s8.bf16 %v2650_v13  ;;  %v2736_v16 = vunpack.c.l.s8.bf16 %v2652_v14 }
 0x3b8   :  { %2824 = vmatprep.subr.bf16.mxu0 %v2699_v17  ;;  %2910 = vmatprep.subr.bf16.mxu1 %v2701_v18  ;;  %v2739_v17 = vunpack.c.h.s8.bf16 %v2651_v7  ;;  %v2741_v18 = vunpack.c.h.s8.bf16 %v2653_v8  ;;  %v2748_v34 = vunpack.c.h.s8.bf16 %v2656_v26 }
 0x3bb   :  { %2825 = vmatpush1.bf16.msra.mxu0 %v2698_v21  ;;  %2911 = vmatpush1.bf16.msra.mxu1 %v2700_v22  ;;  %v2738_v21 = vunpack.c.h.s8.bf16 %v2650_v13  ;;  %v2740_v22 = vunpack.c.h.s8.bf16 %v2652_v14 }
 0x3bc   :  { %2826 = vmatprep.subr.bf16.mxu0 %v2703_v23  ;;  %2912 = vmatprep.subr.bf16.mxu1 %v2705_v24  ;;  %v2743_v23 = vunpack.c.l.s8.bf16 %v2655_v19  ;;  %v2745_v24 = vunpack.c.l.s8.bf16 %v2657_v20 }
 0x3bf   :  { %2827 = vmatpush1.bf16.msra.mxu0 %v2702_v27  ;;  %2913 = vmatpush1.bf16.msra.mxu1 %v2704_v28  ;;  %v2742_v27 = vunpack.c.l.s8.bf16 %v2654_v25  ;;  %v2744_v28 = vunpack.c.l.s8.bf16 %v2656_v26 }
 0x3c0   :  { %2828 = vmatprep.subr.bf16.mxu0 %v2707_v29  ;;  %2914 = vmatprep.subr.bf16.mxu1 %v2709_v30  ;;  %v2747_v29 = vunpack.c.h.s8.bf16 %v2655_v19  ;;  %v2749_v30 = vunpack.c.h.s8.bf16 %v2657_v20 }
 0x3c3   :  { %2829 = vmatpush1.bf16.msra.mxu0 %v2706_v32  ;;  %2915 = vmatpush1.bf16.msra.mxu1 %v2708_v36  ;;  %v2659_v32 = vld [vmem:[#allocation10 + $0xe8] sm:$0xff]  ;;  %v2661_v36 = vld [vmem:[#allocation10 + $0xf8] sm:$0xff] }
 0x3c4   :  { %2830 = vmatprep.subr.bf16.mxu0 %v2711_v33  ;;  %2916 = vmatprep.subr.bf16.mxu1 %v2713_v35  ;;  %v2751_v33 = vunpack.c.l.s8.bf16 %v2659_v32  ;;  %v2753_v35 = vunpack.c.l.s8.bf16 %v2661_v36 }
 0x3c7   :  { %2831 = vmatpush1.bf16.msra.mxu0 %v2710_v39  ;;  %2917 = vmatpush1.bf16.msra.mxu1 %v2712_v40  ;;  %v2750_v39 = vunpack.c.l.s8.bf16 %v2658_v37  ;;  %v2752_v40 = vunpack.c.l.s8.bf16 %v2660_v38 }
 0x3c8   :  { %2832 = vmatprep.subr.bf16.mxu0 %v2715_v41  ;;  %2918 = vmatprep.subr.bf16.mxu1 %v2717_v42  ;;  %v2755_v41 = vunpack.c.h.s8.bf16 %v2659_v32  ;;  %v2757_v42 = vunpack.c.h.s8.bf16 %v2661_v36 }
 0x3cb   :  { %2833 = vmatpush1.bf16.msra.mxu0 %v2714_v45  ;;  %2919 = vmatpush1.bf16.msra.mxu1 %v2716_v48  ;;  %v5256_v45 = vld [vmem:[#allocation10 + $0x108] sm:$0xff]  ;;  %v5258_v48 = vld [vmem:[#allocation10 + $0x118] sm:$0xff] }
 0x3cc   :  { %2834 = vmatprep.subr.bf16.mxu0 %v2719_v49  ;;  %2920 = vmatprep.subr.bf16.mxu1 %v2721_v50  ;;  %v2759_v49 = vunpack.c.l.s8.bf16 %v5256_v45  ;;  %v2761_v50 = vunpack.c.l.s8.bf16 %v5258_v48 }
 0x3cf   :  { %2835 = vmatpush1.bf16.msra.mxu0 %v2718_v47  ;;  %2921 = vmatpush1.bf16.msra.mxu1 %v2720_v52  ;;  %v2563_v47 = vrot.slane %v2558_v51, %v5209_v0  ;;  %v2571_v52 = vrot.slane %v2558_v51, %v5211_v1 }
 0x3d0   :  { %2836 = vmatprep.subr.bf16.mxu0 %v2723_v53  ;;  %2922 = vmatprep.subr.bf16.mxu1 %v2725_v54  ;;  %v2567_v53 = vrot.slane %v2558_v51, %v5216_v3  ;;  %v2575_v54 = vrot.slane %v2558_v51, %v5218_v4  ;;  %v2666_v51 = vld [vmem:[#allocation10 + $0x120] sm:$0xff] }
 0x3d3   :  { %2837 = vmatpush1.bf16.msra.mxu0 %v2722_v57  ;;  %2923 = vmatpush1.bf16.msra.mxu1 %v2724_v58 }
 0x3d4   :  { %2838 = vmatprep.subr.bf16.mxu0 %v2727_v59  ;;  %2924 = vmatprep.subr.bf16.mxu1 %v2729_v60  ;;  %v2597_v59 = vrot.slane %v2588_v46, %v5216_v3  ;;  %v2605_v60 = vrot.slane %v2588_v46, %v5218_v4  ;;  %v2668_v46 = vld [vmem:[#allocation10 + $0x130] sm:$0xff] }
 0x3d7   :  { %2839 = vmatpush1.bf16.msra.mxu0 %v2726_v63  ;;  %2925 = vmatpush1.bf16.msra.mxu1 %v2728_v2 }
 0x3d8   :  { %2840 = vmatprep.subr.bf16.mxu0 %v2731_v5  ;;  %2926 = vmatprep.subr.bf16.mxu1 %v2733_v6 }
 0x3db   :  { %2841 = vmatpush1.bf16.msra.mxu0 %v2730_v9  ;;  %2927 = vmatpush1.bf16.msra.mxu1 %v2732_v10 }
 0x3dc   :  { %2842 = vmatprep.subr.bf16.mxu0 %v2735_v11  ;;  %2928 = vmatprep.subr.bf16.mxu1 %v2737_v12 }
 0x3df   :  { %2843 = vmatpush1.bf16.msra.mxu0 %v2734_v15  ;;  %2929 = vmatpush1.bf16.msra.mxu1 %v2736_v16 }
 0x3e0   :  { %2844 = vmatprep.subr.bf16.mxu0 %v2739_v17  ;;  %2930 = vmatprep.subr.bf16.mxu1 %v2741_v18 }
 0x3e3   :  { %2845 = vmatpush1.bf16.msra.mxu0 %v2738_v21  ;;  %2931 = vmatpush1.bf16.msra.mxu1 %v2740_v22 }
 0x3e4   :  { %2846 = vmatprep.subr.bf16.mxu0 %v2743_v23  ;;  %2932 = vmatprep.subr.bf16.mxu1 %v2745_v24 }
 0x3e7   :  { %2847 = vmatpush1.bf16.msra.mxu0 %v2742_v27  ;;  %2933 = vmatpush1.bf16.msra.mxu1 %v2744_v28  ;;  %v2662_v27 = vld [vmem:[#allocation10 + $0x100] sm:$0xff]  ;;  %v2664_v28 = vld [vmem:[#allocation10 + $0x110] sm:$0xff] }
 0x3e8   :  { %2848 = vmatprep.subr.bf16.mxu0 %v2747_v29  ;;  %2934 = vmatprep.subr.bf16.mxu1 %v2749_v30  ;;  %v2760_v37 = vunpack.c.l.s8.bf16 %v2664_v28 }
 0x3eb   :  { %2849 = vmatpush1.bf16.msra.mxu0 %v2746_v31  ;;  %2935 = vmatpush1.bf16.msra.mxu1 %v2748_v34 }
 0x3ec   :  { %2850 = vmatprep.subr.bf16.mxu0 %v2751_v33  ;;  %2936 = vmatprep.subr.bf16.mxu1 %v2753_v35  ;;  %v2758_v35 = vunpack.c.l.s8.bf16 %v2662_v27 }
 0x3ef   :  { %2851 = vmatpush1.bf16.msra.mxu0 %v2750_v39  ;;  %2937 = vmatpush1.bf16.msra.mxu1 %v2752_v40  ;;  %v2763_v39 = vunpack.c.h.s8.bf16 %v5256_v45  ;;  %v2765_v40 = vunpack.c.h.s8.bf16 %v5258_v48  ;;  %v2766_v45 = vunpack.c.l.s8.bf16 %v2666_v51  ;;  %v2768_v48 = vunpack.c.l.s8.bf16 %v2668_v46 }
 0x3f0   :  { %2852 = vmatprep.subr.bf16.mxu0 %v2755_v41  ;;  %2938 = vmatprep.subr.bf16.mxu1 %v2757_v42  ;;  %v2667_v41 = vld [vmem:[#allocation10 + $0x128] sm:$0xff]  ;;  %v2669_v42 = vld [vmem:[#allocation10 + $0x138] sm:$0xff] }
 0x3f3   :  { %2853 = vmatpush1.bf16.msra.mxu0 %v2754_v43  ;;  %2939 = vmatpush1.bf16.msra.mxu1 %v2756_v44  ;;  %v2762_v43 = vunpack.c.h.s8.bf16 %v2662_v27  ;;  %v2764_v44 = vunpack.c.h.s8.bf16 %v2664_v28 }
 0x3f4   :  { %2865 = vmatprep.subr.bf16.mxu0 %v2759_v49  ;;  %2951 = vmatprep.subr.bf16.mxu1 %v2761_v50  ;;  %v2767_v49 = vunpack.c.l.s8.bf16 %v2667_v41  ;;  %v2769_v50 = vunpack.c.l.s8.bf16 %v2669_v42 }
 0x489   :  { %v2463_v57 = vpop.f32.mrb[8].mxu0  ;;  %v2549_v58 = vpop.f32.mrb[8].mxu1 }
 0x48a   :  { %v2580_v61 = vmul.f32 %v2563_v47, %v2463_v57  ;;  %v2582_v62 = vmul.f32 %v2571_v52, %v2549_v58  ;;  %v2465_v63 = vpop.f32.mrb[9].mxu0  ;;  %v2551_v2 = vpop.f32.mrb[9].mxu1 }
 0x48b   :  { %v2581_v5 = vmul.f32 %v2567_v53, %v2465_v63  ;;  %v2583_v6 = vmul.f32 %v2575_v54, %v2551_v2  ;;  %v2467_v7 = vpop.f32.mrb[10].mxu0  ;;  %v2553_v8 = vpop.f32.mrb[10].mxu1 }
 0x48c   :  { %v2610_v9 = vadd.f32 %v2593_v55, %v2580_v61  ;;  %v2612_v10 = vadd.f32 %v2601_v56, %v2582_v62  ;;  %v2584_v11 = vmul.f32 %v2563_v47, %v2467_v7  ;;  %v2586_v12 = vmul.f32 %v2571_v52, %v2553_v8  ;;  %v2469_v13 = vpop.f32.mrb[11].mxu0  ;;  %v2555_v14 = vpop.f32.mrb[11].mxu1 }
 0x48d   :  { %v2611_v15 = vadd.f32 %v2597_v59, %v2581_v5  ;;  %v2613_v16 = vadd.f32 %v2605_v60, %v2583_v6  ;;  %v2585_v17 = vmul.f32 %v2567_v53, %v2469_v13  ;;  %v2587_v18 = vmul.f32 %v2575_v54, %v2555_v14  ;;  %v2671_v53 = vld [vmem:[#allocation10 + $0x148] sm:$0xff]  ;;  %v2673_v54 = vld [vmem:[#allocation10 + $0x158] sm:$0xff] }
 0x48e   :  { %v2614_v19 = vadd.f32 %v2593_v55, %v2584_v11  ;;  %v2616_v20 = vadd.f32 %v2601_v56, %v2586_v12  ;;  %v2618_v23 = vmax.f32 %v2610_v9, 0.0  ;;  %v2620_v24 = vmax.f32 %v2612_v10, 0.0  ;;  %v2675_v5 = vld [vmem:[#allocation10 + $0x168] sm:$0xff]  ;;  %v2677_v6 = vld [vmem:[#allocation10 + $0x178] sm:$0xff]  ;;  %v2674_v11 = vld [vmem:[#allocation10 + $0x160] sm:$0xff] }
 0x48f   :  { %v2615_v21 = vadd.f32 %v2597_v59, %v2585_v17  ;;  %v2617_v22 = vadd.f32 %v2605_v60, %v2587_v18  ;;  %v2619_v29 = vmax.f32 %v2611_v15, 0.0  ;;  %v2621_v30 = vmax.f32 %v2613_v16, 0.0  ;;  %v2670_v59 = vld [vmem:[#allocation10 + $0x140] sm:$0xff]  ;;  %v2672_v60 = vld [vmem:[#allocation10 + $0x150] sm:$0xff]  ;;  %v2679_v17 = vld [vmem:[#allocation10 + $0x188] sm:$0xff] }
 0x490   :  { %v2622_v25 = vmax.f32 %v2614_v19, 0.0  ;;  %v2624_v26 = vmax.f32 %v2616_v20, 0.0  ;;  %v2771_v47 = vunpack.c.h.s8.bf16 %v2667_v41  ;;  %v2773_v52 = vunpack.c.h.s8.bf16 %v2669_v42  ;;  %v2676_v12 = vld [vmem:[#allocation10 + $0x170] sm:$0xff]  ;;  %v2681_v18 = vld [vmem:[#allocation10 + $0x198] sm:$0xff]  ;;  %v2687_v42 = vld [vmem:[#allocation10 + $0x1c8] sm:$0xff] }
 0x491   :  { %v2623_v31 = vmax.f32 %v2615_v21, 0.0  ;;  %v2625_v34 = vmax.f32 %v2617_v22, 0.0  ;;  %v2770_v55 = vunpack.c.h.s8.bf16 %v2666_v51  ;;  %v2772_v56 = vunpack.c.h.s8.bf16 %v2668_v46  ;;  %v2686_v46 = vld [vmem:[#allocation10 + $0x1c0] sm:$0xff] }
 0x492   :  { %v2626_v32 = vpack.c.bf16 %v2622_v25, %v2618_v23  ;;  %v5276_v36 = vpack.c.bf16 %v2624_v26, %v2620_v24  ;;  %v2775_v57 = vunpack.c.l.s8.bf16 %v2671_v53  ;;  %v2777_v58 = vunpack.c.l.s8.bf16 %v2673_v54  ;;  %v2678_v23 = vld [vmem:[#allocation10 + $0x180] sm:$0xff]  ;;  %v2680_v24 = vld [vmem:[#allocation10 + $0x190] sm:$0xff] }
 0x493   :  { %v2627_v33 = vpack.c.bf16 %v2623_v31, %v2619_v29  ;;  %v2629_v38 = vpack.c.bf16 %v2625_v34, %v2621_v30  ;;  %v2774_v61 = vunpack.c.l.s8.bf16 %v2670_v59  ;;  %v2776_v62 = vunpack.c.l.s8.bf16 %v2672_v60  ;;  %v2683_v29 = vld [vmem:[#allocation10 + $0x1a8] sm:$0xff]  ;;  %v2685_v30 = vld [vmem:[#allocation10 + $0x1b8] sm:$0xff] }
 0x494   :  { %v2779_v63 = vunpack.c.h.s8.bf16 %v2671_v53  ;;  %v2781_v2 = vunpack.c.h.s8.bf16 %v2673_v54  ;;  %v2778_v7 = vunpack.c.h.s8.bf16 %v2670_v59  ;;  %v2780_v8 = vunpack.c.h.s8.bf16 %v2672_v60  ;;  %v2691_v54 = vld [vmem:[#allocation10 + $0x1e8] sm:$0xff]  ;;  %v2690_v60 = vld [vmem:[#allocation10 + $0x1e0] sm:$0xff] }
 0x495   :  { %2854 = vmatprep.mubr.bf16.mxu0 %v2627_v33  ;;  %2940 = vmatprep.mubr.bf16.mxu1 %v2627_v33  ;;  %v2783_v9 = vunpack.c.l.s8.bf16 %v2675_v5  ;;  %v2785_v10 = vunpack.c.l.s8.bf16 %v2677_v6  ;;  %v2782_v13 = vunpack.c.l.s8.bf16 %v2674_v11  ;;  %v2784_v14 = vunpack.c.l.s8.bf16 %v2676_v12 }
 0x496   :  { %2855 = vmatmul.mubr.bf16.vlgmr.msra.gmra.mrb[12].mxu0 %v2626_v32  ;;  %2941 = vmatmul.mubr.bf16.vlgmr.msra.gmra.mrb[12].mxu1 %v2626_v32  ;;  %v2787_v15 = vunpack.c.h.s8.bf16 %v2675_v5  ;;  %v2789_v16 = vunpack.c.h.s8.bf16 %v2677_v6  ;;  %v2786_v19 = vunpack.c.h.s8.bf16 %v2674_v11  ;;  %v2788_v20 = vunpack.c.h.s8.bf16 %v2676_v12  ;;  %v3067_v6 = vld [vmem:[#allocation11 + $0x8] sm:$0xff]  ;;  %v3066_v12 = vld [vmem:[#allocation11] sm:$0xff] }
 0x497   :  { %2866 = vmatpush1.bf16.msra.mxu0 %v2758_v35  ;;  %2952 = vmatpush1.bf16.msra.mxu1 %v2760_v37  ;;  %v2791_v21 = vunpack.c.l.s8.bf16 %v2679_v17  ;;  %v2793_v22 = vunpack.c.l.s8.bf16 %v2681_v18  ;;  %v2790_v25 = vunpack.c.l.s8.bf16 %v2678_v23  ;;  %v2792_v26 = vunpack.c.l.s8.bf16 %v2680_v24  ;;  %v2682_v35 = vld [vmem:[#allocation10 + $0x1a0] sm:$0xff]  ;;  %v2684_v37 = vld [vmem:[#allocation10 + $0x1b0] sm:$0xff] }
 0x498   :  { %2897 = vmatprep.mubr.bf16.mxu0 %v2629_v38  ;;  %2983 = vmatprep.mubr.bf16.mxu1 %v2629_v38  ;;  %v2795_v27 = vunpack.c.h.s8.bf16 %v2679_v17  ;;  %v2797_v28 = vunpack.c.h.s8.bf16 %v2681_v18  ;;  %v2794_v31 = vunpack.c.h.s8.bf16 %v2678_v23  ;;  %v2796_v34 = vunpack.c.h.s8.bf16 %v2680_v24  ;;  %v3071_v18 = vld [vmem:[#allocation11 + $0x28] sm:$0xff]  ;;  %v3070_v24 = vld [vmem:[#allocation11 + $0x20] sm:$0xff] }
 0x499   :  { %2867 = vmatprep.subr.bf16.mxu0 %v2763_v39  ;;  %2953 = vmatprep.subr.bf16.mxu1 %v2765_v40  ;;  %v2799_v32 = vunpack.c.l.s8.bf16 %v2683_v29  ;;  %v2801_v33 = vunpack.c.l.s8.bf16 %v2685_v30  ;;  %v2798_v38 = vunpack.c.l.s8.bf16 %v2682_v35  ;;  %v2800_v39 = vunpack.c.l.s8.bf16 %v2684_v37 }
 0x49a   :  { %v2803_v40 = vunpack.c.h.s8.bf16 %v2683_v29  ;;  %v2805_v41 = vunpack.c.h.s8.bf16 %v2685_v30  ;;  %v3075_v30 = vld [vmem:[#allocation11 + $0x48] sm:$0xff] }
 0x49b   :  { %2868 = vmatpush1.bf16.msra.mxu0 %v2762_v43  ;;  %2954 = vmatpush1.bf16.msra.mxu1 %v2764_v44  ;;  %v2689_v43 = vld [vmem:[#allocation10 + $0x1d8] sm:$0xff]  ;;  %v2802_v44 = vunpack.c.h.s8.bf16 %v2682_v35  ;;  %v3074_v35 = vld [vmem:[#allocation11 + $0x40] sm:$0xff] }
 0x49c   :  { %2869 = vmatprep.subr.bf16.mxu0 %v2767_v49  ;;  %2955 = vmatprep.subr.bf16.mxu1 %v2769_v50  ;;  %v2804_v49 = vunpack.c.h.s8.bf16 %v2684_v37  ;;  %v2807_v50 = vunpack.c.l.s8.bf16 %v2687_v42  ;;  %v2809_v51 = vunpack.c.l.s8.bf16 %v2689_v43  ;;  %v2813_v53 = vunpack.c.h.s8.bf16 %v2689_v43  ;;  %v3076_v37 = vld [vmem:[#allocation11 + $0x50] sm:$0xff]  ;;  %v3081_v43 = vld [vmem:[#allocation11 + $0x78] sm:$0xff] }
 0x49f   :  { %2870 = vmatpush1.bf16.msra.mxu0 %v2766_v45  ;;  %2956 = vmatpush1.bf16.msra.mxu1 %v2768_v48  ;;  %v2688_v45 = vld [vmem:[#allocation10 + $0x1d0] sm:$0xff]  ;;  %v2806_v48 = vunpack.c.l.s8.bf16 %v2686_v46 }
 0x4a0   :  { %2871 = vmatprep.subr.bf16.mxu0 %v2771_v47  ;;  %2957 = vmatprep.subr.bf16.mxu1 %v2773_v52  ;;  %v2808_v47 = vunpack.c.l.s8.bf16 %v2688_v45  ;;  %v2811_v52 = vunpack.c.h.s8.bf16 %v2687_v42  ;;  %v3079_v42 = vld [vmem:[#allocation11 + $0x68] sm:$0xff] }
 0x4a3   :  { %2872 = vmatpush1.bf16.msra.mxu0 %v2770_v55  ;;  %2958 = vmatpush1.bf16.msra.mxu1 %v2772_v56  ;;  %v2693_v55 = vld [vmem:[#allocation10 + $0x1f8] sm:$0xff]  ;;  %v2810_v56 = vunpack.c.h.s8.bf16 %v2686_v46  ;;  %v3078_v46 = vld [vmem:[#allocation11 + $0x60] sm:$0xff] }
 0x4a4   :  { %2873 = vmatprep.subr.bf16.mxu0 %v2775_v57  ;;  %2959 = vmatprep.subr.bf16.mxu1 %v2777_v58  ;;  %v2812_v57 = vunpack.c.h.s8.bf16 %v2688_v45  ;;  %v2815_v58 = vunpack.c.l.s8.bf16 %v2691_v54  ;;  %v2817_v59 = vunpack.c.l.s8.bf16 %v2693_v55  ;;  %v2821_v5 = vunpack.c.h.s8.bf16 %v2693_v55  ;;  %v3080_v45 = vld [vmem:[#allocation11 + $0x70] sm:$0xff]  ;;  %v3085_v55 = vld [vmem:[#allocation11 + $0x98] sm:$0xff] }
 0x4a7   :  { %2874 = vmatpush1.bf16.msra.mxu0 %v2774_v61  ;;  %2960 = vmatpush1.bf16.msra.mxu1 %v2776_v62  ;;  %v2692_v61 = vld [vmem:[#allocation10 + $0x1f0] sm:$0xff]  ;;  %v2814_v62 = vunpack.c.l.s8.bf16 %v2690_v60 }
 0x4a8   :  { %2875 = vmatprep.subr.bf16.mxu0 %v2779_v63  ;;  %2961 = vmatprep.subr.bf16.mxu1 %v2781_v2  ;;  %v2816_v63 = vunpack.c.l.s8.bf16 %v2692_v61  ;;  %v2819_v2 = vunpack.c.h.s8.bf16 %v2691_v54  ;;  %v3083_v54 = vld [vmem:[#allocation11 + $0x88] sm:$0xff] }
 0x4ab   :  { %2876 = vmatpush1.bf16.msra.mxu0 %v2778_v7  ;;  %2962 = vmatpush1.bf16.msra.mxu1 %v2780_v8  ;;  %v3069_v7 = vld [vmem:[#allocation11 + $0x18] sm:$0xff]  ;;  %v2818_v8 = vunpack.c.h.s8.bf16 %v2690_v60  ;;  %v3082_v60 = vld [vmem:[#allocation11 + $0x80] sm:$0xff] }
 0x4ac   :  { %2877 = vmatprep.subr.bf16.mxu0 %v2783_v9  ;;  %2963 = vmatprep.subr.bf16.mxu1 %v2785_v10  ;;  %v2820_v9 = vunpack.c.h.s8.bf16 %v2692_v61  ;;  %v3131_v10 = vunpack.c.l.s8.bf16 %v3067_v6  ;;  %v3133_v11 = vunpack.c.l.s8.bf16 %v3069_v7  ;;  %v3137_v17 = vunpack.c.h.s8.bf16 %v3069_v7  ;;  %v3084_v61 = vld [vmem:[#allocation11 + $0x90] sm:$0xff]  ;;  %v3089_v7 = vld [vmem:[#allocation11 + $0xb8] sm:$0xff] }
 0x4af   :  { %2878 = vmatpush1.bf16.msra.mxu0 %v2782_v13  ;;  %2964 = vmatpush1.bf16.msra.mxu1 %v2784_v14  ;;  %v3068_v13 = vld [vmem:[#allocation11 + $0x10] sm:$0xff]  ;;  %v3130_v14 = vunpack.c.l.s8.bf16 %v3066_v12 }
 0x4b0   :  { %2879 = vmatprep.subr.bf16.mxu0 %v2787_v15  ;;  %2965 = vmatprep.subr.bf16.mxu1 %v2789_v16  ;;  %v3132_v15 = vunpack.c.l.s8.bf16 %v3068_v13  ;;  %v3135_v16 = vunpack.c.h.s8.bf16 %v3067_v6  ;;  %v3087_v6 = vld [vmem:[#allocation11 + $0xa8] sm:$0xff] }
 0x4b3   :  { %2880 = vmatpush1.bf16.msra.mxu0 %v2786_v19  ;;  %2966 = vmatpush1.bf16.msra.mxu1 %v2788_v20  ;;  %v3073_v19 = vld [vmem:[#allocation11 + $0x38] sm:$0xff]  ;;  %v3134_v20 = vunpack.c.h.s8.bf16 %v3066_v12  ;;  %v3086_v12 = vld [vmem:[#allocation11 + $0xa0] sm:$0xff] }
 0x4b4   :  { %2881 = vmatprep.subr.bf16.mxu0 %v2791_v21  ;;  %2967 = vmatprep.subr.bf16.mxu1 %v2793_v22  ;;  %v3136_v21 = vunpack.c.h.s8.bf16 %v3068_v13  ;;  %v3139_v22 = vunpack.c.l.s8.bf16 %v3071_v18  ;;  %v3141_v23 = vunpack.c.l.s8.bf16 %v3073_v19  ;;  %v3145_v29 = vunpack.c.h.s8.bf16 %v3073_v19  ;;  %v3088_v13 = vld [vmem:[#allocation11 + $0xb0] sm:$0xff]  ;;  %v3093_v19 = vld [vmem:[#allocation11 + $0xd8] sm:$0xff] }
 0x4b7   :  { %2882 = vmatpush1.bf16.msra.mxu0 %v2790_v25  ;;  %2968 = vmatpush1.bf16.msra.mxu1 %v2792_v26  ;;  %v3072_v25 = vld [vmem:[#allocation11 + $0x30] sm:$0xff]  ;;  %v3138_v26 = vunpack.c.l.s8.bf16 %v3070_v24 }
 0x4b8   :  { %2883 = vmatprep.subr.bf16.mxu0 %v2795_v27  ;;  %2969 = vmatprep.subr.bf16.mxu1 %v2797_v28  ;;  %v3140_v27 = vunpack.c.l.s8.bf16 %v3072_v25  ;;  %v3143_v28 = vunpack.c.h.s8.bf16 %v3071_v18  ;;  %v3091_v18 = vld [vmem:[#allocation11 + $0xc8] sm:$0xff] }
 0x4bb   :  { %2884 = vmatpush1.bf16.msra.mxu0 %v2794_v31  ;;  %2970 = vmatpush1.bf16.msra.mxu1 %v2796_v34  ;;  %v3142_v31 = vunpack.c.h.s8.bf16 %v3070_v24  ;;  %v3144_v34 = vunpack.c.h.s8.bf16 %v3072_v25  ;;  %v3090_v24 = vld [vmem:[#allocation11 + $0xc0] sm:$0xff]  ;;  %v3092_v25 = vld [vmem:[#allocation11 + $0xd0] sm:$0xff] }
 0x4bc   :  { %2885 = vmatprep.subr.bf16.mxu0 %v2799_v32  ;;  %2971 = vmatprep.subr.bf16.mxu1 %v2801_v33  ;;  %v3147_v32 = vunpack.c.l.s8.bf16 %v3075_v30 }
 0x4bf   :  { %2886 = vmatpush1.bf16.msra.mxu0 %v2798_v38  ;;  %2972 = vmatpush1.bf16.msra.mxu1 %v2800_v39  ;;  %v3146_v38 = vunpack.c.l.s8.bf16 %v3074_v35  ;;  %v3148_v39 = vunpack.c.l.s8.bf16 %v3076_v37 }
 0x4c0   :  { %2887 = vmatprep.subr.bf16.mxu0 %v2803_v40  ;;  %2973 = vmatprep.subr.bf16.mxu1 %v2805_v41  ;;  %v3151_v40 = vunpack.c.h.s8.bf16 %v3075_v30  ;;  %v3182_v30 = vunpack.c.h.s8.bf16 %v3090_v24 }
 0x4c3   :  { %2888 = vmatpush1.bf16.msra.mxu0 %v2802_v44  ;;  %2974 = vmatpush1.bf16.msra.mxu1 %v2804_v49  ;;  %v3150_v44 = vunpack.c.h.s8.bf16 %v3074_v35  ;;  %v3152_v49 = vunpack.c.h.s8.bf16 %v3076_v37  ;;  %v3094_v35 = vld [vmem:[#allocation11 + $0xe0] sm:$0xff]  ;;  %v3096_v37 = vld [vmem:[#allocation11 + $0xf0] sm:$0xff] }
 0x4c4   :  { %2889 = vmatprep.subr.bf16.mxu0 %v2807_v50  ;;  %2975 = vmatprep.subr.bf16.mxu1 %v2809_v51  ;;  %v3155_v50 = vunpack.c.l.s8.bf16 %v3079_v42  ;;  %v3157_v51 = vunpack.c.l.s8.bf16 %v3081_v43 }
 0x4c7   :  { %2890 = vmatpush1.bf16.msra.mxu0 %v2806_v48  ;;  %2976 = vmatpush1.bf16.msra.mxu1 %v2808_v47  ;;  %v3154_v48 = vunpack.c.l.s8.bf16 %v3078_v46  ;;  %v3156_v47 = vunpack.c.l.s8.bf16 %v3080_v45 }
 0x4c8   :  { %2891 = vmatprep.subr.bf16.mxu0 %v2811_v52  ;;  %2977 = vmatprep.subr.bf16.mxu1 %v2813_v53  ;;  %v3159_v52 = vunpack.c.h.s8.bf16 %v3079_v42  ;;  %v3161_v53 = vunpack.c.h.s8.bf16 %v3081_v43  ;;  %v3190_v42 = vunpack.c.h.s8.bf16 %v3094_v35  ;;  %v3192_v43 = vunpack.c.h.s8.bf16 %v3096_v37 }
 0x4cb   :  { %2892 = vmatpush1.bf16.msra.mxu0 %v2810_v56  ;;  %2978 = vmatpush1.bf16.msra.mxu1 %v2812_v57  ;;  %v3158_v56 = vunpack.c.h.s8.bf16 %v3078_v46  ;;  %v3160_v57 = vunpack.c.h.s8.bf16 %v3080_v45  ;;  %v2994_v46 = vld [vmem:[%s5379_s10] sm:$0xf] }
 0x4cc   :  { %2893 = vmatprep.subr.bf16.mxu0 %v2815_v58  ;;  %2979 = vmatprep.subr.bf16.mxu1 %v2817_v59  ;;  %v3163_v58 = vunpack.c.l.s8.bf16 %v3083_v54  ;;  %v3165_v59 = vunpack.c.l.s8.bf16 %v3085_v55  ;;  %v3024_v45 = vld [vmem:[%s5380_s11] sm:$0xf] }
 0x4cf   :  { %2894 = vmatpush1.bf16.msra.mxu0 %v2814_v62  ;;  %2980 = vmatpush1.bf16.msra.mxu1 %v2816_v63  ;;  %v3162_v62 = vunpack.c.l.s8.bf16 %v3082_v60  ;;  %v3164_v63 = vunpack.c.l.s8.bf16 %v3084_v61 }
 0x4d0   :  { %2895 = vmatprep.subr.bf16.mxu0 %v2819_v2  ;;  %2981 = vmatprep.subr.bf16.mxu1 %v2821_v5  ;;  %v3167_v2 = vunpack.c.h.s8.bf16 %v3083_v54  ;;  %v3169_v5 = vunpack.c.h.s8.bf16 %v3085_v55  ;;  %v3029_v54 = vrot.slane %v3024_v45, %v5209_v0  ;;  %v3037_v55 = vrot.slane %v3024_v45, %v5211_v1 }
 0x4d3   :  { %2896 = vmatpush1.bf16.msra.mxu0 %v2818_v8  ;;  %2982 = vmatpush1.bf16.msra.mxu1 %v2820_v9  ;;  %v3166_v8 = vunpack.c.h.s8.bf16 %v3082_v60  ;;  %v3168_v9 = vunpack.c.h.s8.bf16 %v3084_v61 }
 0x4d4   :  { %3258 = vmatprep.subr.bf16.mxu0 %v3131_v10  ;;  %3344 = vmatprep.subr.bf16.mxu1 %v3133_v11  ;;  %v3171_v10 = vunpack.c.l.s8.bf16 %v3087_v6  ;;  %v3173_v11 = vunpack.c.l.s8.bf16 %v3089_v7 }
 0x4d6   :  { %2898 = vmatmul.mubr.bf16.vlgmr.msra.gmra.mrb[12].mxu0 %v5276_v36  ;;  %2984 = vmatmul.mubr.bf16.vlgmr.msra.gmra.mrb[12].mxu1 %v5276_v36  ;;  %v3077_v36 = vld [vmem:[#allocation11 + $0x58] sm:$0xff] }
 0x4d7   :  { %3259 = vmatpush1.bf16.msra.mxu0 %v3130_v14  ;;  %3345 = vmatpush1.bf16.msra.mxu1 %v3132_v15  ;;  %v3149_v33 = vunpack.c.l.s8.bf16 %v3077_v36  ;;  %v3153_v41 = vunpack.c.h.s8.bf16 %v3077_v36  ;;  %v3170_v14 = vunpack.c.l.s8.bf16 %v3086_v12  ;;  %v3172_v15 = vunpack.c.l.s8.bf16 %v3088_v13 }
 0x4d8   :  { %3260 = vmatprep.subr.bf16.mxu0 %v3135_v16  ;;  %3346 = vmatprep.subr.bf16.mxu1 %v3137_v17  ;;  %v3175_v16 = vunpack.c.h.s8.bf16 %v3087_v6  ;;  %v3177_v17 = vunpack.c.h.s8.bf16 %v3089_v7  ;;  %v3184_v36 = vunpack.c.h.s8.bf16 %v3092_v25 }
 0x4db   :  { %3261 = vmatpush1.bf16.msra.mxu0 %v3134_v20  ;;  %3347 = vmatpush1.bf16.msra.mxu1 %v3136_v21  ;;  %v3174_v20 = vunpack.c.h.s8.bf16 %v3086_v12  ;;  %v3176_v21 = vunpack.c.h.s8.bf16 %v3088_v13 }
 0x4dc   :  { %3262 = vmatprep.subr.bf16.mxu0 %v3139_v22  ;;  %3348 = vmatprep.subr.bf16.mxu1 %v3141_v23  ;;  %v3179_v22 = vunpack.c.l.s8.bf16 %v3091_v18  ;;  %v3181_v23 = vunpack.c.l.s8.bf16 %v3093_v19 }
 0x4df   :  { %3263 = vmatpush1.bf16.msra.mxu0 %v3138_v26  ;;  %3349 = vmatpush1.bf16.msra.mxu1 %v3140_v27  ;;  %v3178_v26 = vunpack.c.l.s8.bf16 %v3090_v24  ;;  %v3180_v27 = vunpack.c.l.s8.bf16 %v3092_v25 }
 0x4e0   :  { %3264 = vmatprep.subr.bf16.mxu0 %v3143_v28  ;;  %3350 = vmatprep.subr.bf16.mxu1 %v3145_v29  ;;  %v3183_v28 = vunpack.c.h.s8.bf16 %v3091_v18  ;;  %v3185_v29 = vunpack.c.h.s8.bf16 %v3093_v19 }
 0x4e3   :  { %3265 = vmatpush1.bf16.msra.mxu0 %v3142_v31  ;;  %3351 = vmatpush1.bf16.msra.mxu1 %v3144_v34  ;;  %v3095_v31 = vld [vmem:[#allocation11 + $0xe8] sm:$0xff]  ;;  %v3097_v34 = vld [vmem:[#allocation11 + $0xf8] sm:$0xff] }
 0x4e4   :  { %3266 = vmatprep.subr.bf16.mxu0 %v3147_v32  ;;  %3352 = vmatprep.subr.bf16.mxu1 %v3149_v33  ;;  %v3187_v32 = vunpack.c.l.s8.bf16 %v3095_v31  ;;  %v3189_v33 = vunpack.c.l.s8.bf16 %v3097_v34 }
 0x4e7   :  { %3267 = vmatpush1.bf16.msra.mxu0 %v3146_v38  ;;  %3353 = vmatpush1.bf16.msra.mxu1 %v3148_v39  ;;  %v3186_v38 = vunpack.c.l.s8.bf16 %v3094_v35  ;;  %v3188_v39 = vunpack.c.l.s8.bf16 %v3096_v37 }
 0x4e8   :  { %3268 = vmatprep.subr.bf16.mxu0 %v3151_v40  ;;  %3354 = vmatprep.subr.bf16.mxu1 %v3153_v41  ;;  %v3191_v40 = vunpack.c.h.s8.bf16 %v3095_v31  ;;  %v3193_v41 = vunpack.c.h.s8.bf16 %v3097_v34 }
 0x4eb   :  { %3269 = vmatpush1.bf16.msra.mxu0 %v3150_v44  ;;  %3355 = vmatpush1.bf16.msra.mxu1 %v3152_v49  ;;  %v5282_v44 = vld [vmem:[#allocation11 + $0x108] sm:$0xff]  ;;  %v5284_v49 = vld [vmem:[#allocation11 + $0x118] sm:$0xff] }
 0x4ec   :  { %3270 = vmatprep.subr.bf16.mxu0 %v3155_v50  ;;  %3356 = vmatprep.subr.bf16.mxu1 %v3157_v51  ;;  %v3195_v50 = vunpack.c.l.s8.bf16 %v5282_v44  ;;  %v3197_v51 = vunpack.c.l.s8.bf16 %v5284_v49 }
 0x4ef   :  { %3271 = vmatpush1.bf16.msra.mxu0 %v3154_v48  ;;  %3357 = vmatpush1.bf16.msra.mxu1 %v3156_v47  ;;  %v2999_v48 = vrot.slane %v2994_v46, %v5209_v0  ;;  %v3007_v47 = vrot.slane %v2994_v46, %v5211_v1 }
 0x4f0   :  { %3272 = vmatprep.subr.bf16.mxu0 %v3159_v52  ;;  %3358 = vmatprep.subr.bf16.mxu1 %v3161_v53  ;;  %v3003_v52 = vrot.slane %v2994_v46, %v5216_v3  ;;  %v3011_v53 = vrot.slane %v2994_v46, %v5218_v4  ;;  %v3102_v46 = vld [vmem:[#allocation11 + $0x120] sm:$0xff] }
 0x4f3   :  { %3273 = vmatpush1.bf16.msra.mxu0 %v3158_v56  ;;  %3359 = vmatpush1.bf16.msra.mxu1 %v3160_v57 }
 0x4f4   :  { %3274 = vmatprep.subr.bf16.mxu0 %v3163_v58  ;;  %3360 = vmatprep.subr.bf16.mxu1 %v3165_v59  ;;  %v3033_v58 = vrot.slane %v3024_v45, %v5216_v3  ;;  %v3041_v59 = vrot.slane %v3024_v45, %v5218_v4  ;;  %v3104_v45 = vld [vmem:[#allocation11 + $0x130] sm:$0xff] }
 0x4f7   :  { %3275 = vmatpush1.bf16.msra.mxu0 %v3162_v62  ;;  %3361 = vmatpush1.bf16.msra.mxu1 %v3164_v63 }
 0x4f8   :  { %3276 = vmatprep.subr.bf16.mxu0 %v3167_v2  ;;  %3362 = vmatprep.subr.bf16.mxu1 %v3169_v5 }
 0x4fb   :  { %3277 = vmatpush1.bf16.msra.mxu0 %v3166_v8  ;;  %3363 = vmatpush1.bf16.msra.mxu1 %v3168_v9 }
 0x4fc   :  { %3278 = vmatprep.subr.bf16.mxu0 %v3171_v10  ;;  %3364 = vmatprep.subr.bf16.mxu1 %v3173_v11 }
 0x4ff   :  { %3279 = vmatpush1.bf16.msra.mxu0 %v3170_v14  ;;  %3365 = vmatpush1.bf16.msra.mxu1 %v3172_v15 }
 0x500   :  { %3280 = vmatprep.subr.bf16.mxu0 %v3175_v16  ;;  %3366 = vmatprep.subr.bf16.mxu1 %v3177_v17 }
 0x503   :  { %3281 = vmatpush1.bf16.msra.mxu0 %v3174_v20  ;;  %3367 = vmatpush1.bf16.msra.mxu1 %v3176_v21 }
 0x504   :  { %3282 = vmatprep.subr.bf16.mxu0 %v3179_v22  ;;  %3368 = vmatprep.subr.bf16.mxu1 %v3181_v23 }
 0x507   :  { %3283 = vmatpush1.bf16.msra.mxu0 %v3178_v26  ;;  %3369 = vmatpush1.bf16.msra.mxu1 %v3180_v27  ;;  %v3098_v26 = vld [vmem:[#allocation11 + $0x100] sm:$0xff]  ;;  %v3100_v27 = vld [vmem:[#allocation11 + $0x110] sm:$0xff] }
 0x508   :  { %3284 = vmatprep.subr.bf16.mxu0 %v3183_v28  ;;  %3370 = vmatprep.subr.bf16.mxu1 %v3185_v29  ;;  %v3196_v35 = vunpack.c.l.s8.bf16 %v3100_v27 }
 0x50b   :  { %3285 = vmatpush1.bf16.msra.mxu0 %v3182_v30  ;;  %3371 = vmatpush1.bf16.msra.mxu1 %v3184_v36 }
 0x50c   :  { %3286 = vmatprep.subr.bf16.mxu0 %v3187_v32  ;;  %3372 = vmatprep.subr.bf16.mxu1 %v3189_v33  ;;  %v3194_v33 = vunpack.c.l.s8.bf16 %v3098_v26 }
 0x50f   :  { %3287 = vmatpush1.bf16.msra.mxu0 %v3186_v38  ;;  %3373 = vmatpush1.bf16.msra.mxu1 %v3188_v39  ;;  %v3199_v38 = vunpack.c.h.s8.bf16 %v5282_v44  ;;  %v3201_v39 = vunpack.c.h.s8.bf16 %v5284_v49  ;;  %v3202_v44 = vunpack.c.l.s8.bf16 %v3102_v46  ;;  %v3204_v49 = vunpack.c.l.s8.bf16 %v3104_v45 }
 0x510   :  { %3288 = vmatprep.subr.bf16.mxu0 %v3191_v40  ;;  %3374 = vmatprep.subr.bf16.mxu1 %v3193_v41  ;;  %v3103_v40 = vld [vmem:[#allocation11 + $0x128] sm:$0xff]  ;;  %v3105_v41 = vld [vmem:[#allocation11 + $0x138] sm:$0xff] }
 0x513   :  { %3289 = vmatpush1.bf16.msra.mxu0 %v3190_v42  ;;  %3375 = vmatpush1.bf16.msra.mxu1 %v3192_v43  ;;  %v3198_v42 = vunpack.c.h.s8.bf16 %v3098_v26  ;;  %v3200_v43 = vunpack.c.h.s8.bf16 %v3100_v27 }
 0x514   :  { %3301 = vmatprep.subr.bf16.mxu0 %v3195_v50  ;;  %3387 = vmatprep.subr.bf16.mxu1 %v3197_v51  ;;  %v3203_v50 = vunpack.c.l.s8.bf16 %v3103_v40  ;;  %v3205_v51 = vunpack.c.l.s8.bf16 %v3105_v41 }
 0x5a9   :  { %v2899_v56 = vpop.f32.mrb[12].mxu0  ;;  %v2985_v57 = vpop.f32.mrb[12].mxu1 }
 0x5aa   :  { %v3016_v60 = vmul.f32 %v2999_v48, %v2899_v56  ;;  %v3018_v61 = vmul.f32 %v3007_v47, %v2985_v57  ;;  %v2901_v62 = vpop.f32.mrb[13].mxu0  ;;  %v2987_v63 = vpop.f32.mrb[13].mxu1 }
 0x5ab   :  { %v3017_v2 = vmul.f32 %v3003_v52, %v2901_v62  ;;  %v3019_v5 = vmul.f32 %v3011_v53, %v2987_v63  ;;  %v2903_v6 = vpop.f32.mrb[14].mxu0  ;;  %v2989_v7 = vpop.f32.mrb[14].mxu1 }
 0x5ac   :  { %v3046_v8 = vadd.f32 %v3029_v54, %v3016_v60  ;;  %v3048_v9 = vadd.f32 %v3037_v55, %v3018_v61  ;;  %v3020_v10 = vmul.f32 %v2999_v48, %v2903_v6  ;;  %v3022_v11 = vmul.f32 %v3007_v47, %v2989_v7  ;;  %v2905_v12 = vpop.f32.mrb[15].mxu0  ;;  %v2991_v13 = vpop.f32.mrb[15].mxu1 }
 0x5ad   :  { %v3047_v14 = vadd.f32 %v3033_v58, %v3017_v2  ;;  %v3049_v15 = vadd.f32 %v3041_v59, %v3019_v5  ;;  %v3021_v16 = vmul.f32 %v3003_v52, %v2905_v12  ;;  %v3023_v17 = vmul.f32 %v3011_v53, %v2991_v13  ;;  %v3107_v52 = vld [vmem:[#allocation11 + $0x148] sm:$0xff]  ;;  %v3109_v53 = vld [vmem:[#allocation11 + $0x158] sm:$0xff] }
 0x5ae   :  { %v3050_v18 = vadd.f32 %v3029_v54, %v3020_v10  ;;  %v3052_v19 = vadd.f32 %v3037_v55, %v3022_v11  ;;  %v3054_v22 = vmax.f32 %v3046_v8, 0.0  ;;  %v3056_v23 = vmax.f32 %v3048_v9, 0.0  ;;  %v3111_v2 = vld [vmem:[#allocation11 + $0x168] sm:$0xff]  ;;  %v3113_v5 = vld [vmem:[#allocation11 + $0x178] sm:$0xff]  ;;  %v3110_v10 = vld [vmem:[#allocation11 + $0x160] sm:$0xff] }
 0x5af   :  { %v3051_v20 = vadd.f32 %v3033_v58, %v3021_v16  ;;  %v3053_v21 = vadd.f32 %v3041_v59, %v3023_v17  ;;  %v3055_v28 = vmax.f32 %v3047_v14, 0.0  ;;  %v3057_v29 = vmax.f32 %v3049_v15, 0.0  ;;  %v3106_v58 = vld [vmem:[#allocation11 + $0x140] sm:$0xff]  ;;  %v3108_v59 = vld [vmem:[#allocation11 + $0x150] sm:$0xff]  ;;  %v3115_v16 = vld [vmem:[#allocation11 + $0x188] sm:$0xff] }
 0x5b0   :  { %v3058_v24 = vmax.f32 %v3050_v18, 0.0  ;;  %v3060_v25 = vmax.f32 %v3052_v19, 0.0  ;;  %v3207_v48 = vunpack.c.h.s8.bf16 %v3103_v40  ;;  %v3209_v47 = vunpack.c.h.s8.bf16 %v3105_v41  ;;  %v3112_v11 = vld [vmem:[#allocation11 + $0x170] sm:$0xff]  ;;  %v3117_v17 = vld [vmem:[#allocation11 + $0x198] sm:$0xff]  ;;  %v3123_v41 = vld [vmem:[#allocation11 + $0x1c8] sm:$0xff] }
 0x5b1   :  { %v3059_v30 = vmax.f32 %v3051_v20, 0.0  ;;  %v3061_v36 = vmax.f32 %v3053_v21, 0.0  ;;  %v3206_v54 = vunpack.c.h.s8.bf16 %v3102_v46  ;;  %v3208_v55 = vunpack.c.h.s8.bf16 %v3104_v45  ;;  %v3122_v45 = vld [vmem:[#allocation11 + $0x1c0] sm:$0xff] }
 0x5b2   :  { %v3062_v31 = vpack.c.bf16 %v3058_v24, %v3054_v22  ;;  %v5302_v34 = vpack.c.bf16 %v3060_v25, %v3056_v23  ;;  %v3211_v56 = vunpack.c.l.s8.bf16 %v3107_v52  ;;  %v3213_v57 = vunpack.c.l.s8.bf16 %v3109_v53  ;;  %v3114_v22 = vld [vmem:[#allocation11 + $0x180] sm:$0xff]  ;;  %v3116_v23 = vld [vmem:[#allocation11 + $0x190] sm:$0xff] }
 0x5b3   :  { %v3063_v32 = vpack.c.bf16 %v3059_v30, %v3055_v28  ;;  %v3065_v37 = vpack.c.bf16 %v3061_v36, %v3057_v29  ;;  %v3210_v60 = vunpack.c.l.s8.bf16 %v3106_v58  ;;  %v3212_v61 = vunpack.c.l.s8.bf16 %v3108_v59  ;;  %v3119_v28 = vld [vmem:[#allocation11 + $0x1a8] sm:$0xff]  ;;  %v3121_v29 = vld [vmem:[#allocation11 + $0x1b8] sm:$0xff] }
 0x5b4   :  { %v3215_v62 = vunpack.c.h.s8.bf16 %v3107_v52  ;;  %v3217_v63 = vunpack.c.h.s8.bf16 %v3109_v53  ;;  %v3214_v6 = vunpack.c.h.s8.bf16 %v3106_v58  ;;  %v3216_v7 = vunpack.c.h.s8.bf16 %v3108_v59  ;;  %v3127_v53 = vld [vmem:[#allocation11 + $0x1e8] sm:$0xff]  ;;  %v3126_v59 = vld [vmem:[#allocation11 + $0x1e0] sm:$0xff] }
 0x5b5   :  { %3290 = vmatprep.mubr.bf16.mxu0 %v3063_v32  ;;  %3376 = vmatprep.mubr.bf16.mxu1 %v3063_v32  ;;  %v3219_v8 = vunpack.c.l.s8.bf16 %v3111_v2  ;;  %v3221_v9 = vunpack.c.l.s8.bf16 %v3113_v5  ;;  %v3218_v12 = vunpack.c.l.s8.bf16 %v3110_v10  ;;  %v3220_v13 = vunpack.c.l.s8.bf16 %v3112_v11 }
 0x5b6   :  { %3291 = vmatmul.mubr.bf16.vlgmr.msra.gmra.mrb[16].mxu0 %v3062_v31  ;;  %3377 = vmatmul.mubr.bf16.vlgmr.msra.gmra.mrb[16].mxu1 %v3062_v31  ;;  %v3223_v14 = vunpack.c.h.s8.bf16 %v3111_v2  ;;  %v3225_v15 = vunpack.c.h.s8.bf16 %v3113_v5  ;;  %v3222_v18 = vunpack.c.h.s8.bf16 %v3110_v10  ;;  %v3224_v19 = vunpack.c.h.s8.bf16 %v3112_v11  ;;  %v3503_v5 = vld [vmem:[#allocation13 + $0x8] sm:$0xff]  ;;  %v3502_v11 = vld [vmem:[#allocation13] sm:$0xff] }
 0x5b7   :  { %3302 = vmatpush1.bf16.msra.mxu0 %v3194_v33  ;;  %3388 = vmatpush1.bf16.msra.mxu1 %v3196_v35  ;;  %v3227_v20 = vunpack.c.l.s8.bf16 %v3115_v16  ;;  %v3229_v21 = vunpack.c.l.s8.bf16 %v3117_v17  ;;  %v3226_v24 = vunpack.c.l.s8.bf16 %v3114_v22  ;;  %v3228_v25 = vunpack.c.l.s8.bf16 %v3116_v23  ;;  %v3118_v33 = vld [vmem:[#allocation11 + $0x1a0] sm:$0xff]  ;;  %v3120_v35 = vld [vmem:[#allocation11 + $0x1b0] sm:$0xff] }
 0x5b8   :  { %3333 = vmatprep.mubr.bf16.mxu0 %v3065_v37  ;;  %3419 = vmatprep.mubr.bf16.mxu1 %v3065_v37  ;;  %v3231_v26 = vunpack.c.h.s8.bf16 %v3115_v16  ;;  %v3233_v27 = vunpack.c.h.s8.bf16 %v3117_v17  ;;  %v3230_v30 = vunpack.c.h.s8.bf16 %v3114_v22  ;;  %v3232_v36 = vunpack.c.h.s8.bf16 %v3116_v23  ;;  %v3507_v17 = vld [vmem:[#allocation13 + $0x28] sm:$0xff]  ;;  %v3506_v23 = vld [vmem:[#allocation13 + $0x20] sm:$0xff] }
 0x5b9   :  { %3303 = vmatprep.subr.bf16.mxu0 %v3199_v38  ;;  %3389 = vmatprep.subr.bf16.mxu1 %v3201_v39  ;;  %v3235_v31 = vunpack.c.l.s8.bf16 %v3119_v28  ;;  %v3237_v32 = vunpack.c.l.s8.bf16 %v3121_v29  ;;  %v3234_v37 = vunpack.c.l.s8.bf16 %v3118_v33  ;;  %v3236_v38 = vunpack.c.l.s8.bf16 %v3120_v35 }
 0x5ba   :  { %v3239_v39 = vunpack.c.h.s8.bf16 %v3119_v28  ;;  %v3241_v40 = vunpack.c.h.s8.bf16 %v3121_v29  ;;  %v3511_v29 = vld [vmem:[#allocation13 + $0x48] sm:$0xff] }
 0x5bb   :  { %3304 = vmatpush1.bf16.msra.mxu0 %v3198_v42  ;;  %3390 = vmatpush1.bf16.msra.mxu1 %v3200_v43  ;;  %v3125_v42 = vld [vmem:[#allocation11 + $0x1d8] sm:$0xff]  ;;  %v3238_v43 = vunpack.c.h.s8.bf16 %v3118_v33  ;;  %v3510_v33 = vld [vmem:[#allocation13 + $0x40] sm:$0xff] }
 0x5bc   :  { %3305 = vmatprep.subr.bf16.mxu0 %v3203_v50  ;;  %3391 = vmatprep.subr.bf16.mxu1 %v3205_v51  ;;  %v3240_v50 = vunpack.c.h.s8.bf16 %v3120_v35  ;;  %v3243_v51 = vunpack.c.l.s8.bf16 %v3123_v41  ;;  %v3245_v46 = vunpack.c.l.s8.bf16 %v3125_v42  ;;  %v3249_v52 = vunpack.c.h.s8.bf16 %v3125_v42  ;;  %v3512_v35 = vld [vmem:[#allocation13 + $0x50] sm:$0xff]  ;;  %v3517_v42 = vld [vmem:[#allocation13 + $0x78] sm:$0xff] }
 0x5bf   :  { %3306 = vmatpush1.bf16.msra.mxu0 %v3202_v44  ;;  %3392 = vmatpush1.bf16.msra.mxu1 %v3204_v49  ;;  %v3124_v44 = vld [vmem:[#allocation11 + $0x1d0] sm:$0xff]  ;;  %v3242_v49 = vunpack.c.l.s8.bf16 %v3122_v45 }
 0x5c0   :  { %3307 = vmatprep.subr.bf16.mxu0 %v3207_v48  ;;  %3393 = vmatprep.subr.bf16.mxu1 %v3209_v47  ;;  %v3244_v48 = vunpack.c.l.s8.bf16 %v3124_v44  ;;  %v3247_v47 = vunpack.c.h.s8.bf16 %v3123_v41  ;;  %v3515_v41 = vld [vmem:[#allocation13 + $0x68] sm:$0xff] }
 0x5c3   :  { %3308 = vmatpush1.bf16.msra.mxu0 %v3206_v54  ;;  %3394 = vmatpush1.bf16.msra.mxu1 %v3208_v55  ;;  %v3129_v54 = vld [vmem:[#allocation11 + $0x1f8] sm:$0xff]  ;;  %v3246_v55 = vunpack.c.h.s8.bf16 %v3122_v45  ;;  %v3514_v45 = vld [vmem:[#allocation13 + $0x60] sm:$0xff] }
 0x5c4   :  { %3309 = vmatprep.subr.bf16.mxu0 %v3211_v56  ;;  %3395 = vmatprep.subr.bf16.mxu1 %v3213_v57  ;;  %v3248_v56 = vunpack.c.h.s8.bf16 %v3124_v44  ;;  %v3251_v57 = vunpack.c.l.s8.bf16 %v3127_v53  ;;  %v3253_v58 = vunpack.c.l.s8.bf16 %v3129_v54  ;;  %v3257_v2 = vunpack.c.h.s8.bf16 %v3129_v54  ;;  %v3516_v44 = vld [vmem:[#allocation13 + $0x70] sm:$0xff]  ;;  %v3521_v54 = vld [vmem:[#allocation13 + $0x98] sm:$0xff] }
 0x5c7   :  { %3310 = vmatpush1.bf16.msra.mxu0 %v3210_v60  ;;  %3396 = vmatpush1.bf16.msra.mxu1 %v3212_v61  ;;  %v3128_v60 = vld [vmem:[#allocation11 + $0x1f0] sm:$0xff]  ;;  %v3250_v61 = vunpack.c.l.s8.bf16 %v3126_v59 }
 0x5c8   :  { %3311 = vmatprep.subr.bf16.mxu0 %v3215_v62  ;;  %3397 = vmatprep.subr.bf16.mxu1 %v3217_v63  ;;  %v3252_v62 = vunpack.c.l.s8.bf16 %v3128_v60  ;;  %v3255_v63 = vunpack.c.h.s8.bf16 %v3127_v53  ;;  %v3519_v53 = vld [vmem:[#allocation13 + $0x88] sm:$0xff] }
 0x5cb   :  { %3312 = vmatpush1.bf16.msra.mxu0 %v3214_v6  ;;  %3398 = vmatpush1.bf16.msra.mxu1 %v3216_v7  ;;  %v3505_v6 = vld [vmem:[#allocation13 + $0x18] sm:$0xff]  ;;  %v3254_v7 = vunpack.c.h.s8.bf16 %v3126_v59  ;;  %v3518_v59 = vld [vmem:[#allocation13 + $0x80] sm:$0xff] }
 0x5cc   :  { %3313 = vmatprep.subr.bf16.mxu0 %v3219_v8  ;;  %3399 = vmatprep.subr.bf16.mxu1 %v3221_v9  ;;  %v3256_v8 = vunpack.c.h.s8.bf16 %v3128_v60  ;;  %v3567_v9 = vunpack.c.l.s8.bf16 %v3503_v5  ;;  %v3569_v10 = vunpack.c.l.s8.bf16 %v3505_v6  ;;  %v3573_v16 = vunpack.c.h.s8.bf16 %v3505_v6  ;;  %v3520_v60 = vld [vmem:[#allocation13 + $0x90] sm:$0xff]  ;;  %v3525_v6 = vld [vmem:[#allocation13 + $0xb8] sm:$0xff] }
 0x5cf   :  { %3314 = vmatpush1.bf16.msra.mxu0 %v3218_v12  ;;  %3400 = vmatpush1.bf16.msra.mxu1 %v3220_v13  ;;  %v3504_v12 = vld [vmem:[#allocation13 + $0x10] sm:$0xff]  ;;  %v3566_v13 = vunpack.c.l.s8.bf16 %v3502_v11 }
 0x5d0   :  { %3315 = vmatprep.subr.bf16.mxu0 %v3223_v14  ;;  %3401 = vmatprep.subr.bf16.mxu1 %v3225_v15  ;;  %v3568_v14 = vunpack.c.l.s8.bf16 %v3504_v12  ;;  %v3571_v15 = vunpack.c.h.s8.bf16 %v3503_v5  ;;  %v3523_v5 = vld [vmem:[#allocation13 + $0xa8] sm:$0xff] }
 0x5d3   :  { %3316 = vmatpush1.bf16.msra.mxu0 %v3222_v18  ;;  %3402 = vmatpush1.bf16.msra.mxu1 %v3224_v19  ;;  %v3509_v18 = vld [vmem:[#allocation13 + $0x38] sm:$0xff]  ;;  %v3570_v19 = vunpack.c.h.s8.bf16 %v3502_v11  ;;  %v3522_v11 = vld [vmem:[#allocation13 + $0xa0] sm:$0xff] }
 0x5d4   :  { %3317 = vmatprep.subr.bf16.mxu0 %v3227_v20  ;;  %3403 = vmatprep.subr.bf16.mxu1 %v3229_v21  ;;  %v3572_v20 = vunpack.c.h.s8.bf16 %v3504_v12  ;;  %v3575_v21 = vunpack.c.l.s8.bf16 %v3507_v17  ;;  %v3577_v22 = vunpack.c.l.s8.bf16 %v3509_v18  ;;  %v3581_v28 = vunpack.c.h.s8.bf16 %v3509_v18  ;;  %v3524_v12 = vld [vmem:[#allocation13 + $0xb0] sm:$0xff]  ;;  %v3529_v18 = vld [vmem:[#allocation13 + $0xd8] sm:$0xff] }
 0x5d7   :  { %3318 = vmatpush1.bf16.msra.mxu0 %v3226_v24  ;;  %3404 = vmatpush1.bf16.msra.mxu1 %v3228_v25  ;;  %v3508_v24 = vld [vmem:[#allocation13 + $0x30] sm:$0xff]  ;;  %v3574_v25 = vunpack.c.l.s8.bf16 %v3506_v23 }
 0x5d8   :  { %3319 = vmatprep.subr.bf16.mxu0 %v3231_v26  ;;  %3405 = vmatprep.subr.bf16.mxu1 %v3233_v27  ;;  %v3576_v26 = vunpack.c.l.s8.bf16 %v3508_v24  ;;  %v3579_v27 = vunpack.c.h.s8.bf16 %v3507_v17  ;;  %v3527_v17 = vld [vmem:[#allocation13 + $0xc8] sm:$0xff] }
 0x5db   :  { %3320 = vmatpush1.bf16.msra.mxu0 %v3230_v30  ;;  %3406 = vmatpush1.bf16.msra.mxu1 %v3232_v36  ;;  %v3578_v30 = vunpack.c.h.s8.bf16 %v3506_v23  ;;  %v3580_v36 = vunpack.c.h.s8.bf16 %v3508_v24  ;;  %v3526_v23 = vld [vmem:[#allocation13 + $0xc0] sm:$0xff]  ;;  %v3528_v24 = vld [vmem:[#allocation13 + $0xd0] sm:$0xff] }
 0x5dc   :  { %3321 = vmatprep.subr.bf16.mxu0 %v3235_v31  ;;  %3407 = vmatprep.subr.bf16.mxu1 %v3237_v32  ;;  %v3583_v31 = vunpack.c.l.s8.bf16 %v3511_v29 }
 0x5df   :  { %3322 = vmatpush1.bf16.msra.mxu0 %v3234_v37  ;;  %3408 = vmatpush1.bf16.msra.mxu1 %v3236_v38  ;;  %v3582_v37 = vunpack.c.l.s8.bf16 %v3510_v33  ;;  %v3584_v38 = vunpack.c.l.s8.bf16 %v3512_v35 }
 0x5e0   :  { %3323 = vmatprep.subr.bf16.mxu0 %v3239_v39  ;;  %3409 = vmatprep.subr.bf16.mxu1 %v3241_v40  ;;  %v3587_v39 = vunpack.c.h.s8.bf16 %v3511_v29  ;;  %v3618_v29 = vunpack.c.h.s8.bf16 %v3526_v23 }
 0x5e3   :  { %3324 = vmatpush1.bf16.msra.mxu0 %v3238_v43  ;;  %3410 = vmatpush1.bf16.msra.mxu1 %v3240_v50  ;;  %v3586_v43 = vunpack.c.h.s8.bf16 %v3510_v33  ;;  %v3588_v50 = vunpack.c.h.s8.bf16 %v3512_v35  ;;  %v3530_v33 = vld [vmem:[#allocation13 + $0xe0] sm:$0xff]  ;;  %v3532_v35 = vld [vmem:[#allocation13 + $0xf0] sm:$0xff] }
 0x5e4   :  { %3325 = vmatprep.subr.bf16.mxu0 %v3243_v51  ;;  %3411 = vmatprep.subr.bf16.mxu1 %v3245_v46  ;;  %v3591_v51 = vunpack.c.l.s8.bf16 %v3515_v41  ;;  %v3593_v46 = vunpack.c.l.s8.bf16 %v3517_v42 }
 0x5e7   :  { %3326 = vmatpush1.bf16.msra.mxu0 %v3242_v49  ;;  %3412 = vmatpush1.bf16.msra.mxu1 %v3244_v48  ;;  %v3590_v49 = vunpack.c.l.s8.bf16 %v3514_v45  ;;  %v3592_v48 = vunpack.c.l.s8.bf16 %v3516_v44 }
 0x5e8   :  { %3327 = vmatprep.subr.bf16.mxu0 %v3247_v47  ;;  %3413 = vmatprep.subr.bf16.mxu1 %v3249_v52  ;;  %v3595_v47 = vunpack.c.h.s8.bf16 %v3515_v41  ;;  %v3597_v52 = vunpack.c.h.s8.bf16 %v3517_v42  ;;  %v3626_v41 = vunpack.c.h.s8.bf16 %v3530_v33  ;;  %v3628_v42 = vunpack.c.h.s8.bf16 %v3532_v35 }
 0x5eb   :  { %3328 = vmatpush1.bf16.msra.mxu0 %v3246_v55  ;;  %3414 = vmatpush1.bf16.msra.mxu1 %v3248_v56  ;;  %v3594_v55 = vunpack.c.h.s8.bf16 %v3514_v45  ;;  %v3596_v56 = vunpack.c.h.s8.bf16 %v3516_v44  ;;  %v3430_v45 = vld [vmem:[%s5382_s13] sm:$0xf] }
 0x5ec   :  { %3329 = vmatprep.subr.bf16.mxu0 %v3251_v57  ;;  %3415 = vmatprep.subr.bf16.mxu1 %v3253_v58  ;;  %v3599_v57 = vunpack.c.l.s8.bf16 %v3519_v53  ;;  %v3601_v58 = vunpack.c.l.s8.bf16 %v3521_v54  ;;  %v3460_v44 = vld [vmem:[%s5383_s14] sm:$0xf] }
 0x5ef   :  { %3330 = vmatpush1.bf16.msra.mxu0 %v3250_v61  ;;  %3416 = vmatpush1.bf16.msra.mxu1 %v3252_v62  ;;  %v3598_v61 = vunpack.c.l.s8.bf16 %v3518_v59  ;;  %v3600_v62 = vunpack.c.l.s8.bf16 %v3520_v60 }
 0x5f0   :  { %3331 = vmatprep.subr.bf16.mxu0 %v3255_v63  ;;  %3417 = vmatprep.subr.bf16.mxu1 %v3257_v2  ;;  %v3603_v63 = vunpack.c.h.s8.bf16 %v3519_v53  ;;  %v3605_v2 = vunpack.c.h.s8.bf16 %v3521_v54  ;;  %v3465_v53 = vrot.slane %v3460_v44, %v5209_v0  ;;  %v3473_v54 = vrot.slane %v3460_v44, %v5211_v1 }
 0x5f3   :  { %3332 = vmatpush1.bf16.msra.mxu0 %v3254_v7  ;;  %3418 = vmatpush1.bf16.msra.mxu1 %v3256_v8  ;;  %v3602_v7 = vunpack.c.h.s8.bf16 %v3518_v59  ;;  %v3604_v8 = vunpack.c.h.s8.bf16 %v3520_v60 }
 0x5f4   :  { %3694 = vmatprep.subr.bf16.mxu0 %v3567_v9  ;;  %3780 = vmatprep.subr.bf16.mxu1 %v3569_v10  ;;  %v3607_v9 = vunpack.c.l.s8.bf16 %v3523_v5  ;;  %v3609_v10 = vunpack.c.l.s8.bf16 %v3525_v6 }
 0x5f6   :  { %3334 = vmatmul.mubr.bf16.vlgmr.msra.gmra.mrb[16].mxu0 %v5302_v34  ;;  %3420 = vmatmul.mubr.bf16.vlgmr.msra.gmra.mrb[16].mxu1 %v5302_v34  ;;  %v3513_v34 = vld [vmem:[#allocation13 + $0x58] sm:$0xff] }
 0x5f7   :  { %3695 = vmatpush1.bf16.msra.mxu0 %v3566_v13  ;;  %3781 = vmatpush1.bf16.msra.mxu1 %v3568_v14  ;;  %v3585_v32 = vunpack.c.l.s8.bf16 %v3513_v34  ;;  %v3589_v40 = vunpack.c.h.s8.bf16 %v3513_v34  ;;  %v3606_v13 = vunpack.c.l.s8.bf16 %v3522_v11  ;;  %v3608_v14 = vunpack.c.l.s8.bf16 %v3524_v12 }
 0x5f8   :  { %3696 = vmatprep.subr.bf16.mxu0 %v3571_v15  ;;  %3782 = vmatprep.subr.bf16.mxu1 %v3573_v16  ;;  %v3611_v15 = vunpack.c.h.s8.bf16 %v3523_v5  ;;  %v3613_v16 = vunpack.c.h.s8.bf16 %v3525_v6  ;;  %v3620_v34 = vunpack.c.h.s8.bf16 %v3528_v24 }
 0x5fb   :  { %3697 = vmatpush1.bf16.msra.mxu0 %v3570_v19  ;;  %3783 = vmatpush1.bf16.msra.mxu1 %v3572_v20  ;;  %v3610_v19 = vunpack.c.h.s8.bf16 %v3522_v11  ;;  %v3612_v20 = vunpack.c.h.s8.bf16 %v3524_v12 }
 0x5fc   :  { %3698 = vmatprep.subr.bf16.mxu0 %v3575_v21  ;;  %3784 = vmatprep.subr.bf16.mxu1 %v3577_v22  ;;  %v3615_v21 = vunpack.c.l.s8.bf16 %v3527_v17  ;;  %v3617_v22 = vunpack.c.l.s8.bf16 %v3529_v18 }
 0x5ff   :  { %3699 = vmatpush1.bf16.msra.mxu0 %v3574_v25  ;;  %3785 = vmatpush1.bf16.msra.mxu1 %v3576_v26  ;;  %v3614_v25 = vunpack.c.l.s8.bf16 %v3526_v23  ;;  %v3616_v26 = vunpack.c.l.s8.bf16 %v3528_v24 }
 0x600   :  { %3700 = vmatprep.subr.bf16.mxu0 %v3579_v27  ;;  %3786 = vmatprep.subr.bf16.mxu1 %v3581_v28  ;;  %v3619_v27 = vunpack.c.h.s8.bf16 %v3527_v17  ;;  %v3621_v28 = vunpack.c.h.s8.bf16 %v3529_v18 }
 0x603   :  { %3701 = vmatpush1.bf16.msra.mxu0 %v3578_v30  ;;  %3787 = vmatpush1.bf16.msra.mxu1 %v3580_v36  ;;  %v3531_v30 = vld [vmem:[#allocation13 + $0xe8] sm:$0xff]  ;;  %v3533_v36 = vld [vmem:[#allocation13 + $0xf8] sm:$0xff] }
 0x604   :  { %3702 = vmatprep.subr.bf16.mxu0 %v3583_v31  ;;  %3788 = vmatprep.subr.bf16.mxu1 %v3585_v32  ;;  %v3623_v31 = vunpack.c.l.s8.bf16 %v3531_v30  ;;  %v3625_v32 = vunpack.c.l.s8.bf16 %v3533_v36 }
 0x607   :  { %3703 = vmatpush1.bf16.msra.mxu0 %v3582_v37  ;;  %3789 = vmatpush1.bf16.msra.mxu1 %v3584_v38  ;;  %v3622_v37 = vunpack.c.l.s8.bf16 %v3530_v33  ;;  %v3624_v38 = vunpack.c.l.s8.bf16 %v3532_v35 }
 0x608   :  { %3704 = vmatprep.subr.bf16.mxu0 %v3587_v39  ;;  %3790 = vmatprep.subr.bf16.mxu1 %v3589_v40  ;;  %v3627_v39 = vunpack.c.h.s8.bf16 %v3531_v30  ;;  %v3629_v40 = vunpack.c.h.s8.bf16 %v3533_v36 }
 0x60b   :  { %3705 = vmatpush1.bf16.msra.mxu0 %v3586_v43  ;;  %3791 = vmatpush1.bf16.msra.mxu1 %v3588_v50  ;;  %v5308_v43 = vld [vmem:[#allocation13 + $0x108] sm:$0xff]  ;;  %v5310_v50 = vld [vmem:[#allocation13 + $0x118] sm:$0xff] }
 0x60c   :  { %3706 = vmatprep.subr.bf16.mxu0 %v3591_v51  ;;  %3792 = vmatprep.subr.bf16.mxu1 %v3593_v46  ;;  %v3631_v51 = vunpack.c.l.s8.bf16 %v5308_v43  ;;  %v3633_v46 = vunpack.c.l.s8.bf16 %v5310_v50 }
 0x60f   :  { %3707 = vmatpush1.bf16.msra.mxu0 %v3590_v49  ;;  %3793 = vmatpush1.bf16.msra.mxu1 %v3592_v48  ;;  %v3435_v49 = vrot.slane %v3430_v45, %v5209_v0  ;;  %v3443_v48 = vrot.slane %v3430_v45, %v5211_v1 }
 0x610   :  { %3708 = vmatprep.subr.bf16.mxu0 %v3595_v47  ;;  %3794 = vmatprep.subr.bf16.mxu1 %v3597_v52  ;;  %v3439_v47 = vrot.slane %v3430_v45, %v5216_v3  ;;  %v3447_v52 = vrot.slane %v3430_v45, %v5218_v4  ;;  %v3538_v45 = vld [vmem:[#allocation13 + $0x120] sm:$0xff] }
 0x613   :  { %3709 = vmatpush1.bf16.msra.mxu0 %v3594_v55  ;;  %3795 = vmatpush1.bf16.msra.mxu1 %v3596_v56 }
 0x614   :  { %3710 = vmatprep.subr.bf16.mxu0 %v3599_v57  ;;  %3796 = vmatprep.subr.bf16.mxu1 %v3601_v58  ;;  %v3469_v57 = vrot.slane %v3460_v44, %v5216_v3  ;;  %v3477_v58 = vrot.slane %v3460_v44, %v5218_v4  ;;  %v3540_v44 = vld [vmem:[#allocation13 + $0x130] sm:$0xff] }
 0x617   :  { %3711 = vmatpush1.bf16.msra.mxu0 %v3598_v61  ;;  %3797 = vmatpush1.bf16.msra.mxu1 %v3600_v62 }
 0x618   :  { %3712 = vmatprep.subr.bf16.mxu0 %v3603_v63  ;;  %3798 = vmatprep.subr.bf16.mxu1 %v3605_v2 }
 0x61b   :  { %3713 = vmatpush1.bf16.msra.mxu0 %v3602_v7  ;;  %3799 = vmatpush1.bf16.msra.mxu1 %v3604_v8 }
 0x61c   :  { %3714 = vmatprep.subr.bf16.mxu0 %v3607_v9  ;;  %3800 = vmatprep.subr.bf16.mxu1 %v3609_v10 }
 0x61f   :  { %3715 = vmatpush1.bf16.msra.mxu0 %v3606_v13  ;;  %3801 = vmatpush1.bf16.msra.mxu1 %v3608_v14 }
 0x620   :  { %3716 = vmatprep.subr.bf16.mxu0 %v3611_v15  ;;  %3802 = vmatprep.subr.bf16.mxu1 %v3613_v16 }
 0x623   :  { %3717 = vmatpush1.bf16.msra.mxu0 %v3610_v19  ;;  %3803 = vmatpush1.bf16.msra.mxu1 %v3612_v20 }
 0x624   :  { %3718 = vmatprep.subr.bf16.mxu0 %v3615_v21  ;;  %3804 = vmatprep.subr.bf16.mxu1 %v3617_v22 }
 0x627   :  { %3719 = vmatpush1.bf16.msra.mxu0 %v3614_v25  ;;  %3805 = vmatpush1.bf16.msra.mxu1 %v3616_v26  ;;  %v3534_v25 = vld [vmem:[#allocation13 + $0x100] sm:$0xff]  ;;  %v3536_v26 = vld [vmem:[#allocation13 + $0x110] sm:$0xff] }
 0x628   :  { %3720 = vmatprep.subr.bf16.mxu0 %v3619_v27  ;;  %3806 = vmatprep.subr.bf16.mxu1 %v3621_v28  ;;  %v3632_v33 = vunpack.c.l.s8.bf16 %v3536_v26 }
 0x62b   :  { %3721 = vmatpush1.bf16.msra.mxu0 %v3618_v29  ;;  %3807 = vmatpush1.bf16.msra.mxu1 %v3620_v34 }
 0x62c   :  { %3722 = vmatprep.subr.bf16.mxu0 %v3623_v31  ;;  %3808 = vmatprep.subr.bf16.mxu1 %v3625_v32  ;;  %v3630_v32 = vunpack.c.l.s8.bf16 %v3534_v25 }
 0x62f   :  { %3723 = vmatpush1.bf16.msra.mxu0 %v3622_v37  ;;  %3809 = vmatpush1.bf16.msra.mxu1 %v3624_v38  ;;  %v3635_v37 = vunpack.c.h.s8.bf16 %v5308_v43  ;;  %v3637_v38 = vunpack.c.h.s8.bf16 %v5310_v50  ;;  %v3638_v43 = vunpack.c.l.s8.bf16 %v3538_v45  ;;  %v3640_v50 = vunpack.c.l.s8.bf16 %v3540_v44 }
 0x630   :  { %3724 = vmatprep.subr.bf16.mxu0 %v3627_v39  ;;  %3810 = vmatprep.subr.bf16.mxu1 %v3629_v40  ;;  %v3539_v39 = vld [vmem:[#allocation13 + $0x128] sm:$0xff]  ;;  %v3541_v40 = vld [vmem:[#allocation13 + $0x138] sm:$0xff] }
 0x633   :  { %3725 = vmatpush1.bf16.msra.mxu0 %v3626_v41  ;;  %3811 = vmatpush1.bf16.msra.mxu1 %v3628_v42  ;;  %v3634_v41 = vunpack.c.h.s8.bf16 %v3534_v25  ;;  %v3636_v42 = vunpack.c.h.s8.bf16 %v3536_v26 }
 0x634   :  { %3737 = vmatprep.subr.bf16.mxu0 %v3631_v51  ;;  %3823 = vmatprep.subr.bf16.mxu1 %v3633_v46  ;;  %v3639_v51 = vunpack.c.l.s8.bf16 %v3539_v39  ;;  %v3641_v46 = vunpack.c.l.s8.bf16 %v3541_v40 }
 0x6c9   :  { %v3335_v55 = vpop.f32.mrb[16].mxu0  ;;  %v3421_v56 = vpop.f32.mrb[16].mxu1 }
 0x6ca   :  { %v3452_v59 = vmul.f32 %v3435_v49, %v3335_v55  ;;  %v3454_v60 = vmul.f32 %v3443_v48, %v3421_v56  ;;  %v3337_v61 = vpop.f32.mrb[17].mxu0  ;;  %v3423_v62 = vpop.f32.mrb[17].mxu1 }
 0x6cb   :  { %v3453_v63 = vmul.f32 %v3439_v47, %v3337_v61  ;;  %v3455_v2 = vmul.f32 %v3447_v52, %v3423_v62  ;;  %v3339_v5 = vpop.f32.mrb[18].mxu0  ;;  %v3425_v6 = vpop.f32.mrb[18].mxu1 }
 0x6cc   :  { %v3482_v7 = vadd.f32 %v3465_v53, %v3452_v59  ;;  %v3484_v8 = vadd.f32 %v3473_v54, %v3454_v60  ;;  %v3456_v9 = vmul.f32 %v3435_v49, %v3339_v5  ;;  %v3458_v10 = vmul.f32 %v3443_v48, %v3425_v6  ;;  %v3341_v11 = vpop.f32.mrb[19].mxu0  ;;  %v3427_v12 = vpop.f32.mrb[19].mxu1 }
 0x6cd   :  { %v3483_v13 = vadd.f32 %v3469_v57, %v3453_v63  ;;  %v3485_v14 = vadd.f32 %v3477_v58, %v3455_v2  ;;  %v3457_v15 = vmul.f32 %v3439_v47, %v3341_v11  ;;  %v3459_v16 = vmul.f32 %v3447_v52, %v3427_v12  ;;  %v3543_v47 = vld [vmem:[#allocation13 + $0x148] sm:$0xff]  ;;  %v3545_v52 = vld [vmem:[#allocation13 + $0x158] sm:$0xff] }
 0x6ce   :  { %v3486_v17 = vadd.f32 %v3465_v53, %v3456_v9  ;;  %v3488_v18 = vadd.f32 %v3473_v54, %v3458_v10  ;;  %v3490_v21 = vmax.f32 %v3482_v7, 0.0  ;;  %v3492_v22 = vmax.f32 %v3484_v8, 0.0  ;;  %v3547_v63 = vld [vmem:[#allocation13 + $0x168] sm:$0xff]  ;;  %v3549_v2 = vld [vmem:[#allocation13 + $0x178] sm:$0xff]  ;;  %v3546_v9 = vld [vmem:[#allocation13 + $0x160] sm:$0xff] }
 0x6cf   :  { %v3487_v19 = vadd.f32 %v3469_v57, %v3457_v15  ;;  %v3489_v20 = vadd.f32 %v3477_v58, %v3459_v16  ;;  %v3491_v27 = vmax.f32 %v3483_v13, 0.0  ;;  %v3493_v28 = vmax.f32 %v3485_v14, 0.0  ;;  %v3542_v57 = vld [vmem:[#allocation13 + $0x140] sm:$0xff]  ;;  %v3544_v58 = vld [vmem:[#allocation13 + $0x150] sm:$0xff]  ;;  %v3551_v15 = vld [vmem:[#allocation13 + $0x188] sm:$0xff] }
 0x6d0   :  { %v3494_v23 = vmax.f32 %v3486_v17, 0.0  ;;  %v3496_v24 = vmax.f32 %v3488_v18, 0.0  ;;  %v3643_v49 = vunpack.c.h.s8.bf16 %v3539_v39  ;;  %v3645_v48 = vunpack.c.h.s8.bf16 %v3541_v40  ;;  %v3548_v10 = vld [vmem:[#allocation13 + $0x170] sm:$0xff]  ;;  %v3553_v16 = vld [vmem:[#allocation13 + $0x198] sm:$0xff]  ;;  %v3559_v40 = vld [vmem:[#allocation13 + $0x1c8] sm:$0xff] }
 0x6d1   :  { %v3495_v29 = vmax.f32 %v3487_v19, 0.0  ;;  %v3497_v34 = vmax.f32 %v3489_v20, 0.0  ;;  %v3642_v53 = vunpack.c.h.s8.bf16 %v3538_v45  ;;  %v3644_v54 = vunpack.c.h.s8.bf16 %v3540_v44  ;;  %v3558_v44 = vld [vmem:[#allocation13 + $0x1c0] sm:$0xff] }
 0x6d2   :  { %v3498_v30 = vpack.c.bf16 %v3494_v23, %v3490_v21  ;;  %v5328_v36 = vpack.c.bf16 %v3496_v24, %v3492_v22  ;;  %v3647_v55 = vunpack.c.l.s8.bf16 %v3543_v47  ;;  %v3649_v56 = vunpack.c.l.s8.bf16 %v3545_v52  ;;  %v3550_v21 = vld [vmem:[#allocation13 + $0x180] sm:$0xff]  ;;  %v3552_v22 = vld [vmem:[#allocation13 + $0x190] sm:$0xff] }
 0x6d3   :  { %v3499_v31 = vpack.c.bf16 %v3495_v29, %v3491_v27  ;;  %v3501_v35 = vpack.c.bf16 %v3497_v34, %v3493_v28  ;;  %v3646_v59 = vunpack.c.l.s8.bf16 %v3542_v57  ;;  %v3648_v60 = vunpack.c.l.s8.bf16 %v3544_v58  ;;  %v3555_v27 = vld [vmem:[#allocation13 + $0x1a8] sm:$0xff]  ;;  %v3557_v28 = vld [vmem:[#allocation13 + $0x1b8] sm:$0xff] }
 0x6d4   :  { %v3651_v61 = vunpack.c.h.s8.bf16 %v3543_v47  ;;  %v3653_v62 = vunpack.c.h.s8.bf16 %v3545_v52  ;;  %v3650_v5 = vunpack.c.h.s8.bf16 %v3542_v57  ;;  %v3652_v6 = vunpack.c.h.s8.bf16 %v3544_v58  ;;  %v3563_v52 = vld [vmem:[#allocation13 + $0x1e8] sm:$0xff]  ;;  %v3562_v58 = vld [vmem:[#allocation13 + $0x1e0] sm:$0xff] }
 0x6d5   :  { %3726 = vmatprep.mubr.bf16.mxu0 %v3499_v31  ;;  %3812 = vmatprep.mubr.bf16.mxu1 %v3499_v31  ;;  %v3655_v7 = vunpack.c.l.s8.bf16 %v3547_v63  ;;  %v3657_v8 = vunpack.c.l.s8.bf16 %v3549_v2  ;;  %v3654_v11 = vunpack.c.l.s8.bf16 %v3546_v9  ;;  %v3656_v12 = vunpack.c.l.s8.bf16 %v3548_v10 }
 0x6d6   :  { %3727 = vmatmul.mubr.bf16.vlgmr.msra.gmra.mrb[20].mxu0 %v3498_v30  ;;  %3813 = vmatmul.mubr.bf16.vlgmr.msra.gmra.mrb[20].mxu1 %v3498_v30  ;;  %v3659_v13 = vunpack.c.h.s8.bf16 %v3547_v63  ;;  %v3661_v14 = vunpack.c.h.s8.bf16 %v3549_v2  ;;  %v3658_v17 = vunpack.c.h.s8.bf16 %v3546_v9  ;;  %v3660_v18 = vunpack.c.h.s8.bf16 %v3548_v10  ;;  %v3942_v2 = vld [vmem:[#allocation14 + $0x20] sm:$0xff] }
 0x6d7   :  { %3738 = vmatpush1.bf16.msra.mxu0 %v3630_v32  ;;  %3824 = vmatpush1.bf16.msra.mxu1 %v3632_v33  ;;  %v3663_v19 = vunpack.c.l.s8.bf16 %v3551_v15  ;;  %v3665_v20 = vunpack.c.l.s8.bf16 %v3553_v16  ;;  %v3662_v23 = vunpack.c.l.s8.bf16 %v3550_v21  ;;  %v3664_v24 = vunpack.c.l.s8.bf16 %v3552_v22  ;;  %v3554_v32 = vld [vmem:[#allocation13 + $0x1a0] sm:$0xff]  ;;  %v3556_v33 = vld [vmem:[#allocation13 + $0x1b0] sm:$0xff] }
 0x6d8   :  { %3769 = vmatprep.mubr.bf16.mxu0 %v3501_v35  ;;  %3855 = vmatprep.mubr.bf16.mxu1 %v3501_v35  ;;  %v3667_v25 = vunpack.c.h.s8.bf16 %v3551_v15  ;;  %v3669_v26 = vunpack.c.h.s8.bf16 %v3553_v16  ;;  %v3666_v29 = vunpack.c.h.s8.bf16 %v3550_v21  ;;  %v3668_v34 = vunpack.c.h.s8.bf16 %v3552_v22  ;;  %v3938_v10 = vld [vmem:[#allocation14] sm:$0xff]  ;;  %v3943_v16 = vld [vmem:[#allocation14 + $0x28] sm:$0xff] }
 0x6d9   :  { %3739 = vmatprep.subr.bf16.mxu0 %v3635_v37  ;;  %3825 = vmatprep.subr.bf16.mxu1 %v3637_v38  ;;  %v3671_v30 = vunpack.c.l.s8.bf16 %v3555_v27  ;;  %v3673_v31 = vunpack.c.l.s8.bf16 %v3557_v28  ;;  %v3670_v35 = vunpack.c.l.s8.bf16 %v3554_v32  ;;  %v3672_v37 = vunpack.c.l.s8.bf16 %v3556_v33  ;;  %v3939_v22 = vld [vmem:[#allocation14 + $0x8] sm:$0xff] }
 0x6da   :  { %v3675_v38 = vunpack.c.h.s8.bf16 %v3555_v27  ;;  %v3677_v39 = vunpack.c.h.s8.bf16 %v3557_v28  ;;  %v3944_v28 = vld [vmem:[#allocation14 + $0x30] sm:$0xff] }
 0x6db   :  { %3740 = vmatpush1.bf16.msra.mxu0 %v3634_v41  ;;  %3826 = vmatpush1.bf16.msra.mxu1 %v3636_v42  ;;  %v3561_v41 = vld [vmem:[#allocation13 + $0x1d8] sm:$0xff]  ;;  %v3674_v42 = vunpack.c.h.s8.bf16 %v3554_v32  ;;  %v3940_v32 = vld [vmem:[#allocation14 + $0x10] sm:$0xff] }
 0x6dc   :  { %3741 = vmatprep.subr.bf16.mxu0 %v3639_v51  ;;  %3827 = vmatprep.subr.bf16.mxu1 %v3641_v46  ;;  %v3676_v51 = vunpack.c.h.s8.bf16 %v3556_v33  ;;  %v3679_v46 = vunpack.c.l.s8.bf16 %v3559_v40  ;;  %v3681_v45 = vunpack.c.l.s8.bf16 %v3561_v41  ;;  %v3685_v47 = vunpack.c.h.s8.bf16 %v3561_v41  ;;  %v3948_v33 = vld [vmem:[#allocation14 + $0x50] sm:$0xff] }
 0x6dd   :  { %v3975_v41 = vunpack.c.h.s8.bf16 %v3948_v33 }
 0x6df   :  { %3742 = vmatpush1.bf16.msra.mxu0 %v3638_v43  ;;  %3828 = vmatpush1.bf16.msra.mxu1 %v3640_v50  ;;  %v3560_v43 = vld [vmem:[#allocation13 + $0x1d0] sm:$0xff]  ;;  %v3678_v50 = vunpack.c.l.s8.bf16 %v3558_v44 }
 0x6e0   :  { %3743 = vmatprep.subr.bf16.mxu0 %v3643_v49  ;;  %3829 = vmatprep.subr.bf16.mxu1 %v3645_v48  ;;  %v3680_v49 = vunpack.c.l.s8.bf16 %v3560_v43  ;;  %v3683_v48 = vunpack.c.h.s8.bf16 %v3559_v40  ;;  %v3959_v40 = vunpack.c.h.s8.bf16 %v3940_v32 }
 0x6e3   :  { %3744 = vmatpush1.bf16.msra.mxu0 %v3642_v53  ;;  %3830 = vmatpush1.bf16.msra.mxu1 %v3644_v54  ;;  %v3565_v53 = vld [vmem:[#allocation13 + $0x1f8] sm:$0xff]  ;;  %v3682_v54 = vunpack.c.h.s8.bf16 %v3558_v44 }
 0x6e4   :  { %3745 = vmatprep.subr.bf16.mxu0 %v3647_v55  ;;  %3831 = vmatprep.subr.bf16.mxu1 %v3649_v56  ;;  %v3684_v55 = vunpack.c.h.s8.bf16 %v3560_v43  ;;  %v3687_v56 = vunpack.c.l.s8.bf16 %v3563_v52  ;;  %v3689_v57 = vunpack.c.l.s8.bf16 %v3565_v53  ;;  %v3693_v63 = vunpack.c.h.s8.bf16 %v3565_v53  ;;  %v3941_v44 = vld [vmem:[#allocation14 + $0x18] sm:$0xff] }
 0x6e5   :  { %v3949_v43 = vld [vmem:[#allocation14 + $0x58] sm:$0xff] }
 0x6e6   :  { %v3977_v53 = vunpack.c.h.s8.bf16 %v3949_v43 }
 0x6e7   :  { %3746 = vmatpush1.bf16.msra.mxu0 %v3646_v59  ;;  %3832 = vmatpush1.bf16.msra.mxu1 %v3648_v60  ;;  %v3564_v59 = vld [vmem:[#allocation13 + $0x1f0] sm:$0xff]  ;;  %v3686_v60 = vunpack.c.l.s8.bf16 %v3562_v58 }
 0x6e8   :  { %3747 = vmatprep.subr.bf16.mxu0 %v3651_v61  ;;  %3833 = vmatprep.subr.bf16.mxu1 %v3653_v62  ;;  %v3688_v61 = vunpack.c.l.s8.bf16 %v3564_v59  ;;  %v3691_v62 = vunpack.c.h.s8.bf16 %v3563_v52  ;;  %v3961_v52 = vunpack.c.h.s8.bf16 %v3941_v44 }
 0x6eb   :  { %3748 = vmatpush1.bf16.msra.mxu0 %v3650_v5  ;;  %3834 = vmatpush1.bf16.msra.mxu1 %v3652_v6  ;;  %v3950_v5 = vld [vmem:[#allocation14 + $0x60] sm:$0xff]  ;;  %v3690_v6 = vunpack.c.h.s8.bf16 %v3562_v58 }
 0x6ec   :  { %3749 = vmatprep.subr.bf16.mxu0 %v3655_v7  ;;  %3835 = vmatprep.subr.bf16.mxu1 %v3657_v8  ;;  %v3692_v7 = vunpack.c.h.s8.bf16 %v3564_v59  ;;  %v3962_v8 = vunpack.c.l.s8.bf16 %v3942_v2  ;;  %v3978_v9 = vunpack.c.l.s8.bf16 %v3950_v5  ;;  %v3979_v15 = vunpack.c.h.s8.bf16 %v3950_v5 }
 0x6ef   :  { %3750 = vmatpush1.bf16.msra.mxu0 %v3654_v11  ;;  %3836 = vmatpush1.bf16.msra.mxu1 %v3656_v12  ;;  %v3946_v11 = vld [vmem:[#allocation14 + $0x40] sm:$0xff]  ;;  %v3954_v12 = vunpack.c.l.s8.bf16 %v3938_v10 }
 0x6f0   :  { %3751 = vmatprep.subr.bf16.mxu0 %v3659_v13  ;;  %3837 = vmatprep.subr.bf16.mxu1 %v3661_v14  ;;  %v3970_v13 = vunpack.c.l.s8.bf16 %v3946_v11  ;;  %v3963_v14 = vunpack.c.h.s8.bf16 %v3942_v2 }
 0x6f3   :  { %3752 = vmatpush1.bf16.msra.mxu0 %v3658_v17  ;;  %3838 = vmatpush1.bf16.msra.mxu1 %v3660_v18  ;;  %v3951_v17 = vld [vmem:[#allocation14 + $0x68] sm:$0xff]  ;;  %v3955_v18 = vunpack.c.h.s8.bf16 %v3938_v10 }
 0x6f4   :  { %3753 = vmatprep.subr.bf16.mxu0 %v3663_v19  ;;  %3839 = vmatprep.subr.bf16.mxu1 %v3665_v20  ;;  %v3971_v19 = vunpack.c.h.s8.bf16 %v3946_v11  ;;  %v3964_v20 = vunpack.c.l.s8.bf16 %v3943_v16  ;;  %v3980_v21 = vunpack.c.l.s8.bf16 %v3951_v17  ;;  %v3981_v27 = vunpack.c.h.s8.bf16 %v3951_v17 }
 0x6f7   :  { %3754 = vmatpush1.bf16.msra.mxu0 %v3662_v23  ;;  %3840 = vmatpush1.bf16.msra.mxu1 %v3664_v24  ;;  %v3947_v23 = vld [vmem:[#allocation14 + $0x48] sm:$0xff]  ;;  %v3956_v24 = vunpack.c.l.s8.bf16 %v3939_v22 }
 0x6f8   :  { %3755 = vmatprep.subr.bf16.mxu0 %v3667_v25  ;;  %3841 = vmatprep.subr.bf16.mxu1 %v3669_v26  ;;  %v3972_v25 = vunpack.c.l.s8.bf16 %v3947_v23  ;;  %v3965_v26 = vunpack.c.h.s8.bf16 %v3943_v16 }
 0x6fb   :  { %3756 = vmatpush1.bf16.msra.mxu0 %v3666_v29  ;;  %3842 = vmatpush1.bf16.msra.mxu1 %v3668_v34  ;;  %v3957_v29 = vunpack.c.h.s8.bf16 %v3939_v22  ;;  %v3973_v34 = vunpack.c.h.s8.bf16 %v3947_v23 }
 0x6fc   :  { %3757 = vmatprep.subr.bf16.mxu0 %v3671_v30  ;;  %3843 = vmatprep.subr.bf16.mxu1 %v3673_v31  ;;  %v3966_v30 = vunpack.c.l.s8.bf16 %v3944_v28 }
 0x6ff   :  { %3758 = vmatpush1.bf16.msra.mxu0 %v3670_v35  ;;  %3844 = vmatpush1.bf16.msra.mxu1 %v3672_v37  ;;  %v3958_v35 = vunpack.c.l.s8.bf16 %v3940_v32  ;;  %v3974_v37 = vunpack.c.l.s8.bf16 %v3948_v33 }
 0x700   :  { %3759 = vmatprep.subr.bf16.mxu0 %v3675_v38  ;;  %3845 = vmatprep.subr.bf16.mxu1 %v3677_v39  ;;  %v3967_v38 = vunpack.c.h.s8.bf16 %v3944_v28 }
 0x703   :  { %3760 = vmatpush1.bf16.msra.mxu0 %v3674_v42  ;;  %3846 = vmatpush1.bf16.msra.mxu1 %v3676_v51  ;;  %v3945_v42 = vld [vmem:[#allocation14 + $0x38] sm:$0xff] }
 0x704   :  { %3761 = vmatprep.subr.bf16.mxu0 %v3679_v46  ;;  %3847 = vmatprep.subr.bf16.mxu1 %v3681_v45  ;;  %v3953_v51 = vld [vmem:[#allocation14 + $0x78] sm:$0xff]  ;;  %v3968_v46 = vunpack.c.l.s8.bf16 %v3945_v42 }
 0x705   :  { %v3984_v45 = vunpack.c.l.s8.bf16 %v3953_v51 }
 0x707   :  { %3762 = vmatpush1.bf16.msra.mxu0 %v3678_v50  ;;  %3848 = vmatpush1.bf16.msra.mxu1 %v3680_v49  ;;  %v3960_v50 = vunpack.c.l.s8.bf16 %v3941_v44  ;;  %v3976_v49 = vunpack.c.l.s8.bf16 %v3949_v43 }
 0x708   :  { %3763 = vmatprep.subr.bf16.mxu0 %v3683_v48  ;;  %3849 = vmatprep.subr.bf16.mxu1 %v3685_v47  ;;  %v3969_v48 = vunpack.c.h.s8.bf16 %v3945_v42  ;;  %v3985_v47 = vunpack.c.h.s8.bf16 %v3953_v51 }
 0x70b   :  { %3764 = vmatpush1.bf16.msra.mxu0 %v3682_v54  ;;  %3850 = vmatpush1.bf16.msra.mxu1 %v3684_v55  ;;  %v3866_v54 = vld [vmem:[%s5385_s16] sm:$0xf] }
 0x70c   :  { %3765 = vmatprep.subr.bf16.mxu0 %v3687_v56  ;;  %3851 = vmatprep.subr.bf16.mxu1 %v3689_v57  ;;  %v3896_v55 = vld [vmem:[%s5386_s17] sm:$0xf]  ;;  %v3871_v56 = vrot.slane %v3866_v54, %v5209_v0  ;;  %v3879_v57 = vrot.slane %v3866_v54, %v5211_v1  ;;  %v3875_v58 = vrot.slane %v3866_v54, %v5216_v3 }
 0x70d   :  { %v3883_v59 = vrot.slane %v3866_v54, %v5218_v4  ;;  %v3905_v2 = vrot.slane %v3896_v55, %v5216_v3  ;;  %v3913_v5 = vrot.slane %v3896_v55, %v5218_v4 }
 0x70f   :  { %3766 = vmatpush1.bf16.msra.mxu0 %v3686_v60  ;;  %3852 = vmatpush1.bf16.msra.mxu1 %v3688_v61  ;;  %v3901_v60 = vrot.slane %v3896_v55, %v5209_v0  ;;  %v3909_v61 = vrot.slane %v3896_v55, %v5211_v1 }
 0x710   :  { %3767 = vmatprep.subr.bf16.mxu0 %v3691_v62  ;;  %3853 = vmatprep.subr.bf16.mxu1 %v3693_v63 }
 0x713   :  { %3768 = vmatpush1.bf16.msra.mxu0 %v3690_v6  ;;  %3854 = vmatpush1.bf16.msra.mxu1 %v3692_v7 }
 0x714   :  { %4309 = vmatprep.subr.bf16.mxu0 %v3962_v8  ;;  %4331 = vmatprep.subr.bf16.mxu1 %v3978_v9 }
 0x716   :  { %3770 = vmatmul.mubr.bf16.vlgmr.msra.gmra.mrb[20].mxu0 %v5328_v36  ;;  %3856 = vmatmul.mubr.bf16.vlgmr.msra.gmra.mrb[20].mxu1 %v5328_v36  ;;  %v3952_v36 = vld [vmem:[#allocation14 + $0x70] sm:$0xff] }
 0x717   :  { %4310 = vmatpush3.bf16.msra.mxu0 %v3954_v12  ;;  %4332 = vmatpush3.bf16.msra.mxu1 %v3970_v13  ;;  %v3982_v31 = vunpack.c.l.s8.bf16 %v3952_v36  ;;  %v3983_v39 = vunpack.c.h.s8.bf16 %v3952_v36 }
 0x718   :  { %4311 = vmatprep.subr.bf16.mxu0 %v3963_v14  ;;  %4333 = vmatprep.subr.bf16.mxu1 %v3979_v15 }
 0x71b   :  { %4312 = vmatpush3.bf16.msra.mxu0 %v3955_v18  ;;  %4334 = vmatpush3.bf16.msra.mxu1 %v3971_v19 }
 0x71c   :  { %4313 = vmatprep.subr.bf16.mxu0 %v3964_v20  ;;  %4335 = vmatprep.subr.bf16.mxu1 %v3980_v21 }
 0x71f   :  { %4314 = vmatpush3.bf16.msra.mxu0 %v3956_v24  ;;  %4336 = vmatpush3.bf16.msra.mxu1 %v3972_v25 }
 0x720   :  { %4315 = vmatprep.subr.bf16.mxu0 %v3965_v26  ;;  %4337 = vmatprep.subr.bf16.mxu1 %v3981_v27 }
 0x723   :  { %4316 = vmatpush3.bf16.msra.mxu0 %v3957_v29  ;;  %4338 = vmatpush3.bf16.msra.mxu1 %v3973_v34 }
 0x724   :  { %4317 = vmatprep.subr.bf16.mxu0 %v3966_v30  ;;  %4339 = vmatprep.subr.bf16.mxu1 %v3982_v31 }
 0x727   :  { %4318 = vmatpush3.bf16.msra.mxu0 %v3958_v35  ;;  %4340 = vmatpush3.bf16.msra.mxu1 %v3974_v37 }
 0x728   :  { %4319 = vmatprep.subr.bf16.mxu0 %v3967_v38  ;;  %4341 = vmatprep.subr.bf16.mxu1 %v3983_v39 }
 0x72b   :  { %4320 = vmatpush3.bf16.msra.mxu0 %v3959_v40  ;;  %4342 = vmatpush3.bf16.msra.mxu1 %v3975_v41 }
 0x72c   :  { %4321 = vmatprep.subr.bf16.mxu0 %v3968_v46  ;;  %4343 = vmatprep.subr.bf16.mxu1 %v3984_v45  ;;  %v4307_v46 = vld [vmem:[%s5388_s19] ss:$0 sm:$0xff]  ;;  %s4913_s19 = scalar_lea.vmem %s4094_s4, 256 }
 0x72d   :  { %p4914_p8 = scmp.ne.s32.totalorder %s4094_s4, %s4913_s19  ;;  %p4919_p10 = scmp.lt.s32.totalorder %s4913_s19, %s4913_s19 }
 0x72f   :  { %4322 = vmatpush3.bf16.msra.mxu0 %v3960_v50  ;;  %4344 = vmatpush3.bf16.msra.mxu1 %v3976_v49  ;;  %p4920_p11 = por %p4919_p10, %p4918_p9 }
 0x730   :  { %4323 = vmatprep.subr.bf16.mxu0 %v3969_v48  ;;  %4345 = vmatprep.subr.bf16.mxu1 %v3985_v47  ;;  %v4308_v48 = vld [vmem:[%s5412_s5] ss:$0 sm:$0xff] }
 0x731   :  { %p4921_p12 = pnand %p4920_p11, %p4914_p8 }
 0x733   :  { %4324 = vmatpush3.bf16.msra.mxu0 %v3961_v52  ;;  %4346 = vmatpush3.bf16.msra.mxu1 %v3977_v53 }
 0x7e9   :  { %v3771_v62 = vpop.f32.mrb[20].mxu0  ;;  %v3857_v63 = vpop.f32.mrb[20].mxu1 }
 0x7ea   :  { %v3888_v6 = vmul.f32 %v3871_v56, %v3771_v62  ;;  %v3890_v7 = vmul.f32 %v3879_v57, %v3857_v63  ;;  %v3773_v8 = vpop.f32.mrb[21].mxu0  ;;  %v3859_v9 = vpop.f32.mrb[21].mxu1 }
 0x7eb   :  { %v3889_v10 = vmul.f32 %v3875_v58, %v3773_v8  ;;  %v3891_v11 = vmul.f32 %v3883_v59, %v3859_v9  ;;  %v3775_v12 = vpop.f32.mrb[22].mxu0  ;;  %v3861_v13 = vpop.f32.mrb[22].mxu1 }
 0x7ec   :  { %v3918_v14 = vadd.f32 %v3901_v60, %v3888_v6  ;;  %v3920_v15 = vadd.f32 %v3909_v61, %v3890_v7  ;;  %v3892_v16 = vmul.f32 %v3871_v56, %v3775_v12  ;;  %v3894_v0 = vmul.f32 %v3879_v57, %v3861_v13  ;;  %v3777_v17 = vpop.f32.mrb[23].mxu0  ;;  %v3863_v1 = vpop.f32.mrb[23].mxu1 }
 0x7ed   :  { %v3919_v18 = vadd.f32 %v3905_v2, %v3889_v10  ;;  %v3921_v19 = vadd.f32 %v3913_v5, %v3891_v11  ;;  %v3893_v20 = vmul.f32 %v3875_v58, %v3777_v17  ;;  %v3895_v3 = vmul.f32 %v3883_v59, %v3863_v1 }
 0x7ee   :  { %v3922_v21 = vadd.f32 %v3901_v60, %v3892_v16  ;;  %v3924_v4 = vadd.f32 %v3909_v61, %v3894_v0  ;;  %v3926_v24 = vmax.f32 %v3918_v14, 0.0  ;;  %v3928_v25 = vmax.f32 %v3920_v15, 0.0 }
 0x7ef   :  { %v3923_v22 = vadd.f32 %v3905_v2, %v3893_v20  ;;  %v3925_v23 = vadd.f32 %v3913_v5, %v3895_v3  ;;  %v3927_v28 = vmax.f32 %v3919_v18, 0.0  ;;  %v3929_v36 = vmax.f32 %v3921_v19, 0.0 }
 0x7f0   :  { %v3930_v26 = vmax.f32 %v3922_v21, 0.0  ;;  %v3932_v27 = vmax.f32 %v3924_v4, 0.0 }
 0x7f1   :  { %v3931_v29 = vmax.f32 %v3923_v22, 0.0  ;;  %v3933_v34 = vmax.f32 %v3925_v23, 0.0 }
 0x7f2   :  { %v3934_v30 = vpack.c.bf16 %v3930_v26, %v3926_v24  ;;  %v3936_v31 = vpack.c.bf16 %v3932_v27, %v3928_v25 }
 0x7f3   :  { %v3935_v32 = vpack.c.bf16 %v3931_v29, %v3927_v28  ;;  %v3937_v33 = vpack.c.bf16 %v3933_v34, %v3929_v36 }
 0x7f5   :  { %4018 = vmatprep.mubr.bf16.mxu0 %v3935_v32  ;;  %4059 = vmatprep.mubr.bf16.mxu1 %v3937_v33 }
 0x7f6   :  { %4019 = vmatmul.mubr.bf16.vlgmr.msra.gmra.mrb[24].mxu0 %v3934_v30  ;;  %4060 = vmatmul.mubr.bf16.vlgmr.msra.gmra.mrb[24].mxu1 %v3936_v31 }
 0x8c9   :  { %v4325_v35 = vpop.f32.mrb[24].mxu0  ;;  %v4347_v37 = vpop.f32.mrb[24].mxu1 }
 0x8ca   :  { %v4326_v38 = vpop.f32.mrb[25].mxu0  ;;  %v4348_v39 = vpop.f32.mrb[25].mxu1 }
 0x8cb   :  { %v4327_v40 = vadd.f32 %v4326_v38, %v4325_v35  ;;  %v4349_v41 = vadd.f32 %v4348_v39, %v4347_v37  ;;  %v4328_v42 = vpop.f32.mrb[26].mxu0  ;;  %v4350_v51 = vpop.f32.mrb[26].mxu1 }
 0x8cc   :  { %v4329_v45 = vpop.f32.mrb[27].mxu0  ;;  %v4351_v44 = vpop.f32.mrb[27].mxu1 }
 0x8cd   :  { %v4062_v43 = vadd.f32 %v4349_v41, %v4327_v40  ;;  %v4330_v50 = vadd.f32 %v4329_v45, %v4328_v42  ;;  %v4352_v49 = vadd.f32 %v4351_v44, %v4350_v51 }
 0x8cf   :  { %v4075_v47 = vmul.f32 %v4307_v46, %v4062_v43  ;;  %v4065_v52 = vadd.f32 %v4352_v49, %v4330_v50 }
 0x8d1   :  { %v4076_v53 = vmul.f32 %v4307_v46, %v4065_v52  ;;  %v4084_v54 = vadd.f32 %v4308_v48, %v4075_v47 }
 0x8d3   :  { %v4085_v55 = vadd.f32 %v4308_v48, %v4076_v53  ;;  %4086 = vst [vmem:[#allocation16] sm:$0xff] %v4084_v54 }
 0x8d5   :  { %4087 = vst [vmem:[#allocation16 + $0x8] sm:$0xff] %v4085_v55 }
 0x8d6   :  { %4924 = shalt.err (!%p4921_p12)
}
 0x8d7   :  { %s5413_s30 = sld [smem:[#allocation30_spill]] }
 0x8dd   :  { %s4925_s9 = scalar_lea.hbm %s5413_s30, 256 }
 0x8de   :  { %p4926_p13 = scmp.ne.s32.totalorder %s5413_s30, %s4925_s9  ;;  %p4929_p0 = scmp.lt.u32.totalorder %s4925_s9, %s5413_s30 }
 0x8e0   :  { %p4931_p1 = pnand %p4929_p0, %p4926_p13 }
 0x8e2   :  { %4934 = shalt.err (!%p4931_p1)
}
 0x8e3   :  { %4099 = dma.vmem_to_hbm [thread:$0]  %s4094_s4, 256, %s5413_s30, [#allocation4], %s4961_s15, %s4961_s15, %s4962_s22  }
 0x8e4   :  { %4945 = dma.done.wait [#allocation4], 256  }
 0x8e5   :  { %4946 = vsyncadd [#allocation4], 4294967040 }
 0x8e6   :  { %4103 = vsyncpa [#allocation3], 1 }
 0x8e7   :  { %4104 = vsyncpa [#allocation6], 1 }
 0x8e8   :  { %4105 = vsyncpa [#allocation9], 1 }
 0x8e9   :  { %4106 = vsyncpa [#allocation12], 1 }
 0x8ea   :  { %4107 = vsyncpa [#allocation15], 1 }
 0x8eb   :  { %4108 = vsyncpa [#allocation4], 1 }

</bundles_post_ra>
